<compile_context>
chip_gen: v5e
topology: v5e:2x2
jax: 0.10.0
libtpu: 0.0.40
codegen_flags: <defaults>
</compile_context>

<pallas_src>
import functools

import numpy as np
import jax
import jax.numpy as jnp
from jax.experimental import pallas as pl
from jax.experimental.pallas import tpu as pltpu


def _conv_kernel(x_ref, w_ref, m_ref, conv_ref, sum_ref, sq_ref, xpad_ref,
                 *, W, KH, KW, pad, s_left):
    """Per-image 'same' conv, lane-dense, plus partial BN statistics.

    x_ref    : (1, Cin, H*W)      one image, channels on sublanes, H*W on lanes
    w_ref    : (Cout, KH*KW*Cin)  taps flattened in (kh, kw, cin) order
    m_ref    : (KW, 1, H*W)       per-kw column-validity masks (0/1)
    conv_ref : (1, Cout, H*W)     conv output (conv bias dropped; BN cancels it)
    sum_ref  : (1, Cout, 1)       per-channel sum over this image
    sq_ref   : (1, Cout, 1)       per-channel sum of squares over this image
    xpad_ref : VMEM scratch (Cin, s_left + H*W + pad*W + pad)
    """
    _, Cin, HW = x_ref.shape
    Cout = w_ref.shape[0]

    # In-kernel zero padding of the flattened image.  s_left is a multiple of
    # 128, so the image store below is lane-aligned.
    xpad_ref[...] = jnp.zeros_like(xpad_ref)
    xpad_ref[:, s_left:s_left + HW] = x_ref[0]

    # A tap (kh, kw) is a pure static lane shift of the flattened padded image:
    # out[q] needs x_flat[q + (kh - pad) * W + (kw - pad)].  Rows that run off
    # the top/bottom land in the zero pad; columns that wrap across a row
    # boundary are killed by the per-kw mask.  No reshapes / relayouts per tap.
    acc = jnp.zeros((Cout, HW), jnp.float32)
    for kh in range(KH):
        for kw in range(KW):
            shift = (kh - pad) * W + (kw - pad)
            base = s_left + shift
            xs = xpad_ref[:, base:base + HW]                 # (Cin, HW)
            if kw != pad:
                xs = xs * m_ref[kw]                          # (1, HW) broadcast
            t = kh * KW + kw
            wt = w_ref[:, t * Cin:(t + 1) * Cin]             # (Cout, Cin)
            acc = acc + jnp.dot(wt, xs, preferred_element_type=jnp.float32)

    conv_ref[...] = acc[None]
    # Per-image partial BN statistics; finalized (over the whole batch) in pass 2.
    sum_ref[...] = jnp.sum(acc, axis=-1, keepdims=True)[None]
    sq_ref[...] = jnp.sum(acc * acc, axis=-1, keepdims=True)[None]


def _bn_relu_kernel(conv_ref, sum_ref, sq_ref, g_ref, b_ref, o_ref, *, count, eps):
    """BatchNorm (training-mode batch stats, biased var) + ReLU, lane-dense.

    conv_ref : (1, Cout, H*W)   conv output for one image
    sum_ref  : (N, Cout, 1)     per-image channel sums (all images)
    sq_ref   : (N, Cout, 1)     per-image channel sums of squares
    g_ref    : (Cout, 1)        BN gamma
    b_ref    : (Cout, 1)        BN beta
    o_ref    : (1, Cout, H*W)
    """
    inv = 1.0 / count
    mean = jnp.sum(sum_ref[...], axis=0) * inv                 # (Cout, 1)
    var = jnp.sum(sq_ref[...], axis=0) * inv - mean * mean     # biased variance
    scale = g_ref[...] * jax.lax.rsqrt(var + eps)              # gamma folded in
    shift = b_ref[...] - mean * scale
    o_ref[...] = jnp.maximum(conv_ref[...] * scale[None] + shift[None], 0.0)


def conv_bn_relu(x_nchw, w_oihw, bias, gamma, beta, *, stride=1, padding=3, eps=1e-5):
    """Fused Conv2d ('same') + BatchNorm2d(train-mode stats) + ReLU.  x in NCHW."""
    assert stride == 1, "only the module default stride=1 is implemented"
    N, Cin, H, W = x_nchw.shape
    Cout, Cin_w, KH, KW = w_oihw.shape
    assert Cin == Cin_w
    assert KH == KW and 2 * padding == KH - 1, "kernel assumes 'same' convolution"
    # Conv bias added before training-mode BN is exactly cancelled by the mean
    # subtraction, so it is not sent to the kernel at all.
    del bias

    HW = H * W
    S = padding * W + padding                 # max |lane shift| of any tap
    S_LEFT = pl.cdiv(S, 128) * 128            # lane-aligned left pad of scratch
    PADW = S_LEFT + HW + S

    # Only free reshapes on activations (contiguous dims); no transpose, no pad.
    x2 = x_nchw.reshape(N, Cin, HW).astype(jnp.float32)
    w2 = jnp.transpose(w_oihw, (0, 2, 3, 1)).reshape(Cout, KH * KW * Cin)
    w2 = w2.astype(jnp.float32)               # tiny (Cout, KH*KW*Cin) matrix
    g2 = gamma.reshape(Cout, 1).astype(jnp.float32)
    b2 = beta.reshape(Cout, 1).astype(jnp.float32)

    # Host-built per-kw column-validity masks, shape (KW, 1, H*W).
    wcol = np.arange(HW, dtype=np.int64) % W
    masks = np.stack(
        [((wcol + (kw - padding) >= 0) & (wcol + (kw - padding) < W))
         for kw in range(KW)]
    ).astype(np.float32).reshape(KW, 1, HW)
    masks = jnp.asarray(masks)

    cparams = pltpu.CompilerParams(
        dimension_semantics=("parallel",),     # v7x: split batch across 2 TCs
        vmem_limit_bytes=32 * 1024 * 1024,     # tiles are << v7x's 64 MiB VMEM
    )

    conv_kernel = functools.partial(
        _conv_kernel, W=W, KH=KH, KW=KW, pad=padding, s_left=S_LEFT)

    # Pass 1: lane-dense conv + per-image partial BN sums, tiled over N.
    conv_out, sums, sqsums = pl.pallas_call(
        conv_kernel,
        out_shape=(
            jax.ShapeDtypeStruct((N, Cout, HW), jnp.float32),
            jax.ShapeDtypeStruct((N, Cout, 1), jnp.float32),
            jax.ShapeDtypeStruct((N, Cout, 1), jnp.float32),
        ),
        grid=(N,),
        in_specs=[
            pl.BlockSpec((1, Cin, HW), lambda n: (n, 0, 0)),
            pl.BlockSpec((Cout, KH * KW * Cin), lambda n: (0, 0)),
            pl.BlockSpec((KW, 1, HW), lambda n: (0, 0, 0)),
        ],
        out_specs=(
            pl.BlockSpec((1, Cout, HW), lambda n: (n, 0, 0)),
            pl.BlockSpec((1, Cout, 1), lambda n: (n, 0, 0)),
            pl.BlockSpec((1, Cout, 1), lambda n: (n, 0, 0)),
        ),
        scratch_shapes=[pltpu.VMEM((Cin, PADW), jnp.float32)],
        compiler_params=cparams,
    )(x2, w2, masks)

    # Pass 2: finalize exact batch statistics, apply BN + ReLU, tiled over N.
    bn_kernel = functools.partial(_bn_relu_kernel, count=float(N * HW), eps=eps)
    out = pl.pallas_call(
        bn_kernel,
        out_shape=jax.ShapeDtypeStruct((N, Cout, HW), jnp.float32),
        grid=(N,),
        in_specs=[
            pl.BlockSpec((1, Cout, HW), lambda n: (n, 0, 0)),
            pl.BlockSpec((N, Cout, 1), lambda n: (0, 0, 0)),
            pl.BlockSpec((N, Cout, 1), lambda n: (0, 0, 0)),
            pl.BlockSpec((Cout, 1), lambda n: (0, 0)),
            pl.BlockSpec((Cout, 1), lambda n: (0, 0)),
        ],
        out_specs=pl.BlockSpec((1, Cout, HW), lambda n: (n, 0, 0)),
        compiler_params=cparams,
    )(conv_out, sums, sqsums, g2, b2)

    return out.reshape(N, Cout, H, W)          # free reshape back to NCHW


def _reference(x, w, b, gamma, beta, *, padding=3, eps=1e-5):
    conv = jax.lax.conv_general_dilated(
        x, w, window_strides=(1, 1),
        padding=((padding, padding), (padding, padding)),
        dimension_numbers=("NCHW", "OIHW", "NCHW"),
    ) + b[None, :, None, None]
    mean = conv.mean(axis=(0, 2, 3), keepdims=True)
    var = conv.var(axis=(0, 2, 3), keepdims=True)  # biased, matches torch BN train mode
    out = (conv - mean) / jnp.sqrt(var + eps)
    out = out * gamma[None, :, None, None] + beta[None, :, None, None]
    return jnp.maximum(out, 0.0)


if __name__ == "__main__":
    # Small shapes consistent with the module (in_ch=out_ch=4, k=7, s=1, p=3).
    N, Cin, H, W = 2, 4, 16, 16
    Cout, KH, KW = 4, 7, 7

    key = jax.random.PRNGKey(0)
    kx, kw, kb, kg, kbeta = jax.random.split(key, 5)

    x = jax.random.normal(kx, (N, Cin, H, W), dtype=jnp.float32)
    w = jax.random.normal(kw, (Cout, Cin, KH, KW), dtype=jnp.float32) * 0.05
    b = jax.random.normal(kb, (Cout,), dtype=jnp.float32) * 0.1
    gamma = 1.0 + 0.1 * jax.random.normal(kg, (Cout,), dtype=jnp.float32)
    beta = 0.1 * jax.random.normal(kbeta, (Cout,), dtype=jnp.float32)

    out = conv_bn_relu(x, w, b, gamma, beta, stride=1, padding=3)
    out = jax.block_until_ready(out)

    ref = jax.block_until_ready(_reference(x, w, b, gamma, beta, padding=3))
    assert out.shape == (N, Cout, H, W), out.shape
    assert jnp.allclose(out, ref, atol=2e-3, rtol=2e-3), float(jnp.max(jnp.abs(out - ref)))

    # TODO(synk): BatchNorm running_mean/running_var in-place updates (training
    # side effect) are not modeled; only the returned activation is reproduced.
    print("KERNEL_OK")
</pallas_src>

<mosaic_0001>
module attributes {stable_mosaic.version = 11 : i64} {
  func.func @_conv_kernel(%arg0: i32, %arg1: memref<1x4x256xf32, #tpu.memory_space<vmem>>, %arg2: memref<4x196xf32, #tpu.memory_space<vmem>>, %arg3: memref<7x1x256xf32, #tpu.memory_space<vmem>>, %arg4: memref<1x4x256xf32, #tpu.memory_space<vmem>>, %arg5: memref<1x4x1xf32, #tpu.memory_space<vmem>>, %arg6: memref<1x4x1xf32, #tpu.memory_space<vmem>>, %arg7: memref<4x435xf32, #tpu.memory_space<vmem>>) attributes {dimension_semantics = [#tpu.dimension_semantics<parallel>], iteration_bounds = array<i64: 2>, scalar_prefetch = 0 : i64, scratch_operands = 1 : i64, tpu.core_type = #tpu.core_type<tc>, window_params = [{transform_indices = @transform_0, window_bounds = array<i64: 1, 4, 256>}, {pipeline_mode = #tpu.pipeline_mode<synchronous>, transform_indices = @transform_1, window_bounds = array<i64: 4, 196>}, {pipeline_mode = #tpu.pipeline_mode<synchronous>, transform_indices = @transform_2, window_bounds = array<i64: 7, 1, 256>}, {transform_indices = @transform_3, window_bounds = array<i64: 1, 4, 256>}, {transform_indices = @transform_4, window_bounds = array<i64: 1, 4, 1>}, {transform_indices = @transform_5, window_bounds = array<i64: 1, 4, 1>}]} {
    %cst = arith.constant 0.000000e+00 : f32
    %0 = vector.broadcast %cst : f32 to vector<4x435xf32>
    %c0 = arith.constant 0 : index
    %c0_0 = arith.constant 0 : index
    %1 = vector.load %arg7[%c0, %c0_0] : memref<4x435xf32, #tpu.memory_space<vmem>>, vector<4x435xf32>
    tpu.vector_store %arg7[%c0, %c0_0], %0 {strides = array<i32>} : memref<4x435xf32, #tpu.memory_space<vmem>>, vector<4x435xf32>,
    %c0_1 = arith.constant 0 : index
    %c0_2 = arith.constant 0 : index
    %c0_3 = arith.constant 0 : index
    %2 = vector.load %arg1[%c0_1, %c0_2, %c0_3] : memref<1x4x256xf32, #tpu.memory_space<vmem>>, vector<1x4x256xf32>
    %3 = vector.shape_cast %2 : vector<1x4x256xf32> to vector<4x256xf32>
    %c0_4 = arith.constant 0 : index
    %c128 = arith.constant 128 : index
    %4 = vector.load %arg7[%c0_4, %c128] : memref<4x435xf32, #tpu.memory_space<vmem>>, vector<4x256xf32>
    tpu.vector_store %arg7[%c0_4, %c128], %3 {strides = array<i32>} : memref<4x435xf32, #tpu.memory_space<vmem>>, vector<4x256xf32>,
    %cst_5 = arith.constant 0.000000e+00 : f32
    %5 = vector.broadcast %cst_5 : f32 to vector<4x256xf32>
    %c0_6 = arith.constant 0 : index
    %c77 = arith.constant 77 : index
    %6 = vector.load %arg7[%c0_6, %c77] : memref<4x435xf32, #tpu.memory_space<vmem>>, vector<4x256xf32>
    %c0_7 = arith.constant 0 : index
    %c0_8 = arith.constant 0 : index
    %c0_9 = arith.constant 0 : index
    %7 = vector.load %arg3[%c0_7, %c0_8, %c0_9] : memref<7x1x256xf32, #tpu.memory_space<vmem>>, vector<1x1x256xf32>
    %8 = vector.shape_cast %7 : vector<1x1x256xf32> to vector<1x256xf32>
    %9 = vector.broadcast %8 : vector<1x256xf32> to vector<4x256xf32>
    %10 = arith.mulf %6, %9 : vector<4x256xf32>
    %c0_10 = arith.constant 0 : index
    %c0_11 = arith.constant 0 : index
    %11 = vector.load %arg2[%c0_10, %c0_11] : memref<4x196xf32, #tpu.memory_space<vmem>>, vector<4x4xf32>
    %cst_12 = arith.constant dense<0.000000e+00> : vector<4x256xf32>
    %12 = tpu.matmul %11, %10, %cst_12 {dimension_numbers = #tpu.dot_dimension_numbers<[1], [0], [0], [1], [0, 0, 1, 1], [], []>} : vector<4x4xf32>, vector<4x256xf32>, vector<4x256xf32> -> vector<4x256xf32>
    %13 = arith.addf %5, %12 : vector<4x256xf32>
    %c0_13 = arith.constant 0 : index
    %c78 = arith.constant 78 : index
    %14 = vector.load %arg7[%c0_13, %c78] : memref<4x435xf32, #tpu.memory_space<vmem>>, vector<4x256xf32>
    %c1 = arith.constant 1 : index
    %c0_14 = arith.constant 0 : index
    %c0_15 = arith.constant 0 : index
    %15 = vector.load %arg3[%c1, %c0_14, %c0_15] : memref<7x1x256xf32, #tpu.memory_space<vmem>>, vector<1x1x256xf32>
    %16 = vector.shape_cast %15 : vector<1x1x256xf32> to vector<1x256xf32>
    %17 = vector.broadcast %16 : vector<1x256xf32> to vector<4x256xf32>
    %18 = arith.mulf %14, %17 : vector<4x256xf32>
    %c0_16 = arith.constant 0 : index
    %c4 = arith.constant 4 : index
    %19 = vector.load %arg2[%c0_16, %c4] : memref<4x196xf32, #tpu.memory_space<vmem>>, vector<4x4xf32>
    %cst_17 = arith.constant dense<0.000000e+00> : vector<4x256xf32>
    %20 = tpu.matmul %19, %18, %cst_17 {dimension_numbers = #tpu.dot_dimension_numbers<[1], [0], [0], [1], [0, 0, 1, 1], [], []>} : vector<4x4xf32>, vector<4x256xf32>, vector<4x256xf32> -> vector<4x256xf32>
    %21 = arith.addf %13, %20 : vector<4x256xf32>
    %c0_18 = arith.constant 0 : index
    %c79 = arith.constant 79 : index
    %22 = vector.load %arg7[%c0_18, %c79] : memref<4x435xf32, #tpu.memory_space<vmem>>, vector<4x256xf32>
    %c2 = arith.constant 2 : index
    %c0_19 = arith.constant 0 : index
    %c0_20 = arith.constant 0 : index
    %23 = vector.load %arg3[%c2, %c0_19, %c0_20] : memref<7x1x256xf32, #tpu.memory_space<vmem>>, vector<1x1x256xf32>
    %24 = vector.shape_cast %23 : vector<1x1x256xf32> to vector<1x256xf32>
    %25 = vector.broadcast %24 : vector<1x256xf32> to vector<4x256xf32>
    %26 = arith.mulf %22, %25 : vector<4x256xf32>
    %c0_21 = arith.constant 0 : index
    %c8 = arith.constant 8 : index
    %27 = vector.load %arg2[%c0_21, %c8] : memref<4x196xf32, #tpu.memory_space<vmem>>, vector<4x4xf32>
    %cst_22 = arith.constant dense<0.000000e+00> : vector<4x256xf32>
    %28 = tpu.matmul %27, %26, %cst_22 {dimension_numbers = #tpu.dot_dimension_numbers<[1], [0], [0], [1], [0, 0, 1, 1], [], []>} : vector<4x4xf32>, vector<4x256xf32>, vector<4x256xf32> -> vector<4x256xf32>
    %29 = arith.addf %21, %28 : vector<4x256xf32>
    %c0_23 = arith.constant 0 : index
    %c80 = arith.constant 80 : index
    %30 = vector.load %arg7[%c0_23, %c80] : memref<4x435xf32, #tpu.memory_space<vmem>>, vector<4x256xf32>
    %c0_24 = arith.constant 0 : index
    %c12 = arith.constant 12 : index
    %31 = vector.load %arg2[%c0_24, %c12] : memref<4x196xf32, #tpu.memory_space<vmem>>, vector<4x4xf32>
    %cst_25 = arith.constant dense<0.000000e+00> : vector<4x256xf32>
    %32 = tpu.matmul %31, %30, %cst_25 {dimension_numbers = #tpu.dot_dimension_numbers<[1], [0], [0], [1], [0, 0, 1, 1], [], []>} : vector<4x4xf32>, vector<4x256xf32>, vector<4x256xf32> -> vector<4x256xf32>
    %33 = arith.addf %29, %32 : vector<4x256xf32>
    %c0_26 = arith.constant 0 : index
    %c81 = arith.constant 81 : index
    %34 = vector.load %arg7[%c0_26, %c81] : memref<4x435xf32, #tpu.memory_space<vmem>>, vector<4x256xf32>
    %c4_27 = arith.constant 4 : index
    %c0_28 = arith.constant 0 : index
    %c0_29 = arith.constant 0 : index
    %35 = vector.load %arg3[%c4_27, %c0_28, %c0_29] : memref<7x1x256xf32, #tpu.memory_space<vmem>>, vector<1x1x256xf32>
    %36 = vector.shape_cast %35 : vector<1x1x256xf32> to vector<1x256xf32>
    %37 = vector.broadcast %36 : vector<1x256xf32> to vector<4x256xf32>
    %38 = arith.mulf %34, %37 : vector<4x256xf32>
    %c0_30 = arith.constant 0 : index
    %c16 = arith.constant 16 : index
    %39 = vector.load %arg2[%c0_30, %c16] : memref<4x196xf32, #tpu.memory_space<vmem>>, vector<4x4xf32>
    %cst_31 = arith.constant dense<0.000000e+00> : vector<4x256xf32>
    %40 = tpu.matmul %39, %38, %cst_31 {dimension_numbers = #tpu.dot_dimension_numbers<[1], [0], [0], [1], [0, 0, 1, 1], [], []>} : vector<4x4xf32>, vector<4x256xf32>, vector<4x256xf32> -> vector<4x256xf32>
    %41 = arith.addf %33, %40 : vector<4x256xf32>
    %c0_32 = arith.constant 0 : index
    %c82 = arith.constant 82 : index
    %42 = vector.load %arg7[%c0_32, %c82] : memref<4x435xf32, #tpu.memory_space<vmem>>, vector<4x256xf32>
    %c5 = arith.constant 5 : index
    %c0_33 = arith.constant 0 : index
    %c0_34 = arith.constant 0 : index
    %43 = vector.load %arg3[%c5, %c0_33, %c0_34] : memref<7x1x256xf32, #tpu.memory_space<vmem>>, vector<1x1x256xf32>
    %44 = vector.shape_cast %43 : vector<1x1x256xf32> to vector<1x256xf32>
    %45 = vector.broadcast %44 : vector<1x256xf32> to vector<4x256xf32>
    %46 = arith.mulf %42, %45 : vector<4x256xf32>
    %c0_35 = arith.constant 0 : index
    %c20 = arith.constant 20 : index
    %47 = vector.load %arg2[%c0_35, %c20] : memref<4x196xf32, #tpu.memory_space<vmem>>, vector<4x4xf32>
    %cst_36 = arith.constant dense<0.000000e+00> : vector<4x256xf32>
    %48 = tpu.matmul %47, %46, %cst_36 {dimension_numbers = #tpu.dot_dimension_numbers<[1], [0], [0], [1], [0, 0, 1, 1], [], []>} : vector<4x4xf32>, vector<4x256xf32>, vector<4x256xf32> -> vector<4x256xf32>
    %49 = arith.addf %41, %48 : vector<4x256xf32>
    %c0_37 = arith.constant 0 : index
    %c83 = arith.constant 83 : index
    %50 = vector.load %arg7[%c0_37, %c83] : memref<4x435xf32, #tpu.memory_space<vmem>>, vector<4x256xf32>
    %c6 = arith.constant 6 : index
    %c0_38 = arith.constant 0 : index
    %c0_39 = arith.constant 0 : index
    %51 = vector.load %arg3[%c6, %c0_38, %c0_39] : memref<7x1x256xf32, #tpu.memory_space<vmem>>, vector<1x1x256xf32>
    %52 = vector.shape_cast %51 : vector<1x1x256xf32> to vector<1x256xf32>
    %53 = vector.broadcast %52 : vector<1x256xf32> to vector<4x256xf32>
    %54 = arith.mulf %50, %53 : vector<4x256xf32>
    %c0_40 = arith.constant 0 : index
    %c24 = arith.constant 24 : index
    %55 = vector.load %arg2[%c0_40, %c24] : memref<4x196xf32, #tpu.memory_space<vmem>>, vector<4x4xf32>
    %cst_41 = arith.constant dense<0.000000e+00> : vector<4x256xf32>
    %56 = tpu.matmul %55, %54, %cst_41 {dimension_numbers = #tpu.dot_dimension_numbers<[1], [0], [0], [1], [0, 0, 1, 1], [], []>} : vector<4x4xf32>, vector<4x256xf32>, vector<4x256xf32> -> vector<4x256xf32>
    %57 = arith.addf %49, %56 : vector<4x256xf32>
    %c0_42 = arith.constant 0 : index
    %c93 = arith.constant 93 : index
    %58 = vector.load %arg7[%c0_42, %c93] : memref<4x435xf32, #tpu.memory_space<vmem>>, vector<4x256xf32>
    %c0_43 = arith.constant 0 : index
    %c0_44 = arith.constant 0 : index
    %c0_45 = arith.constant 0 : index
    %59 = vector.load %arg3[%c0_43, %c0_44, %c0_45] : memref<7x1x256xf32, #tpu.memory_space<vmem>>, vector<1x1x256xf32>
    %60 = vector.shape_cast %59 : vector<1x1x256xf32> to vector<1x256xf32>
    %61 = vector.broadcast %60 : vector<1x256xf32> to vector<4x256xf32>
    %62 = arith.mulf %58, %61 : vector<4x256xf32>
    %c0_46 = arith.constant 0 : index
    %c28 = arith.constant 28 : index
    %63 = vector.load %arg2[%c0_46, %c28] : memref<4x196xf32, #tpu.memory_space<vmem>>, vector<4x4xf32>
    %cst_47 = arith.constant dense<0.000000e+00> : vector<4x256xf32>
    %64 = tpu.matmul %63, %62, %cst_47 {dimension_numbers = #tpu.dot_dimension_numbers<[1], [0], [0], [1], [0, 0, 1, 1], [], []>} : vector<4x4xf32>, vector<4x256xf32>, vector<4x256xf32> -> vector<4x256xf32>
    %65 = arith.addf %57, %64 : vector<4x256xf32>
    %c0_48 = arith.constant 0 : index
    %c94 = arith.constant 94 : index
    %66 = vector.load %arg7[%c0_48, %c94] : memref<4x435xf32, #tpu.memory_space<vmem>>, vector<4x256xf32>
    %c1_49 = arith.constant 1 : index
    %c0_50 = arith.constant 0 : index
    %c0_51 = arith.constant 0 : index
    %67 = vector.load %arg3[%c1_49, %c0_50, %c0_51] : memref<7x1x256xf32, #tpu.memory_space<vmem>>, vector<1x1x256xf32>
    %68 = vector.shape_cast %67 : vector<1x1x256xf32> to vector<1x256xf32>
    %69 = vector.broadcast %68 : vector<1x256xf32> to vector<4x256xf32>
    %70 = arith.mulf %66, %69 : vector<4x256xf32>
    %c0_52 = arith.constant 0 : index
    %c32 = arith.constant 32 : index
    %71 = vector.load %arg2[%c0_52, %c32] : memref<4x196xf32, #tpu.memory_space<vmem>>, vector<4x4xf32>
    %cst_53 = arith.constant dense<0.000000e+00> : vector<4x256xf32>
    %72 = tpu.matmul %71, %70, %cst_53 {dimension_numbers = #tpu.dot_dimension_numbers<[1], [0], [0], [1], [0, 0, 1, 1], [], []>} : vector<4x4xf32>, vector<4x256xf32>, vector<4x256xf32> -> vector<4x256xf32>
    %73 = arith.addf %65, %72 : vector<4x256xf32>
    %c0_54 = arith.constant 0 : index
    %c95 = arith.constant 95 : index
    %74 = vector.load %arg7[%c0_54, %c95] : memref<4x435xf32, #tpu.memory_space<vmem>>, vector<4x256xf32>
    %c2_55 = arith.constant 2 : index
    %c0_56 = arith.constant 0 : index
    %c0_57 = arith.constant 0 : index
    %75 = vector.load %arg3[%c2_55, %c0_56, %c0_57] : memref<7x1x256xf32, #tpu.memory_space<vmem>>, vector<1x1x256xf32>
    %76 = vector.shape_cast %75 : vector<1x1x256xf32> to vector<1x256xf32>
    %77 = vector.broadcast %76 : vector<1x256xf32> to vector<4x256xf32>
    %78 = arith.mulf %74, %77 : vector<4x256xf32>
    %c0_58 = arith.constant 0 : index
    %c36 = arith.constant 36 : index
    %79 = vector.load %arg2[%c0_58, %c36] : memref<4x196xf32, #tpu.memory_space<vmem>>, vector<4x4xf32>
    %cst_59 = arith.constant dense<0.000000e+00> : vector<4x256xf32>
    %80 = tpu.matmul %79, %78, %cst_59 {dimension_numbers = #tpu.dot_dimension_numbers<[1], [0], [0], [1], [0, 0, 1, 1], [], []>} : vector<4x4xf32>, vector<4x256xf32>, vector<4x256xf32> -> vector<4x256xf32>
    %81 = arith.addf %73, %80 : vector<4x256xf32>
    %c0_60 = arith.constant 0 : index
    %c96 = arith.constant 96 : index
    %82 = vector.load %arg7[%c0_60, %c96] : memref<4x435xf32, #tpu.memory_space<vmem>>, vector<4x256xf32>
    %c0_61 = arith.constant 0 : index
    %c40 = arith.constant 40 : index
    %83 = vector.load %arg2[%c0_61, %c40] : memref<4x196xf32, #tpu.memory_space<vmem>>, vector<4x4xf32>
    %cst_62 = arith.constant dense<0.000000e+00> : vector<4x256xf32>
    %84 = tpu.matmul %83, %82, %cst_62 {dimension_numbers = #tpu.dot_dimension_numbers<[1], [0], [0], [1], [0, 0, 1, 1], [], []>} : vector<4x4xf32>, vector<4x256xf32>, vector<4x256xf32> -> vector<4x256xf32>
    %85 = arith.addf %81, %84 : vector<4x256xf32>
    %c0_63 = arith.constant 0 : index
    %c97 = arith.constant 97 : index
    %86 = vector.load %arg7[%c0_63, %c97] : memref<4x435xf32, #tpu.memory_space<vmem>>, vector<4x256xf32>
    %c4_64 = arith.constant 4 : index
    %c0_65 = arith.constant 0 : index
    %c0_66 = arith.constant 0 : index
    %87 = vector.load %arg3[%c4_64, %c0_65, %c0_66] : memref<7x1x256xf32, #tpu.memory_space<vmem>>, vector<1x1x256xf32>
    %88 = vector.shape_cast %87 : vector<1x1x256xf32> to vector<1x256xf32>
    %89 = vector.broadcast %88 : vector<1x256xf32> to vector<4x256xf32>
    %90 = arith.mulf %86, %89 : vector<4x256xf32>
    %c0_67 = arith.constant 0 : index
    %c44 = arith.constant 44 : index
    %91 = vector.load %arg2[%c0_67, %c44] : memref<4x196xf32, #tpu.memory_space<vmem>>, vector<4x4xf32>
    %cst_68 = arith.constant dense<0.000000e+00> : vector<4x256xf32>
    %92 = tpu.matmul %91, %90, %cst_68 {dimension_numbers = #tpu.dot_dimension_numbers<[1], [0], [0], [1], [0, 0, 1, 1], [], []>} : vector<4x4xf32>, vector<4x256xf32>, vector<4x256xf32> -> vector<4x256xf32>
    %93 = arith.addf %85, %92 : vector<4x256xf32>
    %c0_69 = arith.constant 0 : index
    %c98 = arith.constant 98 : index
    %94 = vector.load %arg7[%c0_69, %c98] : memref<4x435xf32, #tpu.memory_space<vmem>>, vector<4x256xf32>
    %c5_70 = arith.constant 5 : index
    %c0_71 = arith.constant 0 : index
    %c0_72 = arith.constant 0 : index
    %95 = vector.load %arg3[%c5_70, %c0_71, %c0_72] : memref<7x1x256xf32, #tpu.memory_space<vmem>>, vector<1x1x256xf32>
    %96 = vector.shape_cast %95 : vector<1x1x256xf32> to vector<1x256xf32>
    %97 = vector.broadcast %96 : vector<1x256xf32> to vector<4x256xf32>
    %98 = arith.mulf %94, %97 : vector<4x256xf32>
    %c0_73 = arith.constant 0 : index
    %c48 = arith.constant 48 : index
    %99 = vector.load %arg2[%c0_73, %c48] : memref<4x196xf32, #tpu.memory_space<vmem>>, vector<4x4xf32>
    %cst_74 = arith.constant dense<0.000000e+00> : vector<4x256xf32>
    %100 = tpu.matmul %99, %98, %cst_74 {dimension_numbers = #tpu.dot_dimension_numbers<[1], [0], [0], [1], [0, 0, 1, 1], [], []>} : vector<4x4xf32>, vector<4x256xf32>, vector<4x256xf32> -> vector<4x256xf32>
    %101 = arith.addf %93, %100 : vector<4x256xf32>
    %c0_75 = arith.constant 0 : index
    %c99 = arith.constant 99 : index
    %102 = vector.load %arg7[%c0_75, %c99] : memref<4x435xf32, #tpu.memory_space<vmem>>, vector<4x256xf32>
    %c6_76 = arith.constant 6 : index
    %c0_77 = arith.constant 0 : index
    %c0_78 = arith.constant 0 : index
    %103 = vector.load %arg3[%c6_76, %c0_77, %c0_78] : memref<7x1x256xf32, #tpu.memory_space<vmem>>, vector<1x1x256xf32>
    %104 = vector.shape_cast %103 : vector<1x1x256xf32> to vector<1x256xf32>
    %105 = vector.broadcast %104 : vector<1x256xf32> to vector<4x256xf32>
    %106 = arith.mulf %102, %105 : vector<4x256xf32>
    %c0_79 = arith.constant 0 : index
    %c52 = arith.constant 52 : index
    %107 = vector.load %arg2[%c0_79, %c52] : memref<4x196xf32, #tpu.memory_space<vmem>>, vector<4x4xf32>
    %cst_80 = arith.constant dense<0.000000e+00> : vector<4x256xf32>
    %108 = tpu.matmul %107, %106, %cst_80 {dimension_numbers = #tpu.dot_dimension_numbers<[1], [0], [0], [1], [0, 0, 1, 1], [], []>} : vector<4x4xf32>, vector<4x256xf32>, vector<4x256xf32> -> vector<4x256xf32>
    %109 = arith.addf %101, %108 : vector<4x256xf32>
    %c0_81 = arith.constant 0 : index
    %c109 = arith.constant 109 : index
    %110 = vector.load %arg7[%c0_81, %c109] : memref<4x435xf32, #tpu.memory_space<vmem>>, vector<4x256xf32>
    %c0_82 = arith.constant 0 : index
    %c0_83 = arith.constant 0 : index
    %c0_84 = arith.constant 0 : index
    %111 = vector.load %arg3[%c0_82, %c0_83, %c0_84] : memref<7x1x256xf32, #tpu.memory_space<vmem>>, vector<1x1x256xf32>
    %112 = vector.shape_cast %111 : vector<1x1x256xf32> to vector<1x256xf32>
    %113 = vector.broadcast %112 : vector<1x256xf32> to vector<4x256xf32>
    %114 = arith.mulf %110, %113 : vector<4x256xf32>
    %c0_85 = arith.constant 0 : index
    %c56 = arith.constant 56 : index
    %115 = vector.load %arg2[%c0_85, %c56] : memref<4x196xf32, #tpu.memory_space<vmem>>, vector<4x4xf32>
    %cst_86 = arith.constant dense<0.000000e+00> : vector<4x256xf32>
    %116 = tpu.matmul %115, %114, %cst_86 {dimension_numbers = #tpu.dot_dimension_numbers<[1], [0], [0], [1], [0, 0, 1, 1], [], []>} : vector<4x4xf32>, vector<4x256xf32>, vector<4x256xf32> -> vector<4x256xf32>
    %117 = arith.addf %109, %116 : vector<4x256xf32>
    %c0_87 = arith.constant 0 : index
    %c110 = arith.constant 110 : index
    %118 = vector.load %arg7[%c0_87, %c110] : memref<4x435xf32, #tpu.memory_space<vmem>>, vector<4x256xf32>
    %c1_88 = arith.constant 1 : index
    %c0_89 = arith.constant 0 : index
    %c0_90 = arith.constant 0 : index
    %119 = vector.load %arg3[%c1_88, %c0_89, %c0_90] : memref<7x1x256xf32, #tpu.memory_space<vmem>>, vector<1x1x256xf32>
    %120 = vector.shape_cast %119 : vector<1x1x256xf32> to vector<1x256xf32>
    %121 = vector.broadcast %120 : vector<1x256xf32> to vector<4x256xf32>
    %122 = arith.mulf %118, %121 : vector<4x256xf32>
    %c0_91 = arith.constant 0 : index
    %c60 = arith.constant 60 : index
    %123 = vector.load %arg2[%c0_91, %c60] : memref<4x196xf32, #tpu.memory_space<vmem>>, vector<4x4xf32>
    %cst_92 = arith.constant dense<0.000000e+00> : vector<4x256xf32>
    %124 = tpu.matmul %123, %122, %cst_92 {dimension_numbers = #tpu.dot_dimension_numbers<[1], [0], [0], [1], [0, 0, 1, 1], [], []>} : vector<4x4xf32>, vector<4x256xf32>, vector<4x256xf32> -> vector<4x256xf32>
    %125 = arith.addf %117, %124 : vector<4x256xf32>
    %c0_93 = arith.constant 0 : index
    %c111 = arith.constant 111 : index
    %126 = vector.load %arg7[%c0_93, %c111] : memref<4x435xf32, #tpu.memory_space<vmem>>, vector<4x256xf32>
    %c2_94 = arith.constant 2 : index
    %c0_95 = arith.constant 0 : index
    %c0_96 = arith.constant 0 : index
    %127 = vector.load %arg3[%c2_94, %c0_95, %c0_96] : memref<7x1x256xf32, #tpu.memory_space<vmem>>, vector<1x1x256xf32>
    %128 = vector.shape_cast %127 : vector<1x1x256xf32> to vector<1x256xf32>
    %129 = vector.broadcast %128 : vector<1x256xf32> to vector<4x256xf32>
    %130 = arith.mulf %126, %129 : vector<4x256xf32>
    %c0_97 = arith.constant 0 : index
    %c64 = arith.constant 64 : index
    %131 = vector.load %arg2[%c0_97, %c64] : memref<4x196xf32, #tpu.memory_space<vmem>>, vector<4x4xf32>
    %cst_98 = arith.constant dense<0.000000e+00> : vector<4x256xf32>
    %132 = tpu.matmul %131, %130, %cst_98 {dimension_numbers = #tpu.dot_dimension_numbers<[1], [0], [0], [1], [0, 0, 1, 1], [], []>} : vector<4x4xf32>, vector<4x256xf32>, vector<4x256xf32> -> vector<4x256xf32>
    %133 = arith.addf %125, %132 : vector<4x256xf32>
    %c0_99 = arith.constant 0 : index
    %c112 = arith.constant 112 : index
    %134 = vector.load %arg7[%c0_99, %c112] : memref<4x435xf32, #tpu.memory_space<vmem>>, vector<4x256xf32>
    %c0_100 = arith.constant 0 : index
    %c68 = arith.constant 68 : index
    %135 = vector.load %arg2[%c0_100, %c68] : memref<4x196xf32, #tpu.memory_space<vmem>>, vector<4x4xf32>
    %cst_101 = arith.constant dense<0.000000e+00> : vector<4x256xf32>
    %136 = tpu.matmul %135, %134, %cst_101 {dimension_numbers = #tpu.dot_dimension_numbers<[1], [0], [0], [1], [0, 0, 1, 1], [], []>} : vector<4x4xf32>, vector<4x256xf32>, vector<4x256xf32> -> vector<4x256xf32>
    %137 = arith.addf %133, %136 : vector<4x256xf32>
    %c0_102 = arith.constant 0 : index
    %c113 = arith.constant 113 : index
    %138 = vector.load %arg7[%c0_102, %c113] : memref<4x435xf32, #tpu.memory_space<vmem>>, vector<4x256xf32>
    %c4_103 = arith.constant 4 : index
    %c0_104 = arith.constant 0 : index
    %c0_105 = arith.constant 0 : index
    %139 = vector.load %arg3[%c4_103, %c0_104, %c0_105] : memref<7x1x256xf32, #tpu.memory_space<vmem>>, vector<1x1x256xf32>
    %140 = vector.shape_cast %139 : vector<1x1x256xf32> to vector<1x256xf32>
    %141 = vector.broadcast %140 : vector<1x256xf32> to vector<4x256xf32>
    %142 = arith.mulf %138, %141 : vector<4x256xf32>
    %c0_106 = arith.constant 0 : index
    %c72 = arith.constant 72 : index
    %143 = vector.load %arg2[%c0_106, %c72] : memref<4x196xf32, #tpu.memory_space<vmem>>, vector<4x4xf32>
    %cst_107 = arith.constant dense<0.000000e+00> : vector<4x256xf32>
    %144 = tpu.matmul %143, %142, %cst_107 {dimension_numbers = #tpu.dot_dimension_numbers<[1], [0], [0], [1], [0, 0, 1, 1], [], []>} : vector<4x4xf32>, vector<4x256xf32>, vector<4x256xf32> -> vector<4x256xf32>
    %145 = arith.addf %137, %144 : vector<4x256xf32>
    %c0_108 = arith.constant 0 : index
    %c114 = arith.constant 114 : index
    %146 = vector.load %arg7[%c0_108, %c114] : memref<4x435xf32, #tpu.memory_space<vmem>>, vector<4x256xf32>
    %c5_109 = arith.constant 5 : index
    %c0_110 = arith.constant 0 : index
    %c0_111 = arith.constant 0 : index
    %147 = vector.load %arg3[%c5_109, %c0_110, %c0_111] : memref<7x1x256xf32, #tpu.memory_space<vmem>>, vector<1x1x256xf32>
    %148 = vector.shape_cast %147 : vector<1x1x256xf32> to vector<1x256xf32>
    %149 = vector.broadcast %148 : vector<1x256xf32> to vector<4x256xf32>
    %150 = arith.mulf %146, %149 : vector<4x256xf32>
    %c0_112 = arith.constant 0 : index
    %c76 = arith.constant 76 : index
    %151 = vector.load %arg2[%c0_112, %c76] : memref<4x196xf32, #tpu.memory_space<vmem>>, vector<4x4xf32>
    %cst_113 = arith.constant dense<0.000000e+00> : vector<4x256xf32>
    %152 = tpu.matmul %151, %150, %cst_113 {dimension_numbers = #tpu.dot_dimension_numbers<[1], [0], [0], [1], [0, 0, 1, 1], [], []>} : vector<4x4xf32>, vector<4x256xf32>, vector<4x256xf32> -> vector<4x256xf32>
    %153 = arith.addf %145, %152 : vector<4x256xf32>
    %c0_114 = arith.constant 0 : index
    %c115 = arith.constant 115 : index
    %154 = vector.load %arg7[%c0_114, %c115] : memref<4x435xf32, #tpu.memory_space<vmem>>, vector<4x256xf32>
    %c6_115 = arith.constant 6 : index
    %c0_116 = arith.constant 0 : index
    %c0_117 = arith.constant 0 : index
    %155 = vector.load %arg3[%c6_115, %c0_116, %c0_117] : memref<7x1x256xf32, #tpu.memory_space<vmem>>, vector<1x1x256xf32>
    %156 = vector.shape_cast %155 : vector<1x1x256xf32> to vector<1x256xf32>
    %157 = vector.broadcast %156 : vector<1x256xf32> to vector<4x256xf32>
    %158 = arith.mulf %154, %157 : vector<4x256xf32>
    %c0_118 = arith.constant 0 : index
    %c80_119 = arith.constant 80 : index
    %159 = vector.load %arg2[%c0_118, %c80_119] : memref<4x196xf32, #tpu.memory_space<vmem>>, vector<4x4xf32>
    %cst_120 = arith.constant dense<0.000000e+00> : vector<4x256xf32>
    %160 = tpu.matmul %159, %158, %cst_120 {dimension_numbers = #tpu.dot_dimension_numbers<[1], [0], [0], [1], [0, 0, 1, 1], [], []>} : vector<4x4xf32>, vector<4x256xf32>, vector<4x256xf32> -> vector<4x256xf32>
    %161 = arith.addf %153, %160 : vector<4x256xf32>
    %c0_121 = arith.constant 0 : index
    %c125 = arith.constant 125 : index
    %162 = vector.load %arg7[%c0_121, %c125] : memref<4x435xf32, #tpu.memory_space<vmem>>, vector<4x256xf32>
    %c0_122 = arith.constant 0 : index
    %c0_123 = arith.constant 0 : index
    %c0_124 = arith.constant 0 : index
    %163 = vector.load %arg3[%c0_122, %c0_123, %c0_124] : memref<7x1x256xf32, #tpu.memory_space<vmem>>, vector<1x1x256xf32>
    %164 = vector.shape_cast %163 : vector<1x1x256xf32> to vector<1x256xf32>
    %165 = vector.broadcast %164 : vector<1x256xf32> to vector<4x256xf32>
    %166 = arith.mulf %162, %165 : vector<4x256xf32>
    %c0_125 = arith.constant 0 : index
    %c84 = arith.constant 84 : index
    %167 = vector.load %arg2[%c0_125, %c84] : memref<4x196xf32, #tpu.memory_space<vmem>>, vector<4x4xf32>
    %cst_126 = arith.constant dense<0.000000e+00> : vector<4x256xf32>
    %168 = tpu.matmul %167, %166, %cst_126 {dimension_numbers = #tpu.dot_dimension_numbers<[1], [0], [0], [1], [0, 0, 1, 1], [], []>} : vector<4x4xf32>, vector<4x256xf32>, vector<4x256xf32> -> vector<4x256xf32>
    %169 = arith.addf %161, %168 : vector<4x256xf32>
    %c0_127 = arith.constant 0 : index
    %c126 = arith.constant 126 : index
    %170 = vector.load %arg7[%c0_127, %c126] : memref<4x435xf32, #tpu.memory_space<vmem>>, vector<4x256xf32>
    %c1_128 = arith.constant 1 : index
    %c0_129 = arith.constant 0 : index
    %c0_130 = arith.constant 0 : index
    %171 = vector.load %arg3[%c1_128, %c0_129, %c0_130] : memref<7x1x256xf32, #tpu.memory_space<vmem>>, vector<1x1x256xf32>
    %172 = vector.shape_cast %171 : vector<1x1x256xf32> to vector<1x256xf32>
    %173 = vector.broadcast %172 : vector<1x256xf32> to vector<4x256xf32>
    %174 = arith.mulf %170, %173 : vector<4x256xf32>
    %c0_131 = arith.constant 0 : index
    %c88 = arith.constant 88 : index
    %175 = vector.load %arg2[%c0_131, %c88] : memref<4x196xf32, #tpu.memory_space<vmem>>, vector<4x4xf32>
    %cst_132 = arith.constant dense<0.000000e+00> : vector<4x256xf32>
    %176 = tpu.matmul %175, %174, %cst_132 {dimension_numbers = #tpu.dot_dimension_numbers<[1], [0], [0], [1], [0, 0, 1, 1], [], []>} : vector<4x4xf32>, vector<4x256xf32>, vector<4x256xf32> -> vector<4x256xf32>
    %177 = arith.addf %169, %176 : vector<4x256xf32>
    %c0_133 = arith.constant 0 : index
    %c127 = arith.constant 127 : index
    %178 = vector.load %arg7[%c0_133, %c127] : memref<4x435xf32, #tpu.memory_space<vmem>>, vector<4x256xf32>
    %c2_134 = arith.constant 2 : index
    %c0_135 = arith.constant 0 : index
    %c0_136 = arith.constant 0 : index
    %179 = vector.load %arg3[%c2_134, %c0_135, %c0_136] : memref<7x1x256xf32, #tpu.memory_space<vmem>>, vector<1x1x256xf32>
    %180 = vector.shape_cast %179 : vector<1x1x256xf32> to vector<1x256xf32>
    %181 = vector.broadcast %180 : vector<1x256xf32> to vector<4x256xf32>
    %182 = arith.mulf %178, %181 : vector<4x256xf32>
    %c0_137 = arith.constant 0 : index
    %c92 = arith.constant 92 : index
    %183 = vector.load %arg2[%c0_137, %c92] : memref<4x196xf32, #tpu.memory_space<vmem>>, vector<4x4xf32>
    %cst_138 = arith.constant dense<0.000000e+00> : vector<4x256xf32>
    %184 = tpu.matmul %183, %182, %cst_138 {dimension_numbers = #tpu.dot_dimension_numbers<[1], [0], [0], [1], [0, 0, 1, 1], [], []>} : vector<4x4xf32>, vector<4x256xf32>, vector<4x256xf32> -> vector<4x256xf32>
    %185 = arith.addf %177, %184 : vector<4x256xf32>
    %c0_139 = arith.constant 0 : index
    %c128_140 = arith.constant 128 : index
    %186 = vector.load %arg7[%c0_139, %c128_140] : memref<4x435xf32, #tpu.memory_space<vmem>>, vector<4x256xf32>
    %c0_141 = arith.constant 0 : index
    %c96_142 = arith.constant 96 : index
    %187 = vector.load %arg2[%c0_141, %c96_142] : memref<4x196xf32, #tpu.memory_space<vmem>>, vector<4x4xf32>
    %cst_143 = arith.constant dense<0.000000e+00> : vector<4x256xf32>
    %188 = tpu.matmul %187, %186, %cst_143 {dimension_numbers = #tpu.dot_dimension_numbers<[1], [0], [0], [1], [0, 0, 1, 1], [], []>} : vector<4x4xf32>, vector<4x256xf32>, vector<4x256xf32> -> vector<4x256xf32>
    %189 = arith.addf %185, %188 : vector<4x256xf32>
    %c0_144 = arith.constant 0 : index
    %c129 = arith.constant 129 : index
    %190 = vector.load %arg7[%c0_144, %c129] : memref<4x435xf32, #tpu.memory_space<vmem>>, vector<4x256xf32>
    %c4_145 = arith.constant 4 : index
    %c0_146 = arith.constant 0 : index
    %c0_147 = arith.constant 0 : index
    %191 = vector.load %arg3[%c4_145, %c0_146, %c0_147] : memref<7x1x256xf32, #tpu.memory_space<vmem>>, vector<1x1x256xf32>
    %192 = vector.shape_cast %191 : vector<1x1x256xf32> to vector<1x256xf32>
    %193 = vector.broadcast %192 : vector<1x256xf32> to vector<4x256xf32>
    %194 = arith.mulf %190, %193 : vector<4x256xf32>
    %c0_148 = arith.constant 0 : index
    %c100 = arith.constant 100 : index
    %195 = vector.load %arg2[%c0_148, %c100] : memref<4x196xf32, #tpu.memory_space<vmem>>, vector<4x4xf32>
    %cst_149 = arith.constant dense<0.000000e+00> : vector<4x256xf32>
    %196 = tpu.matmul %195, %194, %cst_149 {dimension_numbers = #tpu.dot_dimension_numbers<[1], [0], [0], [1], [0, 0, 1, 1], [], []>} : vector<4x4xf32>, vector<4x256xf32>, vector<4x256xf32> -> vector<4x256xf32>
    %197 = arith.addf %189, %196 : vector<4x256xf32>
    %c0_150 = arith.constant 0 : index
    %c130 = arith.constant 130 : index
    %198 = vector.load %arg7[%c0_150, %c130] : memref<4x435xf32, #tpu.memory_space<vmem>>, vector<4x256xf32>
    %c5_151 = arith.constant 5 : index
    %c0_152 = arith.constant 0 : index
    %c0_153 = arith.constant 0 : index
    %199 = vector.load %arg3[%c5_151, %c0_152, %c0_153] : memref<7x1x256xf32, #tpu.memory_space<vmem>>, vector<1x1x256xf32>
    %200 = vector.shape_cast %199 : vector<1x1x256xf32> to vector<1x256xf32>
    %201 = vector.broadcast %200 : vector<1x256xf32> to vector<4x256xf32>
    %202 = arith.mulf %198, %201 : vector<4x256xf32>
    %c0_154 = arith.constant 0 : index
    %c104 = arith.constant 104 : index
    %203 = vector.load %arg2[%c0_154, %c104] : memref<4x196xf32, #tpu.memory_space<vmem>>, vector<4x4xf32>
    %cst_155 = arith.constant dense<0.000000e+00> : vector<4x256xf32>
    %204 = tpu.matmul %203, %202, %cst_155 {dimension_numbers = #tpu.dot_dimension_numbers<[1], [0], [0], [1], [0, 0, 1, 1], [], []>} : vector<4x4xf32>, vector<4x256xf32>, vector<4x256xf32> -> vector<4x256xf32>
    %205 = arith.addf %197, %204 : vector<4x256xf32>
    %c0_156 = arith.constant 0 : index
    %c131 = arith.constant 131 : index
    %206 = vector.load %arg7[%c0_156, %c131] : memref<4x435xf32, #tpu.memory_space<vmem>>, vector<4x256xf32>
    %c6_157 = arith.constant 6 : index
    %c0_158 = arith.constant 0 : index
    %c0_159 = arith.constant 0 : index
    %207 = vector.load %arg3[%c6_157, %c0_158, %c0_159] : memref<7x1x256xf32, #tpu.memory_space<vmem>>, vector<1x1x256xf32>
    %208 = vector.shape_cast %207 : vector<1x1x256xf32> to vector<1x256xf32>
    %209 = vector.broadcast %208 : vector<1x256xf32> to vector<4x256xf32>
    %210 = arith.mulf %206, %209 : vector<4x256xf32>
    %c0_160 = arith.constant 0 : index
    %c108 = arith.constant 108 : index
    %211 = vector.load %arg2[%c0_160, %c108] : memref<4x196xf32, #tpu.memory_space<vmem>>, vector<4x4xf32>
    %cst_161 = arith.constant dense<0.000000e+00> : vector<4x256xf32>
    %212 = tpu.matmul %211, %210, %cst_161 {dimension_numbers = #tpu.dot_dimension_numbers<[1], [0], [0], [1], [0, 0, 1, 1], [], []>} : vector<4x4xf32>, vector<4x256xf32>, vector<4x256xf32> -> vector<4x256xf32>
    %213 = arith.addf %205, %212 : vector<4x256xf32>
    %c0_162 = arith.constant 0 : index
    %c141 = arith.constant 141 : index
    %214 = vector.load %arg7[%c0_162, %c141] : memref<4x435xf32, #tpu.memory_space<vmem>>, vector<4x256xf32>
    %c0_163 = arith.constant 0 : index
    %c0_164 = arith.constant 0 : index
    %c0_165 = arith.constant 0 : index
    %215 = vector.load %arg3[%c0_163, %c0_164, %c0_165] : memref<7x1x256xf32, #tpu.memory_space<vmem>>, vector<1x1x256xf32>
    %216 = vector.shape_cast %215 : vector<1x1x256xf32> to vector<1x256xf32>
    %217 = vector.broadcast %216 : vector<1x256xf32> to vector<4x256xf32>
    %218 = arith.mulf %214, %217 : vector<4x256xf32>
    %c0_166 = arith.constant 0 : index
    %c112_167 = arith.constant 112 : index
    %219 = vector.load %arg2[%c0_166, %c112_167] : memref<4x196xf32, #tpu.memory_space<vmem>>, vector<4x4xf32>
    %cst_168 = arith.constant dense<0.000000e+00> : vector<4x256xf32>
    %220 = tpu.matmul %219, %218, %cst_168 {dimension_numbers = #tpu.dot_dimension_numbers<[1], [0], [0], [1], [0, 0, 1, 1], [], []>} : vector<4x4xf32>, vector<4x256xf32>, vector<4x256xf32> -> vector<4x256xf32>
    %221 = arith.addf %213, %220 : vector<4x256xf32>
    %c0_169 = arith.constant 0 : index
    %c142 = arith.constant 142 : index
    %222 = vector.load %arg7[%c0_169, %c142] : memref<4x435xf32, #tpu.memory_space<vmem>>, vector<4x256xf32>
    %c1_170 = arith.constant 1 : index
    %c0_171 = arith.constant 0 : index
    %c0_172 = arith.constant 0 : index
    %223 = vector.load %arg3[%c1_170, %c0_171, %c0_172] : memref<7x1x256xf32, #tpu.memory_space<vmem>>, vector<1x1x256xf32>
    %224 = vector.shape_cast %223 : vector<1x1x256xf32> to vector<1x256xf32>
    %225 = vector.broadcast %224 : vector<1x256xf32> to vector<4x256xf32>
    %226 = arith.mulf %222, %225 : vector<4x256xf32>
    %c0_173 = arith.constant 0 : index
    %c116 = arith.constant 116 : index
    %227 = vector.load %arg2[%c0_173, %c116] : memref<4x196xf32, #tpu.memory_space<vmem>>, vector<4x4xf32>
    %cst_174 = arith.constant dense<0.000000e+00> : vector<4x256xf32>
    %228 = tpu.matmul %227, %226, %cst_174 {dimension_numbers = #tpu.dot_dimension_numbers<[1], [0], [0], [1], [0, 0, 1, 1], [], []>} : vector<4x4xf32>, vector<4x256xf32>, vector<4x256xf32> -> vector<4x256xf32>
    %229 = arith.addf %221, %228 : vector<4x256xf32>
    %c0_175 = arith.constant 0 : index
    %c143 = arith.constant 143 : index
    %230 = vector.load %arg7[%c0_175, %c143] : memref<4x435xf32, #tpu.memory_space<vmem>>, vector<4x256xf32>
    %c2_176 = arith.constant 2 : index
    %c0_177 = arith.constant 0 : index
    %c0_178 = arith.constant 0 : index
    %231 = vector.load %arg3[%c2_176, %c0_177, %c0_178] : memref<7x1x256xf32, #tpu.memory_space<vmem>>, vector<1x1x256xf32>
    %232 = vector.shape_cast %231 : vector<1x1x256xf32> to vector<1x256xf32>
    %233 = vector.broadcast %232 : vector<1x256xf32> to vector<4x256xf32>
    %234 = arith.mulf %230, %233 : vector<4x256xf32>
    %c0_179 = arith.constant 0 : index
    %c120 = arith.constant 120 : index
    %235 = vector.load %arg2[%c0_179, %c120] : memref<4x196xf32, #tpu.memory_space<vmem>>, vector<4x4xf32>
    %cst_180 = arith.constant dense<0.000000e+00> : vector<4x256xf32>
    %236 = tpu.matmul %235, %234, %cst_180 {dimension_numbers = #tpu.dot_dimension_numbers<[1], [0], [0], [1], [0, 0, 1, 1], [], []>} : vector<4x4xf32>, vector<4x256xf32>, vector<4x256xf32> -> vector<4x256xf32>
    %237 = arith.addf %229, %236 : vector<4x256xf32>
    %c0_181 = arith.constant 0 : index
    %c144 = arith.constant 144 : index
    %238 = vector.load %arg7[%c0_181, %c144] : memref<4x435xf32, #tpu.memory_space<vmem>>, vector<4x256xf32>
    %c0_182 = arith.constant 0 : index
    %c124 = arith.constant 124 : index
    %239 = vector.load %arg2[%c0_182, %c124] : memref<4x196xf32, #tpu.memory_space<vmem>>, vector<4x4xf32>
    %cst_183 = arith.constant dense<0.000000e+00> : vector<4x256xf32>
    %240 = tpu.matmul %239, %238, %cst_183 {dimension_numbers = #tpu.dot_dimension_numbers<[1], [0], [0], [1], [0, 0, 1, 1], [], []>} : vector<4x4xf32>, vector<4x256xf32>, vector<4x256xf32> -> vector<4x256xf32>
    %241 = arith.addf %237, %240 : vector<4x256xf32>
    %c0_184 = arith.constant 0 : index
    %c145 = arith.constant 145 : index
    %242 = vector.load %arg7[%c0_184, %c145] : memref<4x435xf32, #tpu.memory_space<vmem>>, vector<4x256xf32>
    %c4_185 = arith.constant 4 : index
    %c0_186 = arith.constant 0 : index
    %c0_187 = arith.constant 0 : index
    %243 = vector.load %arg3[%c4_185, %c0_186, %c0_187] : memref<7x1x256xf32, #tpu.memory_space<vmem>>, vector<1x1x256xf32>
    %244 = vector.shape_cast %243 : vector<1x1x256xf32> to vector<1x256xf32>
    %245 = vector.broadcast %244 : vector<1x256xf32> to vector<4x256xf32>
    %246 = arith.mulf %242, %245 : vector<4x256xf32>
    %c0_188 = arith.constant 0 : index
    %c128_189 = arith.constant 128 : index
    %247 = vector.load %arg2[%c0_188, %c128_189] : memref<4x196xf32, #tpu.memory_space<vmem>>, vector<4x4xf32>
    %cst_190 = arith.constant dense<0.000000e+00> : vector<4x256xf32>
    %248 = tpu.matmul %247, %246, %cst_190 {dimension_numbers = #tpu.dot_dimension_numbers<[1], [0], [0], [1], [0, 0, 1, 1], [], []>} : vector<4x4xf32>, vector<4x256xf32>, vector<4x256xf32> -> vector<4x256xf32>
    %249 = arith.addf %241, %248 : vector<4x256xf32>
    %c0_191 = arith.constant 0 : index
    %c146 = arith.constant 146 : index
    %250 = vector.load %arg7[%c0_191, %c146] : memref<4x435xf32, #tpu.memory_space<vmem>>, vector<4x256xf32>
    %c5_192 = arith.constant 5 : index
    %c0_193 = arith.constant 0 : index
    %c0_194 = arith.constant 0 : index
    %251 = vector.load %arg3[%c5_192, %c0_193, %c0_194] : memref<7x1x256xf32, #tpu.memory_space<vmem>>, vector<1x1x256xf32>
    %252 = vector.shape_cast %251 : vector<1x1x256xf32> to vector<1x256xf32>
    %253 = vector.broadcast %252 : vector<1x256xf32> to vector<4x256xf32>
    %254 = arith.mulf %250, %253 : vector<4x256xf32>
    %c0_195 = arith.constant 0 : index
    %c132 = arith.constant 132 : index
    %255 = vector.load %arg2[%c0_195, %c132] : memref<4x196xf32, #tpu.memory_space<vmem>>, vector<4x4xf32>
    %cst_196 = arith.constant dense<0.000000e+00> : vector<4x256xf32>
    %256 = tpu.matmul %255, %254, %cst_196 {dimension_numbers = #tpu.dot_dimension_numbers<[1], [0], [0], [1], [0, 0, 1, 1], [], []>} : vector<4x4xf32>, vector<4x256xf32>, vector<4x256xf32> -> vector<4x256xf32>
    %257 = arith.addf %249, %256 : vector<4x256xf32>
    %c0_197 = arith.constant 0 : index
    %c147 = arith.constant 147 : index
    %258 = vector.load %arg7[%c0_197, %c147] : memref<4x435xf32, #tpu.memory_space<vmem>>, vector<4x256xf32>
    %c6_198 = arith.constant 6 : index
    %c0_199 = arith.constant 0 : index
    %c0_200 = arith.constant 0 : index
    %259 = vector.load %arg3[%c6_198, %c0_199, %c0_200] : memref<7x1x256xf32, #tpu.memory_space<vmem>>, vector<1x1x256xf32>
    %260 = vector.shape_cast %259 : vector<1x1x256xf32> to vector<1x256xf32>
    %261 = vector.broadcast %260 : vector<1x256xf32> to vector<4x256xf32>
    %262 = arith.mulf %258, %261 : vector<4x256xf32>
    %c0_201 = arith.constant 0 : index
    %c136 = arith.constant 136 : index
    %263 = vector.load %arg2[%c0_201, %c136] : memref<4x196xf32, #tpu.memory_space<vmem>>, vector<4x4xf32>
    %cst_202 = arith.constant dense<0.000000e+00> : vector<4x256xf32>
    %264 = tpu.matmul %263, %262, %cst_202 {dimension_numbers = #tpu.dot_dimension_numbers<[1], [0], [0], [1], [0, 0, 1, 1], [], []>} : vector<4x4xf32>, vector<4x256xf32>, vector<4x256xf32> -> vector<4x256xf32>
    %265 = arith.addf %257, %264 : vector<4x256xf32>
    %c0_203 = arith.constant 0 : index
    %c157 = arith.constant 157 : index
    %266 = vector.load %arg7[%c0_203, %c157] : memref<4x435xf32, #tpu.memory_space<vmem>>, vector<4x256xf32>
    %c0_204 = arith.constant 0 : index
    %c0_205 = arith.constant 0 : index
    %c0_206 = arith.constant 0 : index
    %267 = vector.load %arg3[%c0_204, %c0_205, %c0_206] : memref<7x1x256xf32, #tpu.memory_space<vmem>>, vector<1x1x256xf32>
    %268 = vector.shape_cast %267 : vector<1x1x256xf32> to vector<1x256xf32>
    %269 = vector.broadcast %268 : vector<1x256xf32> to vector<4x256xf32>
    %270 = arith.mulf %266, %269 : vector<4x256xf32>
    %c0_207 = arith.constant 0 : index
    %c140 = arith.constant 140 : index
    %271 = vector.load %arg2[%c0_207, %c140] : memref<4x196xf32, #tpu.memory_space<vmem>>, vector<4x4xf32>
    %cst_208 = arith.constant dense<0.000000e+00> : vector<4x256xf32>
    %272 = tpu.matmul %271, %270, %cst_208 {dimension_numbers = #tpu.dot_dimension_numbers<[1], [0], [0], [1], [0, 0, 1, 1], [], []>} : vector<4x4xf32>, vector<4x256xf32>, vector<4x256xf32> -> vector<4x256xf32>
    %273 = arith.addf %265, %272 : vector<4x256xf32>
    %c0_209 = arith.constant 0 : index
    %c158 = arith.constant 158 : index
    %274 = vector.load %arg7[%c0_209, %c158] : memref<4x435xf32, #tpu.memory_space<vmem>>, vector<4x256xf32>
    %c1_210 = arith.constant 1 : index
    %c0_211 = arith.constant 0 : index
    %c0_212 = arith.constant 0 : index
    %275 = vector.load %arg3[%c1_210, %c0_211, %c0_212] : memref<7x1x256xf32, #tpu.memory_space<vmem>>, vector<1x1x256xf32>
    %276 = vector.shape_cast %275 : vector<1x1x256xf32> to vector<1x256xf32>
    %277 = vector.broadcast %276 : vector<1x256xf32> to vector<4x256xf32>
    %278 = arith.mulf %274, %277 : vector<4x256xf32>
    %c0_213 = arith.constant 0 : index
    %c144_214 = arith.constant 144 : index
    %279 = vector.load %arg2[%c0_213, %c144_214] : memref<4x196xf32, #tpu.memory_space<vmem>>, vector<4x4xf32>
    %cst_215 = arith.constant dense<0.000000e+00> : vector<4x256xf32>
    %280 = tpu.matmul %279, %278, %cst_215 {dimension_numbers = #tpu.dot_dimension_numbers<[1], [0], [0], [1], [0, 0, 1, 1], [], []>} : vector<4x4xf32>, vector<4x256xf32>, vector<4x256xf32> -> vector<4x256xf32>
    %281 = arith.addf %273, %280 : vector<4x256xf32>
    %c0_216 = arith.constant 0 : index
    %c159 = arith.constant 159 : index
    %282 = vector.load %arg7[%c0_216, %c159] : memref<4x435xf32, #tpu.memory_space<vmem>>, vector<4x256xf32>
    %c2_217 = arith.constant 2 : index
    %c0_218 = arith.constant 0 : index
    %c0_219 = arith.constant 0 : index
    %283 = vector.load %arg3[%c2_217, %c0_218, %c0_219] : memref<7x1x256xf32, #tpu.memory_space<vmem>>, vector<1x1x256xf32>
    %284 = vector.shape_cast %283 : vector<1x1x256xf32> to vector<1x256xf32>
    %285 = vector.broadcast %284 : vector<1x256xf32> to vector<4x256xf32>
    %286 = arith.mulf %282, %285 : vector<4x256xf32>
    %c0_220 = arith.constant 0 : index
    %c148 = arith.constant 148 : index
    %287 = vector.load %arg2[%c0_220, %c148] : memref<4x196xf32, #tpu.memory_space<vmem>>, vector<4x4xf32>
    %cst_221 = arith.constant dense<0.000000e+00> : vector<4x256xf32>
    %288 = tpu.matmul %287, %286, %cst_221 {dimension_numbers = #tpu.dot_dimension_numbers<[1], [0], [0], [1], [0, 0, 1, 1], [], []>} : vector<4x4xf32>, vector<4x256xf32>, vector<4x256xf32> -> vector<4x256xf32>
    %289 = arith.addf %281, %288 : vector<4x256xf32>
    %c0_222 = arith.constant 0 : index
    %c160 = arith.constant 160 : index
    %290 = vector.load %arg7[%c0_222, %c160] : memref<4x435xf32, #tpu.memory_space<vmem>>, vector<4x256xf32>
    %c0_223 = arith.constant 0 : index
    %c152 = arith.constant 152 : index
    %291 = vector.load %arg2[%c0_223, %c152] : memref<4x196xf32, #tpu.memory_space<vmem>>, vector<4x4xf32>
    %cst_224 = arith.constant dense<0.000000e+00> : vector<4x256xf32>
    %292 = tpu.matmul %291, %290, %cst_224 {dimension_numbers = #tpu.dot_dimension_numbers<[1], [0], [0], [1], [0, 0, 1, 1], [], []>} : vector<4x4xf32>, vector<4x256xf32>, vector<4x256xf32> -> vector<4x256xf32>
    %293 = arith.addf %289, %292 : vector<4x256xf32>
    %c0_225 = arith.constant 0 : index
    %c161 = arith.constant 161 : index
    %294 = vector.load %arg7[%c0_225, %c161] : memref<4x435xf32, #tpu.memory_space<vmem>>, vector<4x256xf32>
    %c4_226 = arith.constant 4 : index
    %c0_227 = arith.constant 0 : index
    %c0_228 = arith.constant 0 : index
    %295 = vector.load %arg3[%c4_226, %c0_227, %c0_228] : memref<7x1x256xf32, #tpu.memory_space<vmem>>, vector<1x1x256xf32>
    %296 = vector.shape_cast %295 : vector<1x1x256xf32> to vector<1x256xf32>
    %297 = vector.broadcast %296 : vector<1x256xf32> to vector<4x256xf32>
    %298 = arith.mulf %294, %297 : vector<4x256xf32>
    %c0_229 = arith.constant 0 : index
    %c156 = arith.constant 156 : index
    %299 = vector.load %arg2[%c0_229, %c156] : memref<4x196xf32, #tpu.memory_space<vmem>>, vector<4x4xf32>
    %cst_230 = arith.constant dense<0.000000e+00> : vector<4x256xf32>
    %300 = tpu.matmul %299, %298, %cst_230 {dimension_numbers = #tpu.dot_dimension_numbers<[1], [0], [0], [1], [0, 0, 1, 1], [], []>} : vector<4x4xf32>, vector<4x256xf32>, vector<4x256xf32> -> vector<4x256xf32>
    %301 = arith.addf %293, %300 : vector<4x256xf32>
    %c0_231 = arith.constant 0 : index
    %c162 = arith.constant 162 : index
    %302 = vector.load %arg7[%c0_231, %c162] : memref<4x435xf32, #tpu.memory_space<vmem>>, vector<4x256xf32>
    %c5_232 = arith.constant 5 : index
    %c0_233 = arith.constant 0 : index
    %c0_234 = arith.constant 0 : index
    %303 = vector.load %arg3[%c5_232, %c0_233, %c0_234] : memref<7x1x256xf32, #tpu.memory_space<vmem>>, vector<1x1x256xf32>
    %304 = vector.shape_cast %303 : vector<1x1x256xf32> to vector<1x256xf32>
    %305 = vector.broadcast %304 : vector<1x256xf32> to vector<4x256xf32>
    %306 = arith.mulf %302, %305 : vector<4x256xf32>
    %c0_235 = arith.constant 0 : index
    %c160_236 = arith.constant 160 : index
    %307 = vector.load %arg2[%c0_235, %c160_236] : memref<4x196xf32, #tpu.memory_space<vmem>>, vector<4x4xf32>
    %cst_237 = arith.constant dense<0.000000e+00> : vector<4x256xf32>
    %308 = tpu.matmul %307, %306, %cst_237 {dimension_numbers = #tpu.dot_dimension_numbers<[1], [0], [0], [1], [0, 0, 1, 1], [], []>} : vector<4x4xf32>, vector<4x256xf32>, vector<4x256xf32> -> vector<4x256xf32>
    %309 = arith.addf %301, %308 : vector<4x256xf32>
    %c0_238 = arith.constant 0 : index
    %c163 = arith.constant 163 : index
    %310 = vector.load %arg7[%c0_238, %c163] : memref<4x435xf32, #tpu.memory_space<vmem>>, vector<4x256xf32>
    %c6_239 = arith.constant 6 : index
    %c0_240 = arith.constant 0 : index
    %c0_241 = arith.constant 0 : index
    %311 = vector.load %arg3[%c6_239, %c0_240, %c0_241] : memref<7x1x256xf32, #tpu.memory_space<vmem>>, vector<1x1x256xf32>
    %312 = vector.shape_cast %311 : vector<1x1x256xf32> to vector<1x256xf32>
    %313 = vector.broadcast %312 : vector<1x256xf32> to vector<4x256xf32>
    %314 = arith.mulf %310, %313 : vector<4x256xf32>
    %c0_242 = arith.constant 0 : index
    %c164 = arith.constant 164 : index
    %315 = vector.load %arg2[%c0_242, %c164] : memref<4x196xf32, #tpu.memory_space<vmem>>, vector<4x4xf32>
    %cst_243 = arith.constant dense<0.000000e+00> : vector<4x256xf32>
    %316 = tpu.matmul %315, %314, %cst_243 {dimension_numbers = #tpu.dot_dimension_numbers<[1], [0], [0], [1], [0, 0, 1, 1], [], []>} : vector<4x4xf32>, vector<4x256xf32>, vector<4x256xf32> -> vector<4x256xf32>
    %317 = arith.addf %309, %316 : vector<4x256xf32>
    %c0_244 = arith.constant 0 : index
    %c173 = arith.constant 173 : index
    %318 = vector.load %arg7[%c0_244, %c173] : memref<4x435xf32, #tpu.memory_space<vmem>>, vector<4x256xf32>
    %c0_245 = arith.constant 0 : index
    %c0_246 = arith.constant 0 : index
    %c0_247 = arith.constant 0 : index
    %319 = vector.load %arg3[%c0_245, %c0_246, %c0_247] : memref<7x1x256xf32, #tpu.memory_space<vmem>>, vector<1x1x256xf32>
    %320 = vector.shape_cast %319 : vector<1x1x256xf32> to vector<1x256xf32>
    %321 = vector.broadcast %320 : vector<1x256xf32> to vector<4x256xf32>
    %322 = arith.mulf %318, %321 : vector<4x256xf32>
    %c0_248 = arith.constant 0 : index
    %c168 = arith.constant 168 : index
    %323 = vector.load %arg2[%c0_248, %c168] : memref<4x196xf32, #tpu.memory_space<vmem>>, vector<4x4xf32>
    %cst_249 = arith.constant dense<0.000000e+00> : vector<4x256xf32>
    %324 = tpu.matmul %323, %322, %cst_249 {dimension_numbers = #tpu.dot_dimension_numbers<[1], [0], [0], [1], [0, 0, 1, 1], [], []>} : vector<4x4xf32>, vector<4x256xf32>, vector<4x256xf32> -> vector<4x256xf32>
    %325 = arith.addf %317, %324 : vector<4x256xf32>
    %c0_250 = arith.constant 0 : index
    %c174 = arith.constant 174 : index
    %326 = vector.load %arg7[%c0_250, %c174] : memref<4x435xf32, #tpu.memory_space<vmem>>, vector<4x256xf32>
    %c1_251 = arith.constant 1 : index
    %c0_252 = arith.constant 0 : index
    %c0_253 = arith.constant 0 : index
    %327 = vector.load %arg3[%c1_251, %c0_252, %c0_253] : memref<7x1x256xf32, #tpu.memory_space<vmem>>, vector<1x1x256xf32>
    %328 = vector.shape_cast %327 : vector<1x1x256xf32> to vector<1x256xf32>
    %329 = vector.broadcast %328 : vector<1x256xf32> to vector<4x256xf32>
    %330 = arith.mulf %326, %329 : vector<4x256xf32>
    %c0_254 = arith.constant 0 : index
    %c172 = arith.constant 172 : index
    %331 = vector.load %arg2[%c0_254, %c172] : memref<4x196xf32, #tpu.memory_space<vmem>>, vector<4x4xf32>
    %cst_255 = arith.constant dense<0.000000e+00> : vector<4x256xf32>
    %332 = tpu.matmul %331, %330, %cst_255 {dimension_numbers = #tpu.dot_dimension_numbers<[1], [0], [0], [1], [0, 0, 1, 1], [], []>} : vector<4x4xf32>, vector<4x256xf32>, vector<4x256xf32> -> vector<4x256xf32>
    %333 = arith.addf %325, %332 : vector<4x256xf32>
    %c0_256 = arith.constant 0 : index
    %c175 = arith.constant 175 : index
    %334 = vector.load %arg7[%c0_256, %c175] : memref<4x435xf32, #tpu.memory_space<vmem>>, vector<4x256xf32>
    %c2_257 = arith.constant 2 : index
    %c0_258 = arith.constant 0 : index
    %c0_259 = arith.constant 0 : index
    %335 = vector.load %arg3[%c2_257, %c0_258, %c0_259] : memref<7x1x256xf32, #tpu.memory_space<vmem>>, vector<1x1x256xf32>
    %336 = vector.shape_cast %335 : vector<1x1x256xf32> to vector<1x256xf32>
    %337 = vector.broadcast %336 : vector<1x256xf32> to vector<4x256xf32>
    %338 = arith.mulf %334, %337 : vector<4x256xf32>
    %c0_260 = arith.constant 0 : index
    %c176 = arith.constant 176 : index
    %339 = vector.load %arg2[%c0_260, %c176] : memref<4x196xf32, #tpu.memory_space<vmem>>, vector<4x4xf32>
    %cst_261 = arith.constant dense<0.000000e+00> : vector<4x256xf32>
    %340 = tpu.matmul %339, %338, %cst_261 {dimension_numbers = #tpu.dot_dimension_numbers<[1], [0], [0], [1], [0, 0, 1, 1], [], []>} : vector<4x4xf32>, vector<4x256xf32>, vector<4x256xf32> -> vector<4x256xf32>
    %341 = arith.addf %333, %340 : vector<4x256xf32>
    %c0_262 = arith.constant 0 : index
    %c176_263 = arith.constant 176 : index
    %342 = vector.load %arg7[%c0_262, %c176_263] : memref<4x435xf32, #tpu.memory_space<vmem>>, vector<4x256xf32>
    %c0_264 = arith.constant 0 : index
    %c180 = arith.constant 180 : index
    %343 = vector.load %arg2[%c0_264, %c180] : memref<4x196xf32, #tpu.memory_space<vmem>>, vector<4x4xf32>
    %cst_265 = arith.constant dense<0.000000e+00> : vector<4x256xf32>
    %344 = tpu.matmul %343, %342, %cst_265 {dimension_numbers = #tpu.dot_dimension_numbers<[1], [0], [0], [1], [0, 0, 1, 1], [], []>} : vector<4x4xf32>, vector<4x256xf32>, vector<4x256xf32> -> vector<4x256xf32>
    %345 = arith.addf %341, %344 : vector<4x256xf32>
    %c0_266 = arith.constant 0 : index
    %c177 = arith.constant 177 : index
    %346 = vector.load %arg7[%c0_266, %c177] : memref<4x435xf32, #tpu.memory_space<vmem>>, vector<4x256xf32>
    %c4_267 = arith.constant 4 : index
    %c0_268 = arith.constant 0 : index
    %c0_269 = arith.constant 0 : index
    %347 = vector.load %arg3[%c4_267, %c0_268, %c0_269] : memref<7x1x256xf32, #tpu.memory_space<vmem>>, vector<1x1x256xf32>
    %348 = vector.shape_cast %347 : vector<1x1x256xf32> to vector<1x256xf32>
    %349 = vector.broadcast %348 : vector<1x256xf32> to vector<4x256xf32>
    %350 = arith.mulf %346, %349 : vector<4x256xf32>
    %c0_270 = arith.constant 0 : index
    %c184 = arith.constant 184 : index
    %351 = vector.load %arg2[%c0_270, %c184] : memref<4x196xf32, #tpu.memory_space<vmem>>, vector<4x4xf32>
    %cst_271 = arith.constant dense<0.000000e+00> : vector<4x256xf32>
    %352 = tpu.matmul %351, %350, %cst_271 {dimension_numbers = #tpu.dot_dimension_numbers<[1], [0], [0], [1], [0, 0, 1, 1], [], []>} : vector<4x4xf32>, vector<4x256xf32>, vector<4x256xf32> -> vector<4x256xf32>
    %353 = arith.addf %345, %352 : vector<4x256xf32>
    %c0_272 = arith.constant 0 : index
    %c178 = arith.constant 178 : index
    %354 = vector.load %arg7[%c0_272, %c178] : memref<4x435xf32, #tpu.memory_space<vmem>>, vector<4x256xf32>
    %c5_273 = arith.constant 5 : index
    %c0_274 = arith.constant 0 : index
    %c0_275 = arith.constant 0 : index
    %355 = vector.load %arg3[%c5_273, %c0_274, %c0_275] : memref<7x1x256xf32, #tpu.memory_space<vmem>>, vector<1x1x256xf32>
    %356 = vector.shape_cast %355 : vector<1x1x256xf32> to vector<1x256xf32>
    %357 = vector.broadcast %356 : vector<1x256xf32> to vector<4x256xf32>
    %358 = arith.mulf %354, %357 : vector<4x256xf32>
    %c0_276 = arith.constant 0 : index
    %c188 = arith.constant 188 : index
    %359 = vector.load %arg2[%c0_276, %c188] : memref<4x196xf32, #tpu.memory_space<vmem>>, vector<4x4xf32>
    %cst_277 = arith.constant dense<0.000000e+00> : vector<4x256xf32>
    %360 = tpu.matmul %359, %358, %cst_277 {dimension_numbers = #tpu.dot_dimension_numbers<[1], [0], [0], [1], [0, 0, 1, 1], [], []>} : vector<4x4xf32>, vector<4x256xf32>, vector<4x256xf32> -> vector<4x256xf32>
    %361 = arith.addf %353, %360 : vector<4x256xf32>
    %c0_278 = arith.constant 0 : index
    %c179 = arith.constant 179 : index
    %362 = vector.load %arg7[%c0_278, %c179] : memref<4x435xf32, #tpu.memory_space<vmem>>, vector<4x256xf32>
    %c6_279 = arith.constant 6 : index
    %c0_280 = arith.constant 0 : index
    %c0_281 = arith.constant 0 : index
    %363 = vector.load %arg3[%c6_279, %c0_280, %c0_281] : memref<7x1x256xf32, #tpu.memory_space<vmem>>, vector<1x1x256xf32>
    %364 = vector.shape_cast %363 : vector<1x1x256xf32> to vector<1x256xf32>
    %365 = vector.broadcast %364 : vector<1x256xf32> to vector<4x256xf32>
    %366 = arith.mulf %362, %365 : vector<4x256xf32>
    %c0_282 = arith.constant 0 : index
    %c192 = arith.constant 192 : index
    %367 = vector.load %arg2[%c0_282, %c192] : memref<4x196xf32, #tpu.memory_space<vmem>>, vector<4x4xf32>
    %cst_283 = arith.constant dense<0.000000e+00> : vector<4x256xf32>
    %368 = tpu.matmul %367, %366, %cst_283 {dimension_numbers = #tpu.dot_dimension_numbers<[1], [0], [0], [1], [0, 0, 1, 1], [], []>} : vector<4x4xf32>, vector<4x256xf32>, vector<4x256xf32> -> vector<4x256xf32>
    %369 = arith.addf %361, %368 : vector<4x256xf32>
    %370 = vector.shape_cast %369 : vector<4x256xf32> to vector<1x4x256xf32>
    %c0_284 = arith.constant 0 : index
    %c0_285 = arith.constant 0 : index
    %c0_286 = arith.constant 0 : index
    %371 = vector.load %arg4[%c0_284, %c0_285, %c0_286] : memref<1x4x256xf32, #tpu.memory_space<vmem>>, vector<1x4x256xf32>
    tpu.vector_store %arg4[%c0_284, %c0_285, %c0_286], %370 {strides = array<i32>} : memref<1x4x256xf32, #tpu.memory_space<vmem>>, vector<1x4x256xf32>,
    %cst_287 = arith.constant dense<0.000000e+00> : vector<4xf32>
    %372 = vector.multi_reduction <add>, %369, %cst_287 [1] : vector<4x256xf32> to vector<4xf32>
    %373 = vector.shape_cast %372 : vector<4xf32> to vector<4x1xf32>
    %374 = vector.shape_cast %373 : vector<4x1xf32> to vector<1x4x1xf32>
    %c0_288 = arith.constant 0 : index
    %c0_289 = arith.constant 0 : index
    %c0_290 = arith.constant 0 : index
    %375 = vector.load %arg5[%c0_288, %c0_289, %c0_290] : memref<1x4x1xf32, #tpu.memory_space<vmem>>, vector<1x4x1xf32>
    tpu.vector_store %arg5[%c0_288, %c0_289, %c0_290], %374 {strides = array<i32>} : memref<1x4x1xf32, #tpu.memory_space<vmem>>, vector<1x4x1xf32>,
    %376 = arith.mulf %369, %369 : vector<4x256xf32>
    %cst_291 = arith.constant dense<0.000000e+00> : vector<4xf32>
    %377 = vector.multi_reduction <add>, %376, %cst_291 [1] : vector<4x256xf32> to vector<4xf32>
    %378 = vector.shape_cast %377 : vector<4xf32> to vector<4x1xf32>
    %379 = vector.shape_cast %378 : vector<4x1xf32> to vector<1x4x1xf32>
    %c0_292 = arith.constant 0 : index
    %c0_293 = arith.constant 0 : index
    %c0_294 = arith.constant 0 : index
    %380 = vector.load %arg6[%c0_292, %c0_293, %c0_294] : memref<1x4x1xf32, #tpu.memory_space<vmem>>, vector<1x4x1xf32>
    tpu.vector_store %arg6[%c0_292, %c0_293, %c0_294], %379 {strides = array<i32>} : memref<1x4x1xf32, #tpu.memory_space<vmem>>, vector<1x4x1xf32>,
    return
  }
  func.func @transform_0(%arg0: i32) -> (i32, i32, i32) {
    %c0_i32 = arith.constant 0 : i32
    %c0_i32_0 = arith.constant 0 : i32
    %c0_i32_1 = arith.constant 0 : i32
    return %arg0, %c0_i32, %c0_i32_0 : i32, i32, i32
  }
  func.func @transform_1(%arg0: i32) -> (i32, i32) {
    %c0_i32 = arith.constant 0 : i32
    %c0_i32_0 = arith.constant 0 : i32
    %c0_i32_1 = arith.constant 0 : i32
    return %c0_i32, %c0_i32_0 : i32, i32
  }
  func.func @transform_2(%arg0: i32) -> (i32, i32, i32) {
    %c0_i32 = arith.constant 0 : i32
    %c0_i32_0 = arith.constant 0 : i32
    %c0_i32_1 = arith.constant 0 : i32
    %c0_i32_2 = arith.constant 0 : i32
    return %c0_i32, %c0_i32_0, %c0_i32_1 : i32, i32, i32
  }
  func.func @transform_3(%arg0: i32) -> (i32, i32, i32) {
    %c0_i32 = arith.constant 0 : i32
    %c0_i32_0 = arith.constant 0 : i32
    %c0_i32_1 = arith.constant 0 : i32
    return %arg0, %c0_i32, %c0_i32_0 : i32, i32, i32
  }
  func.func @transform_4(%arg0: i32) -> (i32, i32, i32) {
    %c0_i32 = arith.constant 0 : i32
    %c0_i32_0 = arith.constant 0 : i32
    %c0_i32_1 = arith.constant 0 : i32
    return %arg0, %c0_i32, %c0_i32_0 : i32, i32, i32
  }
  func.func @transform_5(%arg0: i32) -> (i32, i32, i32) {
    %c0_i32 = arith.constant 0 : i32
    %c0_i32_0 = arith.constant 0 : i32
    %c0_i32_1 = arith.constant 0 : i32
    return %arg0, %c0_i32, %c0_i32_0 : i32, i32, i32
  }
}

</mosaic_0001>

<bundles_post_ra>
// kernel: tpu_custom_call.1
= control target key start
LH: loop header
LB: loop body
LE: loop exit
PB: predicated region body
PF: predicated region fallthrough
CT: control target
= control target key end

     0   :  { %s6396_s0 = inlined_call_operand.hbm [shape: f32[2,4,256], index: 0, kind: input, shape index: {}]   ;;  %s6397_s1 = inlined_call_operand.hbm [shape: f32[4,196], index: 1, kind: input, shape index: {}]   ;;  %s6398_s2 = inlined_call_operand.hbm [shape: f32[7,1,256], index: 2, kind: input, shape index: {}]   ;;  %s6399_s3 = inlined_call_operand.hbm [shape: f32[2,4,256], index: 3, kind: output, shape index: {0}]   ;;  %s6400_s4 = inlined_call_operand.vmem [shape: f32[2,4,1], index: 4, kind: output, shape index: {1}]   ;;  %s6401_s5 = inlined_call_operand.vmem [shape: f32[2,4,1], index: 5, kind: output, shape index: {2}]  }
   0x1   :  { %6537 = sst [smem:[#allocation19_spill]] %s6396_s0 }
   0x2   :  { %6538 = sst [smem:[#allocation20_spill]] %s6397_s1 }
   0x3   :  { %6539 = sst [smem:[#allocation21_spill]] %s6398_s2 }
   0x4   :  { %11 = vsyncpa [#allocation4], 0 }
   0x5   :  { %13 = vsyncpa [#allocation4 + $0x1], 0 }
   0x6   :  { %14 = vsyncpa [#allocation7], 0 }
   0x7   :  { %15 = vsyncpa [#allocation5], 0 }
   0x8   :  { %17 = vsyncpa [#allocation5 + $0x1], 0  ;;  %s5049_s18 = smov 0   ;;  %s5051_s19 = smov 0  }
   0x9   :  { %s5053_s20 = smov 0   ;;  %s5055_s21 = smov 0  }
   0xa LB: > { %6540 = sst [smem:[#allocation13_spill]] %s4931_s19  ;;  %s5070_s22 = sadd.s32 4294967295, %s4939_s21   ;;  %s4939_s21 = sphi %s5055_s21, %s6672_s21   ;;  %s4935_s20 = sphi %s5053_s20, %s6675_s20   ;;  %s4931_s19 = sphi %s5051_s19, %s6674_s19   ;;  %s4927_s18 = sphi %s5049_s18, %s6673_s18  }
   0xb   : > { %6541 = sst [smem:[#allocation14_spill]] %s4935_s20  ;;  %s4416_s23 = sadd.s32 4294967294, %s4939_s21  }
   0xc   : > { %6542 = sst [smem:[#allocation15_spill]] %s4939_s21  ;;  %p43_p0 = scmp.ne.s32.totalorder %s4931_s19, %s4927_s18 }
   0xd   : > { %p44_p1 = scmp.eq.s32.totalorder %s5070_s22, 0  ;;  %p109_p2 = scmp.eq.s32.totalorder %s5070_s22, 1 }
   0xe   : > { %p115_p3 = scmp.eq.s32.totalorder %s4416_s23, 1  ;;  %p4417_p5 = scmp.ge.s32.totalorder %s4939_s21, 1 }
   0xf   : > { %p5079_p4 = por %p44_p1, %p43_p0  ;;  %p174_p7 = scmp.lt.s32.totalorder %s4939_s21, 3 }
  0x10   : > { %p5084_p6 = por %p115_p3, %p43_p0  ;;  %s6546_s1 = sld [smem:[#allocation20_spill]] }
  0x11   : > { %p5092_p8 = pnand %p4417_p5, %p174_p7  ;;  %s4941_s30 = smov [#allocation6]  }
  0x12   : > { %s6544_s25 = scalar_select %p5084_p6, 1, 0 }
  0x13   : > { %p4646_p10 = pneg %p5092_p8  ;;  %s188_s6 = sshll.u32 %s4941_s30, 4  ;;  %s189_s6 = int_to_ptr.vmem [resolvable:$true] %s188_s6 }
  0x14   : > { %6545 = sst [smem:[#allocation16_spill]] %s6544_s25  ;;  %s4942_s10 = smov [#allocation8]  }
  0x15   : > { %s6548_s2 = sld [smem:[#allocation21_spill]]  ;;  %p4647_p11 = pnand %p4646_p10, %p44_p1 }
  0x16   : > { %s186_s28 = sshll.u32 %s6546_s1, 4  ;;  %s199_s11 = sshll.u32 %s4942_s10, 4  ;;  %s187_s28 = int_to_ptr.hbm [resolvable:$true] %s186_s28  ;;  %s200_s11 = int_to_ptr.vmem [resolvable:$true] %s199_s11 }
  0x17   : > { %4649 = dma.hbm_to_vmem [thread:$0]  (!%p4647_p11), %s187_s28, 128, %s189_s6, [#allocation7]  }
  0x18   : > { %s4943_s12 = smov 32   ;;  %s4944_s13 = smov 2  }
  0x19   : > { %s5105_s14 = sadd.s32 1, %s4939_s21   ;;  %s30_s16 = sadd.s32 1, %s4935_s20 }
  0x1a   : > { %6549 = sst [smem:[#allocation17_spill]] %s5105_s14  ;;  %s27_s15 = ssub.s32 %s4939_s21, %s5105_s14 }
  0x1b   : > { %s197_s9 = sshll.u32 %s6548_s2, 4  ;;  %p28_p12 = scmp.eq.s32.totalorder %s27_s15, 0  ;;  %s198_s9 = int_to_ptr.hbm [resolvable:$true] %s197_s9 }
  0x1c   : > { %4652 = dma.hbm_to_vmem [thread:$0]  (!%p4647_p11), %s198_s9, 224, %s200_s11, [#allocation7], %s4943_s12, %s4943_s12, %s4944_s13  }
  0x1d   : > { %p37_p13 = scmp.ne.s32.totalorder %s4935_s20, %s4931_s19  ;;  %p38_p0 = scmp.eq.s32.totalorder %s4939_s21, 0 }
  0x1e   : > { %s5114_s17 = scalar_select %p28_p12, %s4935_s20, %s30_s16  }
  0x1f   : > { %p39_p3 = por %p38_p0, %p37_p13  ;;  %p5118_p5 = por %p109_p2, %p37_p13 }
  0x20   : > { %6550 = sst [smem:[#allocation18_spill]] %s5114_s17  ;;  %p4663_p7 = scmp.lt.s32.totalorder %s4939_s21, 2 }
  0x21   : > { %s213_s26 = sand.u32 1, %s4935_s20   ;;  %s4632_s28 = sshll.u32 %s4939_s21, 3 }
  0x22   : > { %s4421_s27 = sshll.u32 %s213_s26, 3  ;;  %s6552_s0 = sld [smem:[#allocation19_spill]] }
  0x23   : > { %s217_s8 = scalar_lea.vmem [#allocation3], %s4421_s27  ;;  %p5128_p10 = pnand %p4663_p7, %p39_p3 }
  0x24   : > { %s226_s9 = sshll.u32 %s217_s8, 4  ;;  %s214_s12 = scalar_lea.sflag [#allocation4], %s213_s26  ;;  %s227_s9 = int_to_ptr.vmem [resolvable:$true] %s226_s9 }
  0x25   : > { %p4843_p11 = pneg %p5128_p10 }
  0x28   : > { %s222_s7 = scalar_lea.hbm %s6552_s0, %s4632_s28  ;;  %s4846_s28 = scalar_lea.hbm %s6552_s0, 16 }
  0x29   : > { %s224_s10 = sshll.u32 %s222_s7, 4  ;;  %s225_s10 = int_to_ptr.hbm [resolvable:$true] %s224_s10 }
  0x2a   : > { %s4839_s13 = sshra.s32 %s225_s10, 4  ;;  %s4840_s13 = int_to_ptr.hbm [resolvable:$true] %s4839_s13 }
  0x2b   : > { %s4841_s15 = scalar_lea.hbm %s4840_s13, 8  ;;  %p4847_p0 = scmp.lt.s32.totalorder %s4840_s13, %s6552_s0 }
  0x2c   : > { %p4842_p2 = scmp.ne.s32.totalorder %s4840_s13, %s4841_s15  ;;  %p4848_p3 = scmp.lt.s32.totalorder %s4846_s28, %s4841_s15 }
  0x2e   : > { %p4844_p12 = pnand %p4843_p11, %p4842_p2  ;;  %p4849_p7 = por %p4848_p3, %p4847_p0 }
  0x30   : > { %p4845_p13 = pneg %p4844_p12 }
  0x32   : > { %p4850_p9 = pnand %p4849_p7, %p4845_p13 }
  0x34   : > { %4853 = shalt.err (!%p4850_p9)
}
  0x35   : > { %4656 = dma.hbm_to_vmem [thread:$0]  (!%p5128_p10), %s225_s10, 128, %s227_s9, %s214_s12  }
  0x36   : > { %235 = sbr.rel (%p5092_p8) target bundleno = 1322 (0x52a), region = 32  ;;  %s5145_s26 = sand.u32 (!%p5092_p8), 1, %s4931_s19  }
  0x37   : > { %s6402_s7 = sshll.u32 (!%p5092_p8), %s5145_s26, 3  ;;  %s238_s8 = scalar_lea.sflag (!%p5092_p8), [#allocation4], %s5145_s26 }
  0x38   : > { %s5151_s13 = scalar_lea.vmem (!%p5092_p8), [#allocation3], %s6402_s7 }
  0x3b   : > { %4914 = dma.done.wait (%p5079_p4), %s238_s8, 128  }
  0x3c   : > { %4916 = vsyncadd (%p5079_p4), %s238_s8, 4294967168 }
  0x3d   : > { %4918 = dma.done.wait (%p44_p1), [#allocation7], 352  }
  0x3e   : > { %4920 = vsyncadd (%p44_p1), [#allocation7], 4294966944  ;;  %v321_v0 = vld [vmem:[#allocation8 + $0x2] sm:$0x3]  ;;  %v304_v1 = vld [vmem:[#allocation8] sm:$0x3] }
  0x3f   : > { %v471_v2 = vld [vmem:[#allocation8 + $0x4] sm:$0x3]  ;;  %vm296_vm0 = vcmask 1043456   ;;  %v323_v3 = vperm.slane %v321_v0, 0  ;;  %v324_v4 = vperm.slane %v321_v0, 1  ;;  %v307_v11 = vperm.slane %v304_v1, 1 }
  0x40   : > { %v722_v5 = vld [vmem:[#allocation8 + $0xa] sm:$0x3]  ;;  %v473_v6 = vperm.slane %v471_v2, 0  ;;  %v474_v7 = vperm.slane %v471_v2, 1  ;;  %v633_v12 = vld [vmem:[#allocation8 + $0x8] sm:$0x3] }
  0x41   : > { %v724_v8 = vperm.slane %v722_v5, 0  ;;  %v725_v9 = vperm.slane %v722_v5, 1  ;;  %v325_v10 = vrot.slane %v324_v4, 4  ;;  %v811_v13 = vld [vmem:[#allocation8 + $0xc] sm:$0x3]  ;;  %s6405_s24 = smov 78  }
  0x42   : > { %v475_v14 = vrot.slane %v474_v7, 4  ;;  %v814_v16 = vperm.slane %v811_v13, 1  ;;  %v636_v20 = vperm.slane %v633_v12, 1  ;;  %v306_v21 = vperm.slane %v304_v1, 0  ;;  %s6407_s29 = smov 79   ;;  %s6411_s9 = smov 82  }
  0x43   : > { %v726_v15 = vrot.slane %v725_v9, 4  ;;  %v5162_v17 = vsel %vm296_vm0, %v323_v3, %v325_v10  ;;  %v308_v22 = vrot.slane %v307_v11, 4  ;;  %v813_v23 = vperm.slane %v811_v13, 0  ;;  %s6403_s10 = smov 77   ;;  %s6413_s11 = smov 83   ;;  %v300_v33 = vld [vmem:[%s5151_s13] sm:$0xff] }
  0x44   : > { %327 = vrot.lane.b32.xlu0 %v5162_v17, %s6405_s24  ;;  %v5167_v18 = vsel %vm296_vm0, %v473_v6, %v475_v14  ;;  %v815_v24 = vrot.slane %v814_v16, 4  ;;  %v635_v25 = vperm.slane %v633_v12, 0  ;;  %v637_v26 = vrot.slane %v636_v20, 4  ;;  %s6409_s12 = smov 81   ;;  %v5191_v30 = vld [vmem:[#allocation6] sm:$0xf] }
  0x45   : > { %v5170_v19 = vsel %vm296_vm0, %v724_v8, %v726_v15  ;;  %477 = vrot.lane.b32.xlu1 %v5167_v18, %s6407_s29  ;;  %v5177_v27 = vsel %vm296_vm0, %v306_v21, %v308_v22  ;;  %s6415_s15 = smov 93   ;;  %337 = vst [vmem:[#allocation1] ss:$2 sm:$0xff] %v5191_v30  ;;  %s6419_s16 = smov 95   ;;  %vm297_vm1 = vcmask 416772   ;;  %v4975_v32 = vmov 0.0  }
  0x46   : > { %728 = vrot.lane.b32.xlu2 %v5170_v19, %s6411_s9  ;;  %v5180_v28 = vsel %vm296_vm0, %v813_v23, %v815_v24  ;;  %v5185_v29 = vsel %vm296_vm0, %v635_v25, %v637_v26  ;;  %s6417_s27 = smov 94   ;;  %s6421_s28 = smov 97   ;;  %vm298_vm2 = vmor %vm297_vm1, %vm296_vm0  ;;  %295 = vst [vmem:[#allocation2] sm:$0xff] %v4975_v32  ;;  %vm6464_vm3 = vcmask 637952   ;;  %vm6463_vm4 = vcmask 629760  }
  0x47   : > { %s6425_s30 = smov 99   ;;  %s6423_s6 = smov 98   ;;  %299 = vst.msk [vmem:[#allocation2 + $0x8] sm:$0xff] %vm298_vm2, %v4975_v32  ;;  %v486_v59 = vld [vmem:[#allocation6] sm:$0xf]  ;;  %vm6467_vm5 = vcmask 646144  }
  0x48   : > { %s6430_s8 = smov 109   ;;  %s6432_s7 = smov 111   ;;  %301 = vst [vmem:[#allocation2 + $0x4] sm:$0xff] %v300_v33  ;;  %v559_v12 = vld [vmem:[#allocation6] sm:$0xf]  ;;  %vm6468_vm6 = vcmask 662528  }
  0x49   : > { %s6438_s24 = smov 113   ;;  %s6436_s29 = smov 115   ;;  %v648_v32 = vld [vmem:[#allocation6] sm:$0xf]  ;;  %vm6476_vm7 = vcmask 670720   ;;  %vm6509_vm8 = vcmask 678912  }
  0x4a   : > { %s6440_s9 = smov 125   ;;  %s4981_s13 = smov 45   ;;  %vm6478_vm9 = vcmask 760832   ;;  %vm6511_vm10 = vcmask 769024   ;;  %vm6517_vm11 = vcmask 408576   ;;  %vm6515_vm12 = vcmask 777216  }
  0x4b   : > { %vm419_vm13 = vcmask 416768   ;;  %vm506_vm14 = vcmask 400384   ;;  %vm6518_vm15 = vcmask 793600   ;;  %vm358_vm1 = vcmask 31744   ;;  %s6510_s0 = smov 64   ;;  %s6576_s1 = smov 99  }
  0x4c   : > { %310 = vrot.lane.b32.xlu0 %v5177_v27, %s6403_s10  ;;  %s6427_s10 = smov 110   ;;  %v338_v31 = vld.sshfl [vmem:[#allocation1] sm:$0xff pattern:$0x75316420]  ;;  %vm6519_vm2 = vcmask 801792   ;;  %s5008_s2 = smov 56  }
  0x4d   : > { %639 = vrot.lane.b32.xlu1 %v5185_v29, %s6409_s12  ;;  %s6434_s12 = smov 114   ;;  %s6578_s17 = smov 48  }
  0x4e   : > { %817 = vrot.lane.b32.xlu2 %v5180_v28, %s6413_s11  ;;  %s6444_s11 = smov 127   ;;  %s6581_s20 = smov 96  }
  0x4f   : > { %v303_v38 = vld [vmem:[#allocation2 + $0x8] sm:$0xf]  ;;  %v5271_v39 = vld [vmem:[#allocation2] sm:$0xff]  ;;  %s6589_s19 = smov 93   ;;  %s5011_s14 = smov 40  }
  0x50   : > { %v469_v56 = vld [vmem:[#allocation2 + $0x8] sm:$0xf]  ;;  %s5012_s21 = smov 36   ;;  %s6600_s25 = smov 32  }
  0x51   : > { %v558_v5 = vld [vmem:[#allocation2 + $0x8] sm:$0xf] }
  0x52   : > { %v631_v10 = vld [vmem:[#allocation2 + $0x8] sm:$0xf] }
  0x53   : > { %v720_v20 = vld [vmem:[#allocation2 + $0x8] sm:$0xf] }
  0x54   : > { %899 = vrot.lane.b32.xlu0 %v5177_v27, %s6415_s15  ;;  %s6442_s15 = smov 126  }
  0x55   : > { %981 = vrot.lane.b32.xlu1 %v5162_v17, %s6417_s27  ;;  %s6429_s27 = smov 124  }
  0x56   : > { %1063 = vrot.lane.b32.xlu2 %v5167_v18, %s6419_s16  ;;  %s6450_s16 = smov 3  }
  0x5c   : > { %1218 = vrot.lane.b32.xlu0 %v5185_v29, %s6421_s28  ;;  %s6452_s28 = smov 13  }
  0x5d   : > { %1300 = vrot.lane.b32.xlu1 %v5170_v19, %s6423_s6  ;;  %s6446_s6 = smov 1  }
  0x5e   : > { %1382 = vrot.lane.b32.xlu2 %v5180_v28, %s6425_s30  ;;  %s6500_s30 = smov 17  }
  0x64   : > { %1464 = vrot.lane.b32.xlu0 %v5177_v27, %s6430_s8  ;;  %s4973_s8 = smov 30  }
  0x65   : > { %1546 = vrot.lane.b32.xlu1 %v5162_v17, %s6427_s10  ;;  %s6454_s10 = smov 14  }
  0x66   : > { %1628 = vrot.lane.b32.xlu2 %v5167_v18, %s6432_s7  ;;  %s4974_s7 = smov 18  }
  0x6c   : > { %1783 = vrot.lane.b32.xlu0 %v5185_v29, %s6438_s24  ;;  %s4978_s24 = smov 19  }
  0x6d   : > { %1865 = vrot.lane.b32.xlu1 %v5170_v19, %s6434_s12  ;;  %s6456_s12 = smov 15  }
  0x6e   : > { %1947 = vrot.lane.b32.xlu2 %v5180_v28, %s6436_s29  ;;  %s4977_s29 = smov 31  }
  0x74   : > { %2029 = vrot.lane.b32.xlu0 %v5177_v27, %s6440_s9  ;;  %s4979_s9 = smov 29  }
  0x75   : > { %2111 = vrot.lane.b32.xlu1 %v5162_v17, %s6442_s15  ;;  %s4980_s15 = smov 35  }
  0x76   : > { %2193 = vrot.lane.b32.xlu2 %v5167_v18, %s6444_s11  ;;  %s4982_s11 = smov 33  }
  0x7c   : > { %339 = vrot.lane.b32.xlu0 %v338_v31, %s6429_s27  ;;  %s6448_s27 = smov 2  }
  0x7d   : > { %2574 = vrot.lane.b32.xlu1 %v5177_v27, %s6452_s28  ;;  %s4986_s28 = smov 47  }
  0x7e   : > { %2494 = vrot.lane.b32.xlu2 %v5180_v28, %s6450_s16  ;;  %s4985_s16 = smov 34  }
  0x84   : > { %2334 = vrot.lane.b32.xlu0 %v5185_v29, %s6446_s6  ;;  %s4983_s6 = smov 50  }
  0x85   : > { %2654 = vrot.lane.b32.xlu1 %v5162_v17, %s6454_s10  ;;  %s4987_s10 = smov 49  }
  0x86   : > { %2887 = vrot.lane.b32.xlu2 %v5185_v29, %s6500_s30 }
  0x8c   : > { %2414 = vrot.lane.b32.xlu0 %v5170_v19, %s6448_s27  ;;  %s4984_s27 = smov 46  }
  0x8d   : > { %2963 = vrot.lane.b32.xlu1 %v5170_v19, %s4974_s7 }
  0x8e   : > { %3203 = vrot.lane.b32.xlu2 %v5162_v17, %s4973_s8 }
  0x94   : > { %2734 = vrot.lane.b32.xlu0 %v5167_v18, %s6456_s12  ;;  %s4988_s12 = smov 51  }
  0x95   : > { %3043 = vrot.lane.b32.xlu1 %v5180_v28, %s4978_s24 }
  0x96   : > { %3283 = vrot.lane.b32.xlu2 %v5167_v18, %s4977_s29 }
  0x9c   : > { %3123 = vrot.lane.b32.xlu0 %v5177_v27, %s4979_s9 }
  0x9d   : > { %3676 = vrot.lane.b32.xlu1 %v5177_v27, %s4981_s13  ;;  %v809_v27 = vld [vmem:[#allocation2 + $0x8] sm:$0xf] }
  0x9e   : > { %3596 = vrot.lane.b32.xlu2 %v5180_v28, %s4980_s15 }
  0xa0   : > { %v5255_v34 = vpop.permute.xlu2 %728 }
  0xa4   : > { %3436 = vrot.lane.b32.xlu0 %v5185_v29, %s4982_s11 }
  0xa5   : > { %3756 = vrot.lane.b32.xlu1 %v5162_v17, %s4984_s27 }
  0xa6   : > { %4069 = vrot.lane.b32.xlu2 %v5170_v19, %s4983_s6 }
  0xa8   : > { %v5263_v35 = vpop.permute.xlu2 %817 }
  0xa9   : > { %v819_v25 = vrot.slane %v5263_v35, 4 }
  0xab   : > { %v825_v31 = vmul.f32 %v819_v25, %v809_v27 }
  0xac   : > { %3516 = vrot.lane.b32.xlu0 %v5170_v19, %s4985_s16 }
  0xb0   : > { %v5267_v36 = vpop.permute.xlu2 %1063 }
  0xb4   : > { %3836 = vrot.lane.b32.xlu0 %v5167_v18, %s4986_s28  ;;  %v730_v18 = vrot.slane %v5255_v34, 4 }
  0xb6   : > { %v328_v37 = vpop.permute.xlu0 %327  ;;  %v736_v22 = vmul.f32 %v730_v18, %v720_v20 }
  0xb7   : > { %v329_v40 = vrot.slane %v328_v37, 4  ;;  %v478_v41 = vpop.permute.xlu1 %477 }
  0xb8   : > { %v5277_v45 = vpop.permute.xlu2 %1382  ;;  %v479_v55 = vrot.slane %v478_v41, 4 }
  0xb9   : > { %v331_v42 = vsel %vm6464_vm3, %v329_v40, %v328_v37  ;;  %v335_v43 = vmul.f32 %v329_v40, %v303_v38  ;;  %vm668_vm3 = vcmask 384000  }
  0xba   : > { %v334_v44 = vmul.f32 %v5271_v39, %v331_v42  ;;  %v485_v60 = vmul.f32 %v479_v55, %v469_v56  ;;  %v481_v2 = vsel %vm6467_vm5, %v479_v55, %v478_v41  ;;  %v898_v41 = vld [vmem:[#allocation2 + $0x8] sm:$0xf]  ;;  %vm1010_vm5 = vcmask 277504  }
  0xbb   : > { %345 = vst [vmem:[#allocation1 + $0x10] ss:$2 sm:$0xff] %v335_v43  ;;  %v484_v4 = vmul.f32 %v5271_v39, %v481_v2  ;;  %v732_v2 = vsel %vm6476_vm7, %v730_v18, %v5255_v34  ;;  %v826_v34 = vld [vmem:[#allocation6] sm:$0xf]  ;;  %v1144_v18 = vld [vmem:[#allocation2 + $0x8] sm:$0xf] }
  0xbc   : > { %343 = vst [vmem:[#allocation1] ss:$2 sm:$0xff] %v334_v44  ;;  %3989 = vrot.lane.b32.xlu0 %v5185_v29, %s4987_s10  ;;  %vm6521_vm7 = vcmask 809984  }
  0xbe   : > { %v311_v46 = vpop.permute.xlu0 %310 }
  0xbf   : > { %v312_v47 = vrot.slane %v311_v46, 4  ;;  %v5279_v48 = vpop.permute.xlu1 %639 }
  0xc0   : > { %v5288_v58 = vpop.permute.xlu2 %1628  ;;  %v641_v9 = vrot.slane %v5279_v48, 4 }
  0xc1   : > { %v314_v49 = vsel %vm6463_vm4, %v312_v47, %v311_v46  ;;  %v318_v50 = vmul.f32 %v312_v47, %v303_v38  ;;  %vm928_vm4 = vcmask 285696  }
  0xc2   : > { %v348_v51 = vld.sshfl [vmem:[#allocation1 + $0x10] sm:$0xff pattern:$0x75316420]  ;;  %v317_v52 = vmul.f32 %v5271_v39, %v314_v49  ;;  %v647_v13 = vmul.f32 %v641_v9, %v631_v10  ;;  %v643_v43 = vsel %vm6468_vm6, %v641_v9, %v5279_v48  ;;  %vm846_vm6 = vcmask 367616  }
  0xc3   : > { %v346_v53 = vld.sshfl [vmem:[#allocation1] sm:$0xff pattern:$0x75316420]  ;;  %v347_v54 = vld.sshfl [vmem:[#allocation1 + $0x8] sm:$0xff pattern:$0x75316420]  ;;  %v646_v49 = vmul.f32 %v5271_v39, %v643_v43 }
  0xc4   : > { %407 = vst [vmem:[#allocation1] ss:$2 sm:$0xff] %v317_v52  ;;  %4149 = vrot.lane.b32.xlu0 %v5180_v28, %s4988_s12  ;;  %351 = vrot.lane.b32.xlu2 %v347_v54, %s4983_s6  ;;  %v980_v48 = vld [vmem:[#allocation2 + $0x8] sm:$0xf]  ;;  %v737_v54 = vld [vmem:[#allocation6] sm:$0xf] }
  0xc5   : > { %409 = vst [vmem:[#allocation1 + $0x10] ss:$2 sm:$0xff] %v318_v50  ;;  %349 = vrot.lane.b32.xlu1 %v346_v53, %s4983_s6 }
  0xc6   : > { %v5286_v57 = vpop.permute.xlu0 %899 }
  0xc7   : > { %v5290_v61 = vpop.permute.xlu1 %981  ;;  %v901_v40 = vrot.slane %v5286_v57, 4 }
  0xc8   : > { %v5296_v3 = vpop.permute.xlu2 %1947  ;;  %v983_v52 = vrot.slane %v5290_v61, 4 }
  0xc9   : > { %v907_v46 = vmul.f32 %v901_v40, %v898_v41 }
  0xca   : > { %v989_v55 = vmul.f32 %v983_v52, %v980_v48 }
  0xcb   : > { %v410_v62 = vld.sshfl [vmem:[#allocation1] sm:$0xff pattern:$0x75316420]  ;;  %v411_v63 = vld.sshfl [vmem:[#allocation1 + $0x8] sm:$0xff pattern:$0x75316420] }
  0xcc   : > { %v412_v0 = vld.sshfl [vmem:[#allocation1 + $0x10] sm:$0xff pattern:$0x75316420]  ;;  %488 = vst [vmem:[#allocation1] ss:$2 sm:$0xff] %v486_v59  ;;  %353 = vrot.lane.b32.xlu0 %v348_v51, %s4983_s6  ;;  %415 = vrot.lane.b32.xlu2 %v411_v63, %s4988_s12  ;;  %s6459_s6 = smov 120  }
  0xcd   : > { %496 = vst [vmem:[#allocation1 + $0x10] ss:$2 sm:$0xff] %v485_v60  ;;  %413 = vrot.lane.b32.xlu1 %v410_v62, %s4988_s12 }
  0xce   : > { %v5293_v1 = vpop.permute.xlu0 %1218 }
  0xcf   : > { %v5299_v7 = vpop.permute.xlu1 %1300 }
  0xd0   : > { %v5306_v16 = vpop.permute.xlu2 %2193  ;;  %v1302_v43 = vrot.slane %v5299_v7, 4 }
  0xd3   : > { %v489_v6 = vld.sshfl [vmem:[#allocation1] sm:$0xff pattern:$0x75316420] }
  0xd4   : > { %494 = vst [vmem:[#allocation1] ss:$2 sm:$0xff] %v484_v4  ;;  %v499_v8 = vld.sshfl [vmem:[#allocation1 + $0x10] sm:$0xff pattern:$0x75316420]  ;;  %417 = vrot.lane.b32.xlu0 %v412_v0, %s4988_s12  ;;  %s6490_s12 = smov 48  }
  0xd5   : > { %569 = vst [vmem:[#allocation1 + $0x10] ss:$2 sm:$0xff] %v558_v5  ;;  %504 = vrot.lane.b32.xlu2 %v499_v8, %s4987_s10  ;;  %490 = vrot.lane.b32.xlu1 %v489_v6, %s6459_s6  ;;  %v1065_v4 = vrot.slane %v5267_v36, 4  ;;  %v1062_v5 = vld [vmem:[#allocation2 + $0x8] sm:$0xf]  ;;  %v735_v6 = vmul.f32 %v732_v2, %v5271_v39  ;;  %s6485_s6 = smov 32  }
  0xd6   : > { %v5304_v11 = vpop.permute.xlu0 %1464  ;;  %v1381_v2 = vld [vmem:[#allocation2 + $0x8] sm:$0xf] }
  0xd7   : > { %v5311_v19 = vpop.permute.xlu1 %1546  ;;  %v1071_v10 = vmul.f32 %v1065_v4, %v1062_v5 }
  0xd8   : > { %v5321_v26 = vpop.permute.xlu2 %2494 }
  0xdb   : > { %v497_v14 = vld.sshfl [vmem:[#allocation1] sm:$0xff pattern:$0x75316420]  ;;  %v498_v15 = vld.sshfl [vmem:[#allocation1 + $0x8] sm:$0xff pattern:$0x75316420] }
  0xdc   : > { %561 = vst [vmem:[#allocation1] ss:$2 sm:$0xff] %v559_v12  ;;  %v572_v17 = vld.sshfl [vmem:[#allocation1 + $0x10] sm:$0xff pattern:$0x75316420] }
  0xdd   : > { %658 = vst [vmem:[#allocation1 + $0x10] ss:$2 sm:$0xff] %v647_v13  ;;  %577 = vrot.lane.b32.xlu1 %v572_v17, %s6490_s12  ;;  %500 = vrot.lane.b32.xlu2 %v497_v14, %s4987_s10 }
  0xde   : > { %v5313_v21 = vpop.permute.xlu0 %1783 }
  0xdf   : > { %v5325_v29 = vpop.permute.xlu1 %1865 }
  0xe0   : > { %v5337_v44 = vpop.permute.xlu2 %2887 }
  0xe3   : > { %v562_v23 = vld.sshfl [vmem:[#allocation1] sm:$0xff pattern:$0x75316420] }
  0xe4   : > { %567 = vst [vmem:[#allocation1] ss:$2 sm:$0xff] %v5271_v39  ;;  %v661_v24 = vld.sshfl [vmem:[#allocation1 + $0x10] sm:$0xff pattern:$0x75316420] }
  0xe5   : > { %747 = vst [vmem:[#allocation1 + $0x10] ss:$2 sm:$0xff] %v736_v22  ;;  %666 = vrot.lane.b32.xlu0 %v661_v24, %s4986_s28  ;;  %502 = vrot.lane.b32.xlu1 %v498_v15, %s4987_s10  ;;  %s6458_s10 = smov 116  }
  0xe6   : > { %v5323_v28 = vpop.permute.xlu0 %2029 }
  0xe7   : > { %v5341_v47 = vpop.permute.xlu1 %2111 }
  0xe8   : > { %v5351_v56 = vpop.permute.xlu2 %3203 }
  0xeb   : > { %v570_v33 = vld.sshfl [vmem:[#allocation1] sm:$0xff pattern:$0x75316420]  ;;  %v571_v37 = vld.sshfl [vmem:[#allocation1 + $0x8] sm:$0xff pattern:$0x75316420] }
  0xec   : > { %650 = vst [vmem:[#allocation1] ss:$2 sm:$0xff] %v648_v32  ;;  %v750_v38 = vld.sshfl [vmem:[#allocation1 + $0x10] sm:$0xff pattern:$0x75316420] }
  0xed   : > { %836 = vst [vmem:[#allocation1 + $0x10] ss:$2 sm:$0xff] %v825_v31  ;;  %755 = vrot.lane.b32.xlu2 %v750_v38, %s4984_s27  ;;  %563 = vrot.lane.b32.xlu0 %v562_v23, %s6458_s10  ;;  %s6503_s10 = smov 112   ;;  %v821_v23 = vsel %vm6509_vm8, %v819_v25, %v5263_v35  ;;  %v1220_v31 = vrot.slane %v5293_v1, 4  ;;  %v1217_v32 = vld [vmem:[#allocation2 + $0x8] sm:$0xf] }
  0xee   : > { %v5332_v42 = vpop.permute.xlu0 %339  ;;  %573 = vrot.lane.b32.xlu1 %v570_v33, %s6490_s12  ;;  %v824_v33 = vmul.f32 %v821_v23, %v5271_v39  ;;  %vm6532_vm8 = vcmask 932864  }
  0xef   : > { %v5353_v62 = vpop.permute.xlu1 %2574  ;;  %v1226_v38 = vmul.f32 %v1220_v31, %v1217_v32 }
  0xf0   : > { %v5366_v9 = vpop.permute.xlu2 %3283 }
  0xf3   : > { %v651_v50 = vld.sshfl [vmem:[#allocation1] sm:$0xff pattern:$0x75316420] }
  0xf4   : > { %656 = vst [vmem:[#allocation1] ss:$2 sm:$0xff] %v646_v49  ;;  %v839_v51 = vld.sshfl [vmem:[#allocation1 + $0x10] sm:$0xff pattern:$0x75316420] }
  0xf5   : > { %918 = vst [vmem:[#allocation1 + $0x10] ss:$2 sm:$0xff] %v907_v46  ;;  %844 = vrot.lane.b32.xlu0 %v839_v51, %s4981_s13  ;;  %575 = vrot.lane.b32.xlu2 %v571_v37, %s6490_s12  ;;  %v908_v46 = vld [vmem:[#allocation6] sm:$0xf]  ;;  %v1299_v49 = vld [vmem:[#allocation2 + $0x8] sm:$0xf] }
  0xf6   : > { %v5347_v53 = vpop.permute.xlu0 %2334  ;;  %s6499_s12 = smov 76  }
  0xf7   : > { %v5371_v12 = vpop.permute.xlu1 %2654 }
  0xf8   : > { %v5377_v20 = vpop.permute.xlu2 %3596 }
  0xfb   : > { %v659_v59 = vld.sshfl [vmem:[#allocation1] sm:$0xff pattern:$0x75316420]  ;;  %v660_v60 = vld.sshfl [vmem:[#allocation1 + $0x8] sm:$0xff pattern:$0x75316420] }
  0xfc   : > { %739 = vst [vmem:[#allocation1] ss:$2 sm:$0xff] %v737_v54  ;;  %v921_v63 = vld.sshfl [vmem:[#allocation1 + $0x10] sm:$0xff pattern:$0x75316420]  ;;  %664 = vrot.lane.b32.xlu1 %v660_v60, %s4986_s28  ;;  %v1308_v54 = vmul.f32 %v1302_v43, %v1299_v49 }
  0xfd   : > { %1000 = vst [vmem:[#allocation1 + $0x10] ss:$2 sm:$0xff] %v989_v55  ;;  %652 = vrot.lane.b32.xlu2 %v651_v50, %s6503_s10  ;;  %662 = vrot.lane.b32.xlu0 %v659_v59, %s4986_s28  ;;  %s6466_s28 = smov 108   ;;  %v903_v59 = vsel %vm6478_vm9, %v901_v40, %v5286_v57  ;;  %v1545_v49 = vld [vmem:[#allocation2 + $0x8] sm:$0xf]  ;;  %vm757_vm9 = vcmask 375808  }
  0xfe   : > { %v5358_v0 = vpop.permute.xlu0 %2414 }
  0xff   : > { %v5385_v27 = vpop.permute.xlu1 %2963 }
 0x100   : > { %v5395_v41 = vpop.permute.xlu2 %4069 }
 0x103   : > { %v740_v8 = vld.sshfl [vmem:[#allocation1] sm:$0xff pattern:$0x75316420] }
 0x104   : > { %745 = vst [vmem:[#allocation1] ss:$2 sm:$0xff] %v735_v6  ;;  %v1003_v14 = vld.sshfl [vmem:[#allocation1 + $0x10] sm:$0xff pattern:$0x75316420]  ;;  %v906_v6 = vmul.f32 %v903_v59, %v5271_v39 }
 0x105   : > { %926 = vrot.lane.b32.xlu2 %v921_v63, %s4980_s15  ;;  %1082 = vst [vmem:[#allocation1 + $0x10] ss:$2 sm:$0xff] %v1071_v10  ;;  %1008 = vrot.lane.b32.xlu1 %v1003_v14, %s4985_s16  ;;  %v1384_v63 = vrot.slane %v5277_v45, 4 }
 0x106   : > { %v5373_v13 = vpop.permute.xlu0 %2734 }
 0x107   : > { %v5400_v50 = vpop.permute.xlu1 %3043  ;;  %v1390_v14 = vmul.f32 %v1384_v63, %v1381_v2  ;;  %v6480_v2 = vrot.slane %v5288_v58, 4 }
 0x10b   : > { %v748_v15 = vld.sshfl [vmem:[#allocation1] sm:$0xff pattern:$0x75316420]  ;;  %v749_v17 = vld.sshfl [vmem:[#allocation1 + $0x8] sm:$0xff pattern:$0x75316420] }
 0x10c   : > { %828 = vst [vmem:[#allocation1] ss:$2 sm:$0xff] %v826_v34  ;;  %v1085_v24 = vld.sshfl [vmem:[#allocation1 + $0x10] sm:$0xff pattern:$0x75316420]  ;;  %v6482_v34 = vrot.slane %v5304_v11, 4 }
 0x10d   : > { %751 = vrot.lane.b32.xlu2 %v748_v15, %s4984_s27  ;;  %1155 = vst [vmem:[#allocation1 + $0x10] ss:$2 sm:$0xff] %v1144_v18  ;;  %1090 = vrot.lane.b32.xlu0 %v1085_v24, %s4982_s11  ;;  %v1463_v15 = vld [vmem:[#allocation2 + $0x8] sm:$0xf] }
 0x10e   : > { %v5379_v22 = vpop.permute.xlu0 %3123  ;;  %741 = vrot.lane.b32.xlu1 %v740_v8, %s6466_s28  ;;  %v1472_v32 = vmul.f32 %v6482_v34, %v1463_v15  ;;  %s6556_s28 = smov 13   ;;  %v2192_v34 = vld [vmem:[#allocation2 + $0x8] sm:$0xf] }
 0x10f   : > { %v5415_v10 = vpop.permute.xlu1 %3676 }
 0x113   : > { %v829_v37 = vld.sshfl [vmem:[#allocation1] sm:$0xff pattern:$0x75316420] }
 0x114   : > { %834 = vst [vmem:[#allocation1] ss:$2 sm:$0xff] %v824_v33  ;;  %v1158_v25 = vld.sshfl [vmem:[#allocation1 + $0x10] sm:$0xff pattern:$0x75316420] }
 0x115   : > { %1237 = vst [vmem:[#allocation1 + $0x10] ss:$2 sm:$0xff] %v1226_v38  ;;  %753 = vrot.lane.b32.xlu0 %v749_v17, %s4984_s27  ;;  %1163 = vrot.lane.b32.xlu2 %v1158_v25, %s6485_s6  ;;  %s6462_s27 = smov 104   ;;  %v990_v17 = vld [vmem:[#allocation6] sm:$0xf]  ;;  %v985_v38 = vsel %vm6511_vm10, %v983_v52, %v5290_v61  ;;  %vm2032_vm10 = vcmask 1022976  }
 0x116   : > { %v5393_v35 = vpop.permute.xlu0 %3436 }
 0x117   : > { %v5426_v33 = vpop.permute.xlu1 %3756 }
 0x11b   : > { %v837_v51 = vld.sshfl [vmem:[#allocation1] sm:$0xff pattern:$0x75316420]  ;;  %v838_v48 = vld.sshfl [vmem:[#allocation1 + $0x8] sm:$0xff pattern:$0x75316420] }
 0x11c   : > { %910 = vst [vmem:[#allocation1] ss:$2 sm:$0xff] %v908_v46  ;;  %840 = vrot.lane.b32.xlu1 %v837_v51, %s4981_s13  ;;  %v1240_v60 = vld.sshfl [vmem:[#allocation1 + $0x10] sm:$0xff pattern:$0x75316420]  ;;  %v6481_v46 = vrot.slane %v5311_v19, 4  ;;  %v988_v51 = vmul.f32 %v985_v38, %v5271_v39 }
 0x11d   : > { %1319 = vst [vmem:[#allocation1 + $0x10] ss:$2 sm:$0xff] %v1308_v54  ;;  %830 = vrot.lane.b32.xlu0 %v829_v37, %s6462_s27  ;;  %842 = vrot.lane.b32.xlu2 %v838_v48, %s4981_s13  ;;  %s6460_s13 = smov 100   ;;  %s6465_s27 = smov 88  }
 0x11e   : > { %v5405_v55 = vpop.permute.xlu0 %3516  ;;  %v352_v5 = vpop.permute.xlu2 %351  ;;  %v1554_v54 = vmul.f32 %v6481_v46, %v1545_v49 }
 0x123   : > { %v911_v8 = vld.sshfl [vmem:[#allocation1] sm:$0xff pattern:$0x75316420] }
 0x124   : > { %916 = vst [vmem:[#allocation1] ss:$2 sm:$0xff] %v906_v6  ;;  %v1322_v40 = vld.sshfl [vmem:[#allocation1 + $0x10] sm:$0xff pattern:$0x75316420] }
 0x125   : > { %1401 = vst [vmem:[#allocation1 + $0x10] ss:$2 sm:$0xff] %v1390_v14  ;;  %1245 = vrot.lane.b32.xlu0 %v1240_v60, %s4977_s29  ;;  %1327 = vrot.lane.b32.xlu2 %v1322_v40, %s4973_s8  ;;  %v1072_v14 = vld [vmem:[#allocation6] sm:$0xf] }
 0x126   : > { %v5419_v57 = vpop.permute.xlu0 %3836  ;;  %v416_v24 = vpop.permute.xlu2 %415 }
 0x12b   : > { %v919_v18 = vld.sshfl [vmem:[#allocation1] sm:$0xff pattern:$0x75316420]  ;;  %v920_v23 = vld.sshfl [vmem:[#allocation1 + $0x8] sm:$0xff pattern:$0x75316420] }
 0x12c   : > { %992 = vst [vmem:[#allocation1] ss:$2 sm:$0xff] %v990_v17  ;;  %v1404_v25 = vld.sshfl [vmem:[#allocation1 + $0x10] sm:$0xff pattern:$0x75316420] }
 0x12d   : > { %1483 = vst [vmem:[#allocation1 + $0x10] ss:$2 sm:$0xff] %v1472_v32  ;;  %1409 = vrot.lane.b32.xlu1 %v1404_v25, %s4979_s9  ;;  %922 = vrot.lane.b32.xlu0 %v919_v18, %s4980_s15 }
 0x12e   : > { %v5428_v37 = vpop.permute.xlu0 %3989  ;;  %912 = vrot.lane.b32.xlu2 %v911_v8, %s6460_s13  ;;  %v1627_v8 = vld [vmem:[#allocation2 + $0x8] sm:$0xf]  ;;  %s6501_s13 = smov 16  }
 0x12f   : > { %v5441_v61 = vpop.permute.xlu2 %504  ;;  %v1636_v17 = vmul.f32 %v6480_v2, %v1627_v8 }
 0x133   : > { %v993_v48 = vld.sshfl [vmem:[#allocation1] sm:$0xff pattern:$0x75316420] }
 0x134   : > { %998 = vst [vmem:[#allocation1] ss:$2 sm:$0xff] %v988_v51  ;;  %v1486_v59 = vld.sshfl [vmem:[#allocation1 + $0x10] sm:$0xff pattern:$0x75316420] }
 0x135   : > { %1565 = vst [vmem:[#allocation1 + $0x10] ss:$2 sm:$0xff] %v1554_v54  ;;  %924 = vrot.lane.b32.xlu1 %v920_v23, %s4980_s15  ;;  %1491 = vrot.lane.b32.xlu0 %v1486_v59, %s4978_s24  ;;  %v1067_v23 = vsel %vm6515_vm12, %v1065_v4, %v5267_v36  ;;  %s6486_s15 = smov 96   ;;  %v1709_v4 = vld [vmem:[#allocation2 + $0x8] sm:$0xf]  ;;  %vm1493_vm12 = vcmask 154624  }
 0x136   : > { %v5443_v52 = vpop.permute.xlu0 %4149  ;;  %v1070_v54 = vmul.f32 %v1067_v23, %v5271_v39 }
 0x137   : > { %v350_v60 = vpop.permute.xlu1 %349  ;;  %v501_v38 = vpop.permute.xlu2 %500  ;;  %v6484_v2 = vrot.slane %v5443_v52, 4 }
 0x138   : > { %v356_v6 = vsel %vm6517_vm11, %v350_v60, %v352_v5 }
 0x139   : > { %4431 = vmatpush.msk.msra.mxu0 %vm296_vm0, %v356_v6 }
 0x13a   : > { %4432 = vmatmul.msk.f32.vlgmr.msra.gmra.mxu0 %vm358_vm1, %v5332_v42 }
 0x13b   : > { %v1001_v40 = vld.sshfl [vmem:[#allocation1] sm:$0xff pattern:$0x75316420]  ;;  %v1002_v15 = vld.sshfl [vmem:[#allocation1 + $0x8] sm:$0xff pattern:$0x75316420] }
 0x13c   : > { %1074 = vst [vmem:[#allocation1] ss:$2 sm:$0xff] %v1072_v14  ;;  %v1568_v32 = vld.sshfl [vmem:[#allocation1 + $0x10] sm:$0xff pattern:$0x75316420]  ;;  %v6479_v14 = vrot.slane %v5313_v21, 4 }
 0x13d   : > { %1647 = vst [vmem:[#allocation1 + $0x10] ss:$2 sm:$0xff] %v1636_v17  ;;  %1573 = vrot.lane.b32.xlu2 %v1568_v32, %s4974_s7  ;;  %1006 = vrot.lane.b32.xlu0 %v1002_v15, %s4985_s16  ;;  %v1145_v15 = vld [vmem:[#allocation6] sm:$0xf] }
 0x13e   : > { %v354_v18 = vpop.permute.xlu0 %353  ;;  %994 = vrot.lane.b32.xlu1 %v993_v48, %s6486_s15  ;;  %v1782_v48 = vld [vmem:[#allocation2 + $0x8] sm:$0xf]  ;;  %s6488_s15 = smov 80  }
 0x13f   : > { %v414_v25 = vpop.permute.xlu1 %413  ;;  %v357_v49 = vsel %vm6517_vm11, %v352_v5, %v354_v18  ;;  %v1791_v23 = vmul.f32 %v6479_v14, %v1782_v48  ;;  %v1946_v48 = vld [vmem:[#allocation2 + $0x8] sm:$0xf]  ;;  %v6495_v14 = vrot.slane %v5428_v37, 4  ;;  %vm6536_vm11 = vcmask 244736  }
 0x140   : > { %v420_v51 = vsel %vm419_vm13, %v414_v25, %v416_v24  ;;  %4433 = vmatpush.msk.msra.mxu1 %vm296_vm0, %v357_v49  ;;  %v6475_v25 = vrot.slane %v5325_v29, 4  ;;  %v1864_v49 = vld [vmem:[#allocation2 + $0x8] sm:$0xf] }
 0x141   : > { %4435 = vmatpush.msk.msra.mxu2 %vm296_vm0, %v420_v51  ;;  %4434 = vmatmul.msk.f32.vlgmr.msra.gmra.mxu1 %vm358_vm1, %v5332_v42 }
 0x142   : > { %4436 = vmatmul.msk.f32.vlgmr.msra.gmra.mxu2 %vm358_vm1, %v5191_v30 }
 0x143   : > { %v1075_v36 = vld.sshfl [vmem:[#allocation1] sm:$0xff pattern:$0x75316420] }
 0x144   : > { %1080 = vst [vmem:[#allocation1] ss:$2 sm:$0xff] %v1070_v54  ;;  %v1650_v59 = vld.sshfl [vmem:[#allocation1 + $0x10] sm:$0xff pattern:$0x75316420]  ;;  %v1873_v54 = vmul.f32 %v6475_v25, %v1864_v49 }
 0x145   : > { %1004 = vrot.lane.b32.xlu2 %v1001_v40, %s4985_s16  ;;  %1655 = vrot.lane.b32.xlu0 %v1650_v59, %s6500_s30  ;;  %1720 = vst [vmem:[#allocation1 + $0x10] ss:$2 sm:$0xff] %v1709_v4  ;;  %s6461_s16 = smov 92   ;;  %v6472_v59 = vrot.slane %v5296_v3, 4 }
 0x146   : > { %v418_v5 = vpop.permute.xlu0 %417 }
 0x147   : > { %v5464_v60 = vpop.permute.xlu1 %490  ;;  %v5466_v6 = vpop.permute.xlu2 %755  ;;  %v421_v8 = vsel %vm419_vm13, %v416_v24, %v418_v5 }
 0x148   : > { %4437 = vmatpush.msk.msra.mxu3 %vm296_vm0, %v421_v8 }
 0x149   : > { %4438 = vmatmul.msk.f32.vlgmr.msra.gmra.mxu3 %vm358_vm1, %v5191_v30  ;;  %v6471_v30 = vrot.slane %v5323_v28, 4 }
 0x14b   : > { %v1083_v17 = vld.sshfl [vmem:[#allocation1] sm:$0xff pattern:$0x75316420]  ;;  %v1084_v18 = vld.sshfl [vmem:[#allocation1 + $0x8] sm:$0xff pattern:$0x75316420] }
 0x14c   : > { %1147 = vst [vmem:[#allocation1] ss:$2 sm:$0xff] %v1145_v15  ;;  %1088 = vrot.lane.b32.xlu1 %v1084_v18, %s4982_s11  ;;  %v1723_v40 = vld.sshfl [vmem:[#allocation1 + $0x10] sm:$0xff pattern:$0x75316420] }
 0x14d   : > { %1076 = vrot.lane.b32.xlu2 %v1075_v36, %s6461_s16  ;;  %1086 = vrot.lane.b32.xlu0 %v1083_v17, %s4982_s11  ;;  %1802 = vst [vmem:[#allocation1 + $0x10] ss:$2 sm:$0xff] %v1791_v23  ;;  %s6554_s11 = smov 15   ;;  %v1227_v17 = vld [vmem:[#allocation6] sm:$0xf]  ;;  %s6555_s16 = smov 14  }
 0x14f   : > { %v5476_v24 = vpop.permute.xlu1 %577  ;;  %v5478_v32 = vpop.permute.xlu2 %575 }
 0x153   : > { %v1148_v51 = vld.sshfl [vmem:[#allocation1] sm:$0xff pattern:$0x75316420] }
 0x154   : > { %1153 = vst [vmem:[#allocation1] ss:$2 sm:$0xff] %v5271_v39  ;;  %v1805_v5 = vld.sshfl [vmem:[#allocation1 + $0x10] sm:$0xff pattern:$0x75316420] }
 0x155   : > { %1728 = vrot.lane.b32.xlu2 %v1723_v40, %s6501_s13  ;;  %1810 = vrot.lane.b32.xlu1 %v1805_v5, %s6554_s11  ;;  %1884 = vst [vmem:[#allocation1 + $0x10] ss:$2 sm:$0xff] %v1873_v54  ;;  %v1955_v40 = vmul.f32 %v6472_v59, %v1946_v48  ;;  %v1309_v5 = vld [vmem:[#allocation6] sm:$0xf]  ;;  %s5006_s13 = smov 60  }
 0x157   : > { %v503_v4 = vpop.permute.xlu1 %502  ;;  %v5488_v8 = vpop.permute.xlu2 %652 }
 0x158   : > { %v507_v36 = vsel %vm506_vm14, %v501_v38, %v503_v4  ;;  %v508_v15 = vsel %vm506_vm14, %v503_v4, %v5441_v61  ;;  %v667_v38 = vpop.permute.xlu0 %666  ;;  %v1222_v61 = vsel %vm6518_vm15, %v1220_v31, %v5293_v1  ;;  %vm2114_vm15 = vcmask 1031168  }
 0x159   : > { %4439 = vmatpush.msk.msrb.mxu0 %vm296_vm0, %v507_v36  ;;  %4441 = vmatpush.msk.msrb.mxu1 %vm296_vm0, %v508_v15  ;;  %v1225_v1 = vmul.f32 %v1222_v61, %v5271_v39  ;;  %v2028_v36 = vld [vmem:[#allocation2 + $0x8] sm:$0xf] }
 0x15a   : > { %4442 = vmatmul.msk.f32.vlgmr.msrb.gmra.mxu1 %vm358_vm1, %v5464_v60  ;;  %4440 = vmatmul.msk.f32.vlgmr.msrb.gmra.mxu0 %vm358_vm1, %v5464_v60 }
 0x15b   : > { %v1156_v18 = vld.sshfl [vmem:[#allocation1] sm:$0xff pattern:$0x75316420]  ;;  %v1157_v23 = vld.sshfl [vmem:[#allocation1 + $0x8] sm:$0xff pattern:$0x75316420] }
 0x15c   : > { %1229 = vst [vmem:[#allocation1] ss:$2 sm:$0xff] %v1227_v17  ;;  %v1887_v49 = vld.sshfl [vmem:[#allocation1 + $0x10] sm:$0xff pattern:$0x75316420]  ;;  %v2037_v17 = vmul.f32 %v6471_v30, %v2028_v36 }
 0x15d   : > { %1892 = vrot.lane.b32.xlu0 %v1887_v49, %s6555_s16  ;;  %1966 = vst [vmem:[#allocation1 + $0x10] ss:$2 sm:$0xff] %v1955_v40  ;;  %1159 = vrot.lane.b32.xlu2 %v1156_v18, %s6485_s6  ;;  %v1304_v18 = vsel %vm6519_vm2, %v1302_v43, %v5299_v7  ;;  %v2110_v36 = vld [vmem:[#allocation2 + $0x8] sm:$0xf]  ;;  %vm1411_vm2 = vcmask 236544  }
 0x15e   : > { %1149 = vrot.lane.b32.xlu1 %v1148_v51, %s6465_s27  ;;  %s6474_s27 = smov 84  }
 0x15f   : > { %v5508_v54 = vpop.permute.xlu2 %926 }
 0x160   : > { %v5516_v42 = vpop.permute.xlu0 %563  ;;  %v5518_v4 = vpop.permute.xlu1 %573 }
 0x163   : > { %v1230_v31 = vld.sshfl [vmem:[#allocation1] sm:$0xff pattern:$0x75316420] }
 0x164   : > { %1235 = vst [vmem:[#allocation1] ss:$2 sm:$0xff] %v1225_v1  ;;  %v1969_v49 = vld.sshfl [vmem:[#allocation1 + $0x10] sm:$0xff pattern:$0x75316420]  ;;  %v1307_v1 = vmul.f32 %v1304_v18, %v5271_v39  ;;  %v6477_v18 = vrot.slane %v5415_v10, 4 }
 0x165   : > { %1161 = vrot.lane.b32.xlu0 %v1157_v23, %s6485_s6  ;;  %v6469_v23 = vrot.slane %v5377_v20, 4  ;;  %1974 = vrot.lane.b32.xlu2 %v1969_v49, %s6556_s28  ;;  %2048 = vst [vmem:[#allocation1 + $0x10] ss:$2 sm:$0xff] %v2037_v17  ;;  %v1391_v17 = vld [vmem:[#allocation6] sm:$0xf]  ;;  %s6559_s6 = smov 1  }
 0x167   : > { %v5523_v51 = vpop.permute.xlu2 %751  ;;  %v5541_v61 = vsel %vm928_vm4, %v6469_v23, %v5377_v20 }
 0x168   : > { %v845_v60 = vpop.permute.xlu0 %844 }
 0x16b   : > { %v1238_v15 = vld.sshfl [vmem:[#allocation1] sm:$0xff pattern:$0x75316420]  ;;  %v1239_v48 = vld.sshfl [vmem:[#allocation1 + $0x8] sm:$0xff pattern:$0x75316420] }
 0x16c   : > { %1311 = vst [vmem:[#allocation1] ss:$2 sm:$0xff] %v1309_v5  ;;  %1241 = vrot.lane.b32.xlu1 %v1238_v15, %s4977_s29  ;;  %v6473_v15 = vrot.slane %v5405_v55, 4 }
 0x16d   : > { %1231 = vrot.lane.b32.xlu0 %v1230_v31, %s6474_s27  ;;  %v6470_v31 = vrot.slane %v5341_v47, 4  ;;  %1243 = vrot.lane.b32.xlu2 %v1239_v48, %s4977_s29  ;;  %s6557_s27 = smov 3   ;;  %v3758_v48 = vrot.slane %v5426_v33, 4  ;;  %s6558_s29 = smov 2  }
 0x16e   : > { %v665_v40 = vpop.permute.xlu1 %664 }
 0x16f   : > { %v5545_v7 = vpop.permute.xlu2 %1163  ;;  %v670_v5 = vsel %vm668_vm3, %v665_v40, %v667_v38  ;;  %v2119_v49 = vmul.f32 %v6470_v31, %v2110_v36  ;;  %v6483_v38 = vrot.slane %v5419_v57, 4  ;;  %v2051_v36 = vld.sshfl [vmem:[#allocation1 + $0x10] sm:$0xff pattern:$0x75316420] }
 0x170   : > { %4449 = vmatpush.msk.msra.mxu1 %vm296_vm0, %v670_v5  ;;  %v5569_v5 = vsel %vm846_vm6, %v6477_v18, %v5415_v10  ;;  %v663_v23 = vpop.permute.xlu0 %662  ;;  %v6496_v18 = vrot.slane %v5306_v16, 4 }
 0x171   : > { %4450 = vmatmul.msk.f32.vlgmr.msra.gmra.mxu1 %vm358_vm1, %v5488_v8  ;;  %v669_v46 = vsel %vm668_vm3, %v663_v23, %v665_v40  ;;  %2130 = vst [vmem:[#allocation1 + $0x10] ss:$2 sm:$0xff] %v2119_v49  ;;  %v5604_v23 = vsel %vm506_vm14, %v6495_v14, %v5428_v37  ;;  %vm6531_vm14 = vcmask 252928  }
 0x172   : > { %4447 = vmatpush.msk.msra.mxu0 %vm296_vm0, %v669_v46  ;;  %v5611_v46 = vsel %vm419_vm13, %v6484_v2, %v5443_v52  ;;  %vm6526_vm13 = vcmask 891904  }
 0x173   : > { %v5547_v43 = vld.sshfl [vmem:[#allocation1] sm:$0xff pattern:$0x75316420]  ;;  %4448 = vmatmul.msk.f32.vlgmr.msra.gmra.mxu0 %vm358_vm1, %v5488_v8 }
 0x174   : > { %1317 = vst [vmem:[#allocation1] ss:$2 sm:$0xff] %v1307_v1  ;;  %v5563_v1 = vsel %vm1010_vm5, %v6473_v15, %v5405_v55  ;;  %v5580_v15 = vsel %vm668_vm3, %v6483_v38, %v5419_v57  ;;  %v1386_v38 = vsel %vm6521_vm7, %v1384_v63, %v5277_v45  ;;  %vm579_vm3 = vcmask 392192  }
 0x175   : > { %2056 = vrot.lane.b32.xlu0 %v2051_v36, %s6557_s27  ;;  %v5592_v36 = vsel %vm757_vm9, %v3758_v48, %v5426_v33  ;;  %v2201_v45 = vmul.f32 %v6496_v18, %v2192_v34  ;;  %v580_v63 = vsel %vm579_vm3, %v5518_v4, %v5478_v32  ;;  %v1389_v40 = vmul.f32 %v1386_v38, %v5271_v39  ;;  %v1473_v38 = vld [vmem:[#allocation6] sm:$0xf]  ;;  %v3835_v33 = vld [vmem:[#allocation2 + $0xc] sm:$0xf] }
 0x176   : > { %4443 = vmatpush.msk.msrb.mxu2 %vm296_vm0, %v580_v63  ;;  %vm2196_vm7 = vcmask 1039360  }
 0x177   : > { %v5572_v31 = vpop.permute.xlu1 %1008  ;;  %v843_v25 = vpop.permute.xlu2 %842  ;;  %4444 = vmatmul.msk.f32.vlgmr.msrb.gmra.mxu2 %vm358_vm1, %v5516_v42 }
 0x178   : > { %v2133_v34 = vld.sshfl [vmem:[#allocation1 + $0x10] sm:$0xff pattern:$0x75316420] }
 0x179   : > { %2212 = vst [vmem:[#allocation1 + $0x10] ss:$2 sm:$0xff] %v2201_v45  ;;  %2138 = vrot.lane.b32.xlu2 %v2133_v34, %s6558_s29  ;;  %v6492_v34 = vrot.slane %v5358_v0, 4 }
 0x17b   : > { %v1320_v30 = vld.sshfl [vmem:[#allocation1] sm:$0xff pattern:$0x75316420]  ;;  %v5574_v59 = vld.sshfl [vmem:[#allocation1 + $0x8] sm:$0xff pattern:$0x75316420] }
 0x17c   : > { %1393 = vst [vmem:[#allocation1] ss:$2 sm:$0xff] %v1391_v17  ;;  %v848_v17 = vsel %vm846_vm6, %v843_v25, %v845_v60  ;;  %v581_v60 = vsel %vm579_vm3, %v5478_v32, %v5476_v24  ;;  %v6493_v24 = vrot.slane %v5347_v53, 4  ;;  %v2333_v32 = vld [vmem:[#allocation2 + $0xc] sm:$0xf]  ;;  %vm1165_vm3 = vcmask 261120  }
 0x17d   : > { %4457 = vmatpush.msk.msrb.mxu1 %vm296_vm0, %v848_v17  ;;  %4445 = vmatpush.msk.msrb.mxu3 %vm296_vm0, %v581_v60 }
 0x17e   : > { %1323 = vrot.lane.b32.xlu0 %v1320_v30, %s4973_s8  ;;  %4446 = vmatmul.msk.f32.vlgmr.msrb.gmra.mxu3 %vm358_vm1, %v5516_v42  ;;  %v2341_v30 = vmul.f32 %v6493_v24, %v2333_v32  ;;  %v6560_v32 = vrot.slane %v5304_v11, 4 }
 0x17f   : > { %v5622_v49 = vpop.permute.xlu0 %1090  ;;  %v5635_v4 = vpop.permute.xlu2 %1327 }
 0x180   : > { %v742_v8 = vpop.permute.xlu1 %741  ;;  %v2215_v45 = vld.sshfl [vmem:[#allocation1 + $0x10] sm:$0xff pattern:$0x75316420] }
 0x181   : > { %2220 = vrot.lane.b32.xlu1 %v2215_v45, %s6559_s6  ;;  %2352 = vst [vmem:[#allocation1 + $0x10] ss:$2 sm:$0xff] %v2341_v30  ;;  %1313 = vrot.lane.b32.xlu2 %v5547_v43, %s6488_s15  ;;  %s6561_s15 = smov 127  }
 0x183   : > { %v5626_v17 = vld.sshfl [vmem:[#allocation1] sm:$0xff pattern:$0x75316420] }
 0x184   : > { %1399 = vst [vmem:[#allocation1] ss:$2 sm:$0xff] %v1389_v40 }
 0x187   : > { %v754_v63 = vpop.permute.xlu0 %753 }
 0x188   : > { %v758_v60 = vsel %vm757_vm9, %v5523_v51, %v754_v63  ;;  %v759_v40 = vsel %vm757_vm9, %v754_v63, %v5466_v6  ;;  %v2413_v51 = vld [vmem:[#allocation2 + $0xc] sm:$0xf]  ;;  %vm6527_vm9 = vcmask 908288  }
 0x189   : > { %4451 = vmatpush.msk.msra.mxu2 %vm296_vm0, %v758_v60  ;;  %4453 = vmatpush.msk.msra.mxu3 %vm296_vm0, %v759_v40  ;;  %v5656_v60 = vpop.permute.xlu2 %912  ;;  %v2421_v43 = vmul.f32 %v6492_v34, %v2413_v51 }
 0x18a   : > { %4452 = vmatmul.msk.f32.vlgmr.msra.gmra.mxu2 %vm358_vm1, %v742_v8  ;;  %4454 = vmatmul.msk.f32.vlgmr.msra.gmra.mxu3 %vm358_vm1, %v742_v8  ;;  %v2355_v8 = vld.sshfl [vmem:[#allocation1 + $0x10] sm:$0xff pattern:$0x75316420] }
 0x18b   : > { %v1402_v42 = vld.sshfl [vmem:[#allocation1] sm:$0xff pattern:$0x75316420]  ;;  %v1403_v2 = vld.sshfl [vmem:[#allocation1 + $0x8] sm:$0xff pattern:$0x75316420]  ;;  %1325 = vrot.lane.b32.xlu1 %v5574_v59, %s4973_s8  ;;  %2360 = vrot.lane.b32.xlu0 %v2355_v8, %s6561_s15 }
 0x18c   : > { %1475 = vst [vmem:[#allocation1] ss:$2 sm:$0xff] %v1473_v38  ;;  %v1468_v38 = vsel %vm6526_vm13, %v6560_v32, %v5304_v11  ;;  %v6491_v11 = vrot.slane %v5321_v26, 4  ;;  %1405 = vrot.lane.b32.xlu2 %v1402_v42, %s4979_s9  ;;  %v6494_v59 = vrot.slane %v5353_v62, 4  ;;  %s6562_s8 = smov 126   ;;  %vm1657_vm13 = vcmask 138240  }
 0x18d   : > { %v1471_v30 = vmul.f32 %v1468_v38, %v5271_v39  ;;  %2432 = vst [vmem:[#allocation1 + $0x10] ss:$2 sm:$0xff] %v2421_v43  ;;  %v2573_v42 = vld [vmem:[#allocation2 + $0xc] sm:$0xf]  ;;  %v6563_v43 = vrot.slane %v5311_v19, 4 }
 0x18e   : > { %v841_v6 = vpop.permute.xlu1 %840 }
 0x18f   : > { %v847_v63 = vsel %vm846_vm6, %v841_v6, %v843_v25  ;;  %v831_v40 = vpop.permute.xlu0 %830  ;;  %v2493_v25 = vld [vmem:[#allocation2 + $0xc] sm:$0xf]  ;;  %v1555_v6 = vld [vmem:[#allocation6] sm:$0xf]  ;;  %vm6524_vm6 = vcmask 900096  }
 0x190   : > { %4455 = vmatpush.msk.msrb.mxu0 %vm296_vm0, %v847_v63  ;;  %4458 = vmatmul.msk.f32.vlgmr.msrb.gmra.mxu1 %vm358_vm1, %v831_v40  ;;  %v2501_v51 = vmul.f32 %v6491_v11, %v2493_v25  ;;  %v1550_v8 = vsel %vm6524_vm6, %v6563_v43, %v5311_v19  ;;  %v2581_v25 = vmul.f32 %v6494_v59, %v2573_v42  ;;  %v2653_v19 = vld [vmem:[#allocation2 + $0xc] sm:$0xf]  ;;  %v1637_v42 = vld [vmem:[#allocation6] sm:$0xf]  ;;  %vm1575_vm6 = vcmask 146432  }
 0x191   : > { %4456 = vmatmul.msk.f32.vlgmr.msrb.gmra.mxu0 %vm358_vm1, %v831_v40 }
 0x193   : > { %v5662_v45 = vld.sshfl [vmem:[#allocation1] sm:$0xff pattern:$0x75316420]  ;;  %1395 = vrot.lane.b32.xlu1 %v5626_v17, %s6499_s12  ;;  %v6535_v17 = vrot.slane %v5371_v12, 4  ;;  %s6567_s12 = smov 115  }
 0x194   : > { %1481 = vst [vmem:[#allocation1] ss:$2 sm:$0xff] %v1471_v30  ;;  %v2435_v40 = vld.sshfl [vmem:[#allocation1 + $0x10] sm:$0xff pattern:$0x75316420] }
 0x195   : > { %2440 = vrot.lane.b32.xlu0 %v2435_v40, %s6562_s8  ;;  %2512 = vst [vmem:[#allocation1 + $0x10] ss:$2 sm:$0xff] %v2501_v51 }
 0x197   : > { %v5673_v32 = vpop.permute.xlu2 %1573  ;;  %v5675_v38 = vpop.permute.xlu0 %1245 }
 0x19b   : > { %v1485_v63 = vld.sshfl [vmem:[#allocation1 + $0x8] sm:$0xff pattern:$0x75316420]  ;;  %v1484_v30 = vld.sshfl [vmem:[#allocation1] sm:$0xff pattern:$0x75316420] }
 0x19c   : > { %1557 = vst [vmem:[#allocation1] ss:$2 sm:$0xff] %v1555_v6  ;;  %1489 = vrot.lane.b32.xlu2 %v1485_v63, %s4978_s24  ;;  %v1553_v6 = vmul.f32 %v1550_v8, %v5271_v39  ;;  %v2515_v34 = vld.sshfl [vmem:[#allocation1 + $0x10] sm:$0xff pattern:$0x75316420]  ;;  %1487 = vrot.lane.b32.xlu1 %v1484_v30, %s4978_s24  ;;  %v2661_v63 = vmul.f32 %v6535_v17, %v2653_v19  ;;  %v6508_v30 = vrot.slane %v5373_v13, 4 }
 0x19d   : > { %1407 = vrot.lane.b32.xlu0 %v1403_v2, %s4979_s9  ;;  %2592 = vst [vmem:[#allocation1 + $0x10] ss:$2 sm:$0xff] %v2581_v25  ;;  %s6564_s24 = smov 125   ;;  %s6497_s9 = smov 68  }
 0x19f   : > { %v5689_v11 = vpop.permute.xlu1 %1409  ;;  %v923_v51 = vpop.permute.xlu0 %922 }
 0x1a0   : > { %v1005_v24 = vpop.permute.xlu2 %1004 }
 0x1a3   : > { %v1558_v40 = vld.sshfl [vmem:[#allocation1] sm:$0xff pattern:$0x75316420] }
 0x1a4   : > { %1563 = vst [vmem:[#allocation1] ss:$2 sm:$0xff] %v1553_v6  ;;  %v2595_v2 = vld.sshfl [vmem:[#allocation1 + $0x10] sm:$0xff pattern:$0x75316420]  ;;  %1559 = vrot.lane.b32.xlu1 %v1558_v40, %s6497_s9  ;;  %s6498_s9 = smov 72  }
 0x1a5   : > { %2672 = vst [vmem:[#allocation1 + $0x10] ss:$2 sm:$0xff] %v2661_v63  ;;  %2520 = vrot.lane.b32.xlu0 %v2515_v34, %s6564_s24 }
 0x1a7   : > { %v925_v43 = vpop.permute.xlu1 %924  ;;  %v5699_v14 = vpop.permute.xlu0 %1491 }
 0x1a8   : > { %v929_v8 = vsel %vm928_vm4, %v923_v51, %v925_v43  ;;  %v930_v59 = vsel %vm928_vm4, %v925_v43, %v5508_v54  ;;  %v2733_v54 = vld [vmem:[#allocation2 + $0xc] sm:$0xf]  ;;  %v1077_v25 = vpop.permute.xlu2 %1076  ;;  %vm6528_vm4 = vcmask 269312  }
 0x1a9   : > { %4459 = vmatpush.msk.msrb.mxu2 %vm296_vm0, %v929_v8  ;;  %4461 = vmatpush.msk.msrb.mxu3 %vm296_vm0, %v930_v59  ;;  %v6565_v59 = vrot.slane %v5288_v58, 4  ;;  %v2741_v19 = vmul.f32 %v6508_v30, %v2733_v54 }
 0x1aa   : > { %4462 = vmatmul.msk.f32.vlgmr.msrb.gmra.mxu3 %vm358_vm1, %v5656_v60  ;;  %4460 = vmatmul.msk.f32.vlgmr.msrb.gmra.mxu2 %vm358_vm1, %v5656_v60 }
 0x1ab   : > { %v1567_v6 = vld.sshfl [vmem:[#allocation1 + $0x8] sm:$0xff pattern:$0x75316420]  ;;  %v5701_v18 = vld.sshfl [vmem:[#allocation1] sm:$0xff pattern:$0x75316420]  ;;  %v1632_v51 = vsel %vm6527_vm9, %v6565_v59, %v5288_v58 }
 0x1ac   : > { %1639 = vst [vmem:[#allocation1] ss:$2 sm:$0xff] %v1637_v42  ;;  %v1635_v34 = vmul.f32 %v1632_v51, %v5271_v39  ;;  %v2675_v42 = vld.sshfl [vmem:[#allocation1 + $0x10] sm:$0xff pattern:$0x75316420]  ;;  %1571 = vrot.lane.b32.xlu1 %v1567_v6, %s4974_s7  ;;  %v6506_v6 = vrot.slane %v5337_v44, 4 }
 0x1ad   : > { %1477 = vrot.lane.b32.xlu0 %v5662_v45, %s6498_s9  ;;  %2752 = vst [vmem:[#allocation1 + $0x10] ss:$2 sm:$0xff] %v2741_v19  ;;  %s6566_s9 = smov 113   ;;  %v2886_v19 = vld [vmem:[#allocation2 + $0xc] sm:$0xf]  ;;  %vm2222_vm9 = vcmask 7168  }
 0x1af   : > { %v1007_v63 = vpop.permute.xlu0 %1006 }
 0x1b0   : > { %v1011_v43 = vsel %vm1010_vm5, %v1005_v24, %v1007_v63  ;;  %v1012_v8 = vsel %vm1010_vm5, %v1007_v63, %v5572_v31  ;;  %v995_v60 = vpop.permute.xlu1 %994  ;;  %v5731_v58 = vpop.permute.xlu2 %1728  ;;  %v1710_v31 = vld [vmem:[#allocation6] sm:$0xf]  ;;  %v2813_v24 = vld [vmem:[#allocation2 + $0xc] sm:$0xf]  ;;  %vm6530_vm5 = vcmask 924672  }
 0x1b1   : > { %4463 = vmatpush.msk.msra.mxu0 %vm296_vm0, %v1011_v43  ;;  %4465 = vmatpush.msk.msra.mxu1 %vm296_vm0, %v1012_v8  ;;  %v2894_v43 = vmul.f32 %v6506_v6, %v2886_v19  ;;  %v1708_v8 = vld [vmem:[#allocation2] sm:$0xff] }
 0x1b2   : > { %4466 = vmatmul.msk.f32.vlgmr.msra.gmra.mxu1 %vm358_vm1, %v995_v60  ;;  %4464 = vmatmul.msk.f32.vlgmr.msra.gmra.mxu0 %vm358_vm1, %v995_v60 }
 0x1b3   : > { %v5719_v40 = vld.sshfl [vmem:[#allocation1] sm:$0xff pattern:$0x75316420] }
 0x1b4   : > { %1645 = vst [vmem:[#allocation1] ss:$2 sm:$0xff] %v1635_v34  ;;  %v2755_v45 = vld.sshfl [vmem:[#allocation1 + $0x10] sm:$0xff pattern:$0x75316420] }
 0x1b5   : > { %2760 = vrot.lane.b32.xlu2 %v2755_v45, %s6566_s9  ;;  %2600 = vrot.lane.b32.xlu0 %v2595_v2, %s6567_s12  ;;  %2824 = vst [vmem:[#allocation1 + $0x10] ss:$2 sm:$0xff] %v2813_v24 }
 0x1b7   : > { %v5733_v54 = vpop.permute.xlu0 %1655 }
 0x1b8   : > { %v1160_v60 = vpop.permute.xlu2 %1159 }
 0x1bb   : > { %v1648_v59 = vld.sshfl [vmem:[#allocation1] sm:$0xff pattern:$0x75316420]  ;;  %v1649_v51 = vld.sshfl [vmem:[#allocation1 + $0x8] sm:$0xff pattern:$0x75316420] }
 0x1bc   : > { %1712 = vst [vmem:[#allocation1] ss:$2 sm:$0xff] %v1710_v31  ;;  %1651 = vrot.lane.b32.xlu1 %v1648_v59, %s6500_s30  ;;  %v2827_v2 = vld.sshfl [vmem:[#allocation1 + $0x10] sm:$0xff pattern:$0x75316420]  ;;  %v6505_v59 = vrot.slane %v5385_v27, 4 }
 0x1bd   : > { %2832 = vrot.lane.b32.xlu2 %v2827_v2, %s6503_s10  ;;  %2900 = vst [vmem:[#allocation1 + $0x10] ss:$2 sm:$0xff] %v2894_v43  ;;  %s6568_s30 = smov 114   ;;  %s6570_s10 = smov 16  }
 0x1be   : > { %v1089_v34 = vpop.permute.xlu1 %1088  ;;  %2680 = vrot.lane.b32.xlu0 %v2675_v42, %s6568_s30  ;;  %v6507_v42 = vrot.slane %v5400_v50, 4 }
 0x1bf   : > { %v1094_v63 = vsel %vm6528_vm4, %v1089_v34, %v5622_v49  ;;  %v1087_v31 = vpop.permute.xlu0 %1086  ;;  %v2962_v49 = vld [vmem:[#allocation2 + $0xc] sm:$0xf] }
 0x1c0   : > { %4469 = vmatpush.msk.msra.mxu3 %vm296_vm0, %v1094_v63  ;;  %v1093_v24 = vsel %vm6528_vm4, %v1087_v31, %v1089_v34  ;;  %v2970_v19 = vmul.f32 %v6505_v59, %v2962_v49  ;;  %v1792_v63 = vld [vmem:[#allocation6] sm:$0xf]  ;;  %v5757_v2 = vpop.permute.xlu2 %1974  ;;  %vm1730_vm4 = vcmask 130048  }
 0x1c1   : > { %4470 = vmatmul.msk.f32.vlgmr.msra.gmra.mxu3 %vm358_vm1, %v1077_v25  ;;  %4467 = vmatpush.msk.msra.mxu2 %vm296_vm0, %v1093_v24 }
 0x1c2   : > { %4468 = vmatmul.msk.f32.vlgmr.msra.gmra.mxu2 %vm358_vm1, %v1077_v25  ;;  %v3042_v25 = vld [vmem:[#allocation2 + $0xc] sm:$0xf] }
 0x1c3   : > { %v1713_v45 = vld.sshfl [vmem:[#allocation1] sm:$0xff pattern:$0x75316420]  ;;  %v3050_v49 = vmul.f32 %v6507_v42, %v3042_v25  ;;  %v3122_v25 = vld [vmem:[#allocation2 + $0xc] sm:$0xf] }
 0x1c4   : > { %1718 = vst [vmem:[#allocation1] ss:$2 sm:$0xff] %v1708_v8  ;;  %1714 = vrot.lane.b32.xlu1 %v1713_v45, %s5006_s13  ;;  %v2903_v43 = vld.sshfl [vmem:[#allocation1 + $0x10] sm:$0xff pattern:$0x75316420]  ;;  %s6569_s13 = smov 111  }
 0x1c5   : > { %2981 = vst [vmem:[#allocation1 + $0x10] ss:$2 sm:$0xff] %v2970_v19  ;;  %2908 = vrot.lane.b32.xlu2 %v2903_v43, %s6569_s13  ;;  %v6571_v45 = vrot.slane %v5313_v21, 4 }
 0x1c6   : > { %1569 = vrot.lane.b32.xlu0 %v5701_v18, %s4974_s7  ;;  %v6534_v18 = vrot.slane %v5379_v22, 4  ;;  %s6572_s7 = smov 17  }
 0x1c7   : > { %v5753_v8 = vpop.permute.xlu1 %1810  ;;  %v1787_v24 = vsel %vm6530_vm5, %v6571_v45, %v5313_v21  ;;  %vm2140_vm5 = vcmask 15360  }
 0x1c8   : > { %v1244_v6 = vpop.permute.xlu2 %1243  ;;  %v3130_v45 = vmul.f32 %v6534_v18, %v3122_v25 }
 0x1c9   : > { %v1249_v21 = vsel %vm6531_vm14, %v1244_v6, %v5675_v38  ;;  %v6516_v38 = vrot.slane %v5351_v56, 4 }
 0x1ca   : > { %4477 = vmatpush.msk.msrb.mxu3 %vm296_vm0, %v1249_v21  ;;  %v3202_v21 = vld [vmem:[#allocation2 + $0xc] sm:$0xf] }
 0x1cb   : > { %v1722_v34 = vld.sshfl [vmem:[#allocation1 + $0x8] sm:$0xff pattern:$0x75316420]  ;;  %v5755_v31 = vld.sshfl [vmem:[#allocation1] sm:$0xff pattern:$0x75316420] }
 0x1cc   : > { %1794 = vst [vmem:[#allocation1] ss:$2 sm:$0xff] %v1792_v63  ;;  %1726 = vrot.lane.b32.xlu1 %v1722_v34, %s6570_s10  ;;  %v1790_v63 = vmul.f32 %v1787_v24, %v5271_v39  ;;  %v2984_v59 = vld.sshfl [vmem:[#allocation1 + $0x10] sm:$0xff pattern:$0x75316420] }
 0x1cd   : > { %3061 = vst [vmem:[#allocation1 + $0x10] ss:$2 sm:$0xff] %v3050_v49  ;;  %1653 = vrot.lane.b32.xlu2 %v1649_v51, %s6572_s7  ;;  %v1874_v24 = vld [vmem:[#allocation6] sm:$0xf]  ;;  %s6573_s7 = smov 109  }
 0x1ce   : > { %1641 = vrot.lane.b32.xlu0 %v5719_v40, %s6510_s0  ;;  %s6574_s0 = smov 110  }
 0x1cf   : > { %v5771_v19 = vpop.permute.xlu0 %1892 }
 0x1d0   : > { %v1150_v34 = vpop.permute.xlu1 %1149 }
 0x1d3   : > { %v1795_v43 = vld.sshfl [vmem:[#allocation1] sm:$0xff pattern:$0x75316420] }
 0x1d4   : > { %1800 = vst [vmem:[#allocation1] ss:$2 sm:$0xff] %v1790_v63  ;;  %v3064_v40 = vld.sshfl [vmem:[#allocation1 + $0x10] sm:$0xff pattern:$0x75316420] }
 0x1d5   : > { %3141 = vst [vmem:[#allocation1 + $0x10] ss:$2 sm:$0xff] %v3130_v45  ;;  %2989 = vrot.lane.b32.xlu2 %v2984_v59, %s6574_s0  ;;  %v3210_v45 = vmul.f32 %v6516_v38, %v3202_v21 }
 0x1d6   : > { %3069 = vrot.lane.b32.xlu0 %v3064_v40, %s6573_s7  ;;  %v1956_v40 = vld [vmem:[#allocation6] sm:$0xf] }
 0x1d7   : > { %v1162_v63 = vpop.permute.xlu0 %1161 }
 0x1d8   : > { %v1166_v49 = vsel %vm1165_vm3, %v1160_v60, %v1162_v63  ;;  %v1167_v51 = vsel %vm1165_vm3, %v1162_v63, %v5545_v7  ;;  %v6575_v7 = vrot.slane %v5325_v29, 4  ;;  %vm1950_vm3 = vcmask 941056  }
 0x1d9   : > { %4471 = vmatpush.msk.msrb.mxu0 %vm296_vm0, %v1166_v49  ;;  %4473 = vmatpush.msk.msrb.mxu1 %vm296_vm0, %v1167_v51 }
 0x1da   : > { %4472 = vmatmul.msk.f32.vlgmr.msrb.gmra.mxu0 %vm358_vm1, %v1150_v34  ;;  %4474 = vmatmul.msk.f32.vlgmr.msrb.gmra.mxu1 %vm358_vm1, %v1150_v34  ;;  %v5806_v34 = vpop.permute.xlu2 %2138 }
 0x1db   : > { %v1804_v42 = vld.sshfl [vmem:[#allocation1 + $0x8] sm:$0xff pattern:$0x75316420]  ;;  %v1803_v30 = vld.sshfl [vmem:[#allocation1] sm:$0xff pattern:$0x75316420] }
 0x1dc   : > { %1806 = vrot.lane.b32.xlu1 %v1803_v30, %s6554_s11  ;;  %1876 = vst [vmem:[#allocation1] ss:$2 sm:$0xff] %v1874_v24  ;;  %v1869_v30 = vsel %vm6532_vm8, %v6575_v7, %v5325_v29  ;;  %v3144_v49 = vld.sshfl [vmem:[#allocation1 + $0x10] sm:$0xff pattern:$0x75316420]  ;;  %v6514_v29 = vrot.slane %v5366_v9, 4 }
 0x1dd   : > { %v1872_v59 = vmul.f32 %v1869_v30, %v5271_v39  ;;  %3221 = vst [vmem:[#allocation1 + $0x10] ss:$2 sm:$0xff] %v3210_v45  ;;  %1724 = vrot.lane.b32.xlu2 %v5755_v31, %s6570_s10  ;;  %v6577_v31 = vrot.slane %v5296_v3, 4  ;;  %vm1894_vm8 = vcmask 113664  }
 0x1de   : > { %v1242_v60 = vpop.permute.xlu1 %1241  ;;  %3149 = vrot.lane.b32.xlu0 %v3144_v49, %s6576_s1 }
 0x1df   : > { %v1248_v25 = vsel %vm6531_vm14, %v1242_v60, %v1244_v6  ;;  %v1232_v24 = vpop.permute.xlu0 %1231  ;;  %v3282_v6 = vld [vmem:[#allocation2 + $0xc] sm:$0xf]  ;;  %v1951_v60 = vsel %vm1950_vm3, %v6577_v31, %v5296_v3  ;;  %vm2058_vm14 = vcmask 23552  }
 0x1e0   : > { %4475 = vmatpush.msk.msrb.mxu2 %vm296_vm0, %v1248_v25  ;;  %4478 = vmatmul.msk.f32.vlgmr.msrb.gmra.mxu3 %vm358_vm1, %v1232_v24  ;;  %v3290_v51 = vmul.f32 %v6514_v29, %v3282_v6  ;;  %v1954_v25 = vmul.f32 %v1951_v60, %v5271_v39 }
 0x1e1   : > { %4476 = vmatmul.msk.f32.vlgmr.msrb.gmra.mxu2 %vm358_vm1, %v1232_v24 }
 0x1e2   : > { %v1314_v45 = vpop.permute.xlu2 %1313 }
 0x1e3   : > { %v1877_v63 = vld.sshfl [vmem:[#allocation1] sm:$0xff pattern:$0x75316420] }
 0x1e4   : > { %1882 = vst [vmem:[#allocation1] ss:$2 sm:$0xff] %v1872_v59  ;;  %v3224_v30 = vld.sshfl [vmem:[#allocation1 + $0x10] sm:$0xff pattern:$0x75316420] }
 0x1e5   : > { %1808 = vrot.lane.b32.xlu2 %v1804_v42, %s6554_s11  ;;  %3301 = vst [vmem:[#allocation1 + $0x10] ss:$2 sm:$0xff] %v3290_v51  ;;  %v3362_v59 = vld [vmem:[#allocation2 + $0xc] sm:$0xf]  ;;  %s5009_s11 = smov 52  }
 0x1e6   : > { %1796 = vrot.lane.b32.xlu0 %v1795_v43, %s5008_s2  ;;  %v6513_v43 = vrot.slane %v5393_v35, 4  ;;  %s6579_s2 = smov 98   ;;  %v3435_v42 = vld [vmem:[#allocation2 + $0xc] sm:$0xf]  ;;  %v2038_v51 = vld [vmem:[#allocation6] sm:$0xf] }
 0x1e7   : > { %v5817_v24 = vpop.permute.xlu0 %2056 }
 0x1e8   : > { %v3443_v3 = vmul.f32 %v6513_v43, %v3435_v42  ;;  %v6583_v42 = vrot.slane %v5405_v55, 4 }
 0x1ea   : > { %v1406_v31 = vpop.permute.xlu2 %1405 }
 0x1eb   : > { %v1886_v21 = vld.sshfl [vmem:[#allocation1 + $0x8] sm:$0xff pattern:$0x75316420]  ;;  %v1885_v7 = vld.sshfl [vmem:[#allocation1] sm:$0xff pattern:$0x75316420] }
 0x1ec   : > { %1890 = vrot.lane.b32.xlu1 %v1886_v21, %s6555_s16  ;;  %1958 = vst [vmem:[#allocation1] ss:$2 sm:$0xff] %v1956_v40  ;;  %v3304_v6 = vld.sshfl [vmem:[#allocation1 + $0x10] sm:$0xff pattern:$0x75316420] }
 0x1ed   : > { %1878 = vrot.lane.b32.xlu2 %v1877_v63, %s5009_s11  ;;  %3373 = vst [vmem:[#allocation1 + $0x10] ss:$2 sm:$0xff] %v3362_v59  ;;  %v6582_v63 = vrot.slane %v5323_v28, 4  ;;  %s6584_s11 = smov 95  }
 0x1ee   : > { %3229 = vrot.lane.b32.xlu0 %v3224_v30, %s6579_s2 }
 0x1ef   : > { %v2033_v59 = vsel %vm2032_vm10, %v6582_v63, %v5323_v28 }
 0x1f0   : > { %v1324_v30 = vpop.permute.xlu0 %1323  ;;  %v2036_v29 = vmul.f32 %v2033_v59, %v5271_v39 }
 0x1f3   : > { %v1959_v49 = vld.sshfl [vmem:[#allocation1] sm:$0xff pattern:$0x75316420] }
 0x1f4   : > { %1960 = vrot.lane.b32.xlu1 %v1959_v49, %s6578_s17  ;;  %1964 = vst [vmem:[#allocation1] ss:$2 sm:$0xff] %v1954_v25  ;;  %v3376_v60 = vld.sshfl [vmem:[#allocation1 + $0x10] sm:$0xff pattern:$0x75316420]  ;;  %s6580_s17 = smov 97   ;;  %v5830_v49 = vpop.permute.xlu1 %2220 }
 0x1f5   : > { %3381 = vrot.lane.b32.xlu2 %v3376_v60, %s6581_s20  ;;  %3454 = vst [vmem:[#allocation1 + $0x10] ss:$2 sm:$0xff] %v3443_v3  ;;  %v3515_v25 = vld [vmem:[#allocation2 + $0xc] sm:$0xf] }
 0x1f6   : > { %3309 = vrot.lane.b32.xlu0 %v3304_v6, %s6580_s17  ;;  %v3523_v43 = vmul.f32 %v6583_v42, %v3515_v25  ;;  %v1490_v38 = vpop.permute.xlu2 %1489  ;;  %v3595_v3 = vld [vmem:[#allocation2 + $0xc] sm:$0xf] }
 0x1f7   : > { %v1495_v55 = vsel %vm1493_vm12, %v1490_v38, %v5699_v14 }
 0x1fb   : > { %v1968_v40 = vld.sshfl [vmem:[#allocation1 + $0x8] sm:$0xff pattern:$0x75316420]  ;;  %v1967_v21 = vld.sshfl [vmem:[#allocation1] sm:$0xff pattern:$0x75316420] }
 0x1fc   : > { %2040 = vst [vmem:[#allocation1] ss:$2 sm:$0xff] %v2038_v51  ;;  %v3457_v6 = vld.sshfl [vmem:[#allocation1 + $0x10] sm:$0xff pattern:$0x75316420] }
 0x1fd   : > { %3462 = vrot.lane.b32.xlu2 %v3457_v6, %s6584_s11  ;;  %3534 = vst [vmem:[#allocation1 + $0x10] ss:$2 sm:$0xff] %v3523_v43  ;;  %v1326_v28 = vpop.permute.xlu1 %1325  ;;  %v5837_v60 = vpop.permute.xlu0 %2360 }
 0x1fe   : > { %1888 = vrot.lane.b32.xlu0 %v1885_v7, %s6555_s16  ;;  %v1330_v25 = vsel %vm6536_vm11, %v1324_v30, %v1326_v28  ;;  %v1331_v63 = vsel %vm6536_vm11, %v1326_v28, %v5635_v4  ;;  %v2120_v7 = vld [vmem:[#allocation6] sm:$0xf]  ;;  %s6586_s16 = smov 94   ;;  %v6587_v4 = vrot.slane %v5341_v47, 4  ;;  %vm1976_vm11 = vcmask 105472  }
 0x1ff   : > { %4479 = vmatpush.msk.msra.mxu0 %vm296_vm0, %v1330_v25  ;;  %4481 = vmatpush.msk.msra.mxu1 %vm296_vm0, %v1331_v63 }
 0x200   : > { %4480 = vmatmul.msk.f32.vlgmr.msra.gmra.mxu0 %vm358_vm1, %v1314_v45  ;;  %4482 = vmatmul.msk.f32.vlgmr.msra.gmra.mxu1 %vm358_vm1, %v1314_v45  ;;  %v2115_v30 = vsel %vm2114_vm15, %v6587_v4, %v5341_v47  ;;  %v6588_v45 = vrot.slane %v5415_v10, 4 }
 0x201   : > { %4489 = vmatpush.msk.msrb.mxu1 %vm296_vm0, %v1495_v55  ;;  %v2118_v55 = vmul.f32 %v2115_v30, %v5271_v39 }
 0x203   : > { %v2041_v51 = vld.sshfl [vmem:[#allocation1] sm:$0xff pattern:$0x75316420] }
 0x204   : > { %2046 = vst [vmem:[#allocation1] ss:$2 sm:$0xff] %v2036_v29  ;;  %v6585_v29 = vrot.slane %v5377_v20, 4  ;;  %v3537_v14 = vld.sshfl [vmem:[#allocation1 + $0x10] sm:$0xff pattern:$0x75316420] }
 0x205   : > { %3542 = vrot.lane.b32.xlu1 %v3537_v14, %s6586_s16  ;;  %v3675_v20 = vld [vmem:[#allocation2 + $0xc] sm:$0xf]  ;;  %1970 = vrot.lane.b32.xlu2 %v1967_v21, %s6556_s28  ;;  %v2202_v14 = vld [vmem:[#allocation6] sm:$0xf] }
 0x206   : > { %v3603_v59 = vmul.f32 %v6585_v29, %v3595_v3  ;;  %1972 = vrot.lane.b32.xlu0 %v1968_v40, %s6556_s28  ;;  %v1396_v3 = vpop.permute.xlu1 %1395  ;;  %v3683_v28 = vmul.f32 %v6588_v45, %v3675_v20  ;;  %s5010_s28 = smov 44   ;;  %v3755_v40 = vld [vmem:[#allocation2 + $0xc] sm:$0xf] }
 0x207   : > { %v5858_v6 = vpop.permute.xlu0 %2440 }
 0x208   : > { %3614 = vst [vmem:[#allocation1 + $0x10] ss:$2 sm:$0xff] %v3603_v59 }
 0x20b   : > { %v2050_v43 = vld.sshfl [vmem:[#allocation1 + $0x8] sm:$0xff pattern:$0x75316420]  ;;  %v2049_v42 = vld.sshfl [vmem:[#allocation1] sm:$0xff pattern:$0x75316420] }
 0x20c   : > { %2122 = vst [vmem:[#allocation1] ss:$2 sm:$0xff] %v2120_v7  ;;  %v3763_v7 = vmul.f32 %v3758_v48, %v3755_v40  ;;  %v6591_v48 = vrot.slane %v5306_v16, 4  ;;  %v3915_v40 = vld [vmem:[#allocation2 + $0xc] sm:$0xf] }
 0x20d   : > { %2054 = vrot.lane.b32.xlu2 %v2050_v43, %s6557_s27 }
 0x20e   : > { %2042 = vrot.lane.b32.xlu0 %v2041_v51, %s5010_s28  ;;  %v1488_v59 = vpop.permute.xlu1 %1487  ;;  %s6590_s28 = smov 83  }
 0x20f   : > { %v3617_v63 = vld.sshfl [vmem:[#allocation1 + $0x10] sm:$0xff pattern:$0x75316420]  ;;  %v5865_v47 = vpop.permute.xlu2 %2760  ;;  %v1408_v21 = vpop.permute.xlu0 %1407  ;;  %v1494_v51 = vsel %vm1493_vm12, %v1488_v59, %v1490_v38  ;;  %v2197_v38 = vsel %vm2196_vm7, %v6591_v48, %v5306_v16 }
 0x210   : > { %3622 = vrot.lane.b32.xlu1 %v3617_v63, %s6589_s19  ;;  %3694 = vst [vmem:[#allocation1 + $0x10] ss:$2 sm:$0xff] %v3683_v28  ;;  %v1412_v10 = vsel %vm1411_vm2, %v1406_v31, %v1408_v21  ;;  %v1413_v29 = vsel %vm1411_vm2, %v1408_v21, %v5689_v11  ;;  %4487 = vmatpush.msk.msrb.mxu0 %vm296_vm0, %v1494_v51  ;;  %v2274_v63 = vld [vmem:[#allocation6] sm:$0xf]  ;;  %v3988_v59 = vld [vmem:[#allocation2 + $0xc] sm:$0xf] }
 0x211   : > { %4483 = vmatpush.msk.msra.mxu2 %vm296_vm0, %v1412_v10  ;;  %4485 = vmatpush.msk.msra.mxu3 %vm296_vm0, %v1413_v29  ;;  %v2200_v28 = vmul.f32 %v2197_v38, %v5271_v39 }
 0x212   : > { %4484 = vmatmul.msk.f32.vlgmr.msra.gmra.mxu2 %vm358_vm1, %v1396_v3  ;;  %4486 = vmatmul.msk.f32.vlgmr.msra.gmra.mxu3 %vm358_vm1, %v1396_v3  ;;  %v6592_v3 = vrot.slane %v5419_v57, 4 }
 0x213   : > { %v2123_v25 = vld.sshfl [vmem:[#allocation1] sm:$0xff pattern:$0x75316420] }
 0x214   : > { %2128 = vst [vmem:[#allocation1] ss:$2 sm:$0xff] %v2118_v55  ;;  %v3843_v45 = vmul.f32 %v6592_v3, %v3835_v33 }
 0x215   : > { %2124 = vrot.lane.b32.xlu2 %v2123_v25, %s5011_s14  ;;  %s6593_s14 = smov 82  }
 0x216   : > { %v5888_v30 = vpop.permute.xlu1 %1559 }
 0x217   : > { %v3697_v11 = vld.sshfl [vmem:[#allocation1 + $0x10] sm:$0xff pattern:$0x75316420]  ;;  %v5884_v20 = vpop.permute.xlu2 %2832  ;;  %v5886_v4 = vpop.permute.xlu0 %2520 }
 0x218   : > { %3702 = vrot.lane.b32.xlu0 %v3697_v11, %s6590_s28  ;;  %3774 = vst [vmem:[#allocation1 + $0x10] ss:$2 sm:$0xff] %v3763_v7  ;;  %2052 = vrot.lane.b32.xlu1 %v2049_v42, %s6557_s27  ;;  %s6594_s27 = smov 81  }
 0x21b   : > { %v2132_v31 = vld.sshfl [vmem:[#allocation1 + $0x8] sm:$0xff pattern:$0x75316420]  ;;  %v2131_v43 = vld.sshfl [vmem:[#allocation1] sm:$0xff pattern:$0x75316420] }
 0x21c   : > { %2204 = vst [vmem:[#allocation1] ss:$2 sm:$0xff] %v2202_v14 }
 0x21e   : > { %v1572_v57 = vpop.permute.xlu1 %1571 }
 0x21f   : > { %v3777_v55 = vld.sshfl [vmem:[#allocation1 + $0x10] sm:$0xff pattern:$0x75316420]  ;;  %v5895_v16 = vpop.permute.xlu2 %2908  ;;  %v1478_v25 = vpop.permute.xlu0 %1477  ;;  %v1577_v39 = vsel %vm1575_vm6, %v1572_v57, %v5673_v32 }
 0x220   : > { %3782 = vrot.lane.b32.xlu0 %v3777_v55, %s6593_s14  ;;  %3854 = vst [vmem:[#allocation1 + $0x10] ss:$2 sm:$0xff] %v3843_v45  ;;  %2136 = vrot.lane.b32.xlu1 %v2132_v31, %s6558_s29  ;;  %v6595_v31 = vrot.slane %v5428_v37, 4  ;;  %v6533_v37 = vrot.slane %v5395_v41, 4  ;;  %v2342_v55 = vld [vmem:[#allocation6] sm:$0xf] }
 0x221   : > { %4488 = vmatmul.msk.f32.vlgmr.msrb.gmra.mxu0 %vm358_vm1, %v1478_v25  ;;  %4490 = vmatmul.msk.f32.vlgmr.msrb.gmra.mxu1 %vm358_vm1, %v1478_v25 }
 0x222   : > { %4493 = vmatpush.msk.msrb.mxu3 %vm296_vm0, %v1577_v39  ;;  %v3996_v11 = vmul.f32 %v6595_v31, %v3988_v59  ;;  %v6599_v31 = vrot.slane %v5443_v52, 4 }
 0x223   : > { %v2205_v42 = vld.sshfl [vmem:[#allocation1] sm:$0xff pattern:$0x75316420]  ;;  %4494 = vmatmul.msk.f32.vlgmr.msrb.gmra.mxu3 %vm358_vm1, %v5888_v30 }
 0x224   : > { %2210 = vst [vmem:[#allocation1] ss:$2 sm:$0xff] %v2200_v28 }
 0x227   : > { %v3857_v29 = vld.sshfl [vmem:[#allocation1 + $0x10] sm:$0xff pattern:$0x75316420]  ;;  %v1654_v32 = vpop.permute.xlu2 %1653  ;;  %v5906_v7 = vpop.permute.xlu0 %2600 }
 0x228   : > { %3862 = vrot.lane.b32.xlu2 %v3857_v29, %s6594_s27  ;;  %2134 = vrot.lane.b32.xlu0 %v2131_v43, %s6558_s29  ;;  %3926 = vst [vmem:[#allocation1 + $0x10] ss:$2 sm:$0xff] %v3915_v40  ;;  %v1659_v51 = vsel %vm1657_vm13, %v1654_v32, %v5733_v54  ;;  %v5914_v43 = vld [vmem:[#allocation2 + $0x4] sm:$0xff]  ;;  %v4068_v54 = vld [vmem:[#allocation2 + $0xc] sm:$0xf]  ;;  %s6597_s29 = smov 79  }
 0x229   : > { %2206 = vrot.lane.b32.xlu1 %v2205_v42, %s5012_s21  ;;  %4497 = vmatpush.msk.msra.mxu1 %vm296_vm0, %v1659_v51  ;;  %s6596_s21 = smov 80   ;;  %v4076_v42 = vmul.f32 %v6533_v37, %v4068_v54  ;;  %v4148_v40 = vld [vmem:[#allocation2 + $0xc] sm:$0xf] }
 0x22b   : > { %v2214_v21 = vld.sshfl [vmem:[#allocation1 + $0x8] sm:$0xff pattern:$0x75316420]  ;;  %v2213_v10 = vld.sshfl [vmem:[#allocation1] sm:$0xff pattern:$0x75316420] }
 0x22c   : > { %2276 = vst [vmem:[#allocation1] ss:$2 sm:$0xff] %v2274_v63 }
 0x22e   : > { %v1652_v14 = vpop.permute.xlu1 %1651 }
 0x22f   : > { %v1658_v33 = vsel %vm1657_vm13, %v1652_v14, %v1654_v32  ;;  %v3929_v38 = vld.sshfl [vmem:[#allocation1 + $0x10] sm:$0xff pattern:$0x75316420]  ;;  %v5923_v45 = vpop.permute.xlu2 %2989 }
 0x230   : > { %4495 = vmatpush.msk.msra.mxu0 %vm296_vm0, %v1658_v33  ;;  %3934 = vrot.lane.b32.xlu2 %v3929_v38, %s6596_s21  ;;  %4007 = vst [vmem:[#allocation1 + $0x10] ss:$2 sm:$0xff] %v3996_v11  ;;  %v5921_v3 = vpop.permute.xlu0 %2680  ;;  %v4156_v11 = vmul.f32 %v6599_v31, %v4148_v40  ;;  %v5942_v38 = vld [vmem:[#allocation2 + $0x4] sm:$0xff]  ;;  %v445_v40 = vpop.f32.mrf.mxu2 }
 0x231   : > { %2218 = vrot.lane.b32.xlu0 %v2214_v21, %s6559_s6  ;;  %v6598_v21 = vrot.slane %v5347_v53, 4 }
 0x233   : > { %v2277_v48 = vld.sshfl [vmem:[#allocation1] sm:$0xff pattern:$0x75316420]  ;;  %v2337_v29 = vsel %vm2222_vm9, %v6598_v21, %v5347_v53  ;;  %v465_v21 = vpop.f32.mrf.mxu3 }
 0x234   : > { %2281 = vst [vmem:[#allocation1] ss:$2 sm:$0xff] %v5914_v43  ;;  %v2340_v54 = vmul.f32 %v5942_v38, %v2337_v29 }
 0x236   : > { %v1715_v28 = vpop.permute.xlu1 %1714 }
 0x237   : > { %v4010_v63 = vld.sshfl [vmem:[#allocation1 + $0x10] sm:$0xff pattern:$0x75316420]  ;;  %v1725_v32 = vpop.permute.xlu2 %1724 }
 0x238   : > { %2216 = vrot.lane.b32.xlu2 %v2213_v10, %s6559_s6  ;;  %4015 = vrot.lane.b32.xlu1 %v4010_v63, %s6597_s29  ;;  %4087 = vst [vmem:[#allocation1 + $0x10] ss:$2 sm:$0xff] %v4076_v42  ;;  %v1570_v59 = vpop.permute.xlu0 %1569  ;;  %s5013_s6 = smov 28   ;;  %v382_v42 = vpop.f32.mrf.mxu0  ;;  %v2422_v63 = vld [vmem:[#allocation6] sm:$0xf] }
 0x239   : > { %v1576_v51 = vsel %vm1575_vm6, %v1570_v59, %v1572_v57 }
 0x23a   : > { %4491 = vmatpush.msk.msrb.mxu2 %vm296_vm0, %v1576_v51  ;;  %v6601_v51 = vrot.slane %v5358_v0, 4 }
 0x23b   : > { %v5927_v25 = vld.sshfl [vmem:[#allocation1] sm:$0xff pattern:$0x75316420]  ;;  %v5929_v39 = vld.sshfl [vmem:[#allocation1 + $0x8] sm:$0xff pattern:$0x75316420]  ;;  %4492 = vmatmul.msk.f32.vlgmr.msrb.gmra.mxu2 %vm358_vm1, %v5888_v30 }
 0x23c   : > { %2344 = vst [vmem:[#allocation1] ss:$2 sm:$0xff] %v2342_v55  ;;  %v402_v55 = vpop.f32.mrf.mxu1 }
 0x23d   : > { %v466_v59 = vadd.f32 %v465_v21, %v402_v55 }
 0x23e   : > { %v1727_v14 = vpop.permute.xlu1 %1726 }
 0x23f   : > { %v1731_v10 = vsel %vm1730_vm4, %v1725_v32, %v1727_v14  ;;  %v1732_v33 = vsel %vm1730_vm4, %v1727_v14, %v5731_v58  ;;  %v5950_v52 = vld.sshfl [vmem:[#allocation1 + $0x10] sm:$0xff pattern:$0x75316420]  ;;  %vm1812_vm4 = vcmask 121856   ;;  %v1809_v57 = vpop.permute.xlu2 %1808  ;;  %v2417_v14 = vsel %vm2140_vm5, %v6601_v51, %v5358_v0 }
 0x240   : > { %4501 = vmatpush.msk.msra.mxu3 %vm296_vm0, %v1732_v33  ;;  %4499 = vmatpush.msk.msra.mxu2 %vm296_vm0, %v1731_v10  ;;  %4167 = vst [vmem:[#allocation1 + $0x10] ss:$2 sm:$0xff] %v4156_v11  ;;  %v1642_v58 = vpop.permute.xlu0 %1641  ;;  %v1814_v30 = vsel %vm1812_vm4, %v1809_v57, %v5753_v8  ;;  %v446_v8 = vadd.f32 %v445_v40, %v382_v42  ;;  %v532_v10 = vpop.f32.mrf.mxu0 }
 0x241   : > { %4502 = vmatmul.msk.f32.vlgmr.msra.gmra.mxu3 %vm358_vm1, %v1715_v28  ;;  %2278 = vrot.lane.b32.xlu2 %v2277_v48, %s6600_s25  ;;  %v2420_v42 = vmul.f32 %v5942_v38, %v2417_v14  ;;  %s5014_s25 = smov 24  }
 0x242   : > { %4498 = vmatmul.msk.f32.vlgmr.msra.gmra.mxu1 %vm358_vm1, %v1642_v58  ;;  %4496 = vmatmul.msk.f32.vlgmr.msra.gmra.mxu0 %vm358_vm1, %v1642_v58  ;;  %v605_v58 = vpop.f32.mrf.mxu2 }
 0x243   : > { %v2345_v53 = vld.sshfl [vmem:[#allocation1] sm:$0xff pattern:$0x75316420]  ;;  %4505 = vmatpush.msk.msrb.mxu1 %vm296_vm0, %v1814_v30  ;;  %4500 = vmatmul.msk.f32.vlgmr.msra.gmra.mxu2 %vm358_vm1, %v1715_v28  ;;  %v625_v30 = vpop.f32.mrf.mxu3 }
 0x244   : > { %2346 = vrot.lane.b32.xlu0 %v2345_v53, %s5013_s6  ;;  %2350 = vst [vmem:[#allocation1] ss:$2 sm:$0xff] %v2340_v54  ;;  %v552_v33 = vpop.f32.mrf.mxu1  ;;  %v555_v54 = vadd.f32 %v532_v10, %v446_v8 }
 0x245   : > { %v556_v53 = vadd.f32 %v552_v33, %v466_v59 }
 0x247   : > { %v5967_v11 = vpop.permute.xlu2 %1878  ;;  %v629_v40 = vadd.f32 %v625_v30, %v556_v53  ;;  %v6602_v53 = vrot.slane %v5321_v26, 4 }
 0x248   : > { %v5965_v31 = vpop.permute.xlu0 %3069 }
 0x24b   : > { %v2354_v48 = vld.sshfl [vmem:[#allocation1 + $0x8] sm:$0xff pattern:$0x75316420]  ;;  %v2353_v29 = vld.sshfl [vmem:[#allocation1] sm:$0xff pattern:$0x75316420]  ;;  %v803_v10 = vpop.f32.mrf.mxu3 }
 0x24c   : > { %2356 = vrot.lane.b32.xlu1 %v2353_v29, %s6561_s15  ;;  %2424 = vst [vmem:[#allocation1] ss:$2 sm:$0xff] %v2422_v63  ;;  %2358 = vrot.lane.b32.xlu2 %v2354_v48, %s6561_s15  ;;  %v628_v63 = vadd.f32 %v605_v58, %v555_v54  ;;  %v694_v48 = vpop.f32.mrf.mxu0  ;;  %v714_v29 = vpop.f32.mrf.mxu1  ;;  %v2497_v58 = vsel %vm2058_vm14, %v6602_v53, %v5321_v26  ;;  %s5015_s15 = smov 20  }
 0x24d   : > { %v718_v51 = vadd.f32 %v714_v29, %v629_v40 }
 0x24e   : > { %v1807_v32 = vpop.permute.xlu1 %1806  ;;  %v717_v59 = vadd.f32 %v694_v48, %v628_v63  ;;  %v2500_v63 = vmul.f32 %v5942_v38, %v2497_v58 }
 0x24f   : > { %v1813_v28 = vsel %vm1812_vm4, %v1807_v32, %v1809_v57  ;;  %v5974_v21 = vpop.permute.xlu2 %3381  ;;  %v2502_v57 = vld [vmem:[#allocation6] sm:$0xf]  ;;  %v807_v33 = vadd.f32 %v803_v10, %v718_v51 }
 0x250   : > { %4503 = vmatpush.msk.msrb.mxu0 %vm296_vm0, %v1813_v28  ;;  %v5972_v0 = vpop.permute.xlu0 %3149  ;;  %v783_v28 = vpop.f32.mrf.mxu2  ;;  %v2582_v10 = vld [vmem:[#allocation6] sm:$0xf] }
 0x251   : > { %v806_v14 = vadd.f32 %v783_v28, %v717_v59 }
 0x253   : > { %v2425_v55 = vld.sshfl [vmem:[#allocation1] sm:$0xff pattern:$0x75316420] }
 0x254   : > { %2426 = vrot.lane.b32.xlu1 %v2425_v55, %s5014_s25  ;;  %2430 = vst [vmem:[#allocation1] ss:$2 sm:$0xff] %v2420_v42  ;;  %v872_v40 = vpop.f32.mrf.mxu0 }
 0x255   : > { %v895_v48 = vadd.f32 %v872_v40, %v806_v14  ;;  %v6603_v40 = vrot.slane %v5353_v62, 4 }
 0x257   : > { %v5982_v42 = vpop.permute.xlu2 %3462 }
 0x258   : > { %v1797_v30 = vpop.permute.xlu0 %1796 }
 0x259   : > { %4506 = vmatmul.msk.f32.vlgmr.msrb.gmra.mxu1 %vm358_vm1, %v1797_v30  ;;  %4504 = vmatmul.msk.f32.vlgmr.msrb.gmra.mxu0 %vm358_vm1, %v1797_v30 }
 0x25b   : > { %v2434_v32 = vld.sshfl [vmem:[#allocation1 + $0x8] sm:$0xff pattern:$0x75316420]  ;;  %v2433_v8 = vld.sshfl [vmem:[#allocation1] sm:$0xff pattern:$0x75316420] }
 0x25c   : > { %2438 = vrot.lane.b32.xlu2 %v2434_v32, %s6562_s8  ;;  %2436 = vrot.lane.b32.xlu1 %v2433_v8, %s6562_s8  ;;  %2504 = vst [vmem:[#allocation1] ss:$2 sm:$0xff] %v2502_v57  ;;  %v892_v57 = vpop.f32.mrf.mxu1  ;;  %v954_v32 = vpop.f32.mrf.mxu2  ;;  %s6607_s8 = smov 112  }
 0x25d   : > { %v896_v29 = vadd.f32 %v892_v57, %v807_v33  ;;  %v974_v8 = vpop.f32.mrf.mxu3  ;;  %v1036_v53 = vpop.f32.mrf.mxu0  ;;  %v2577_v57 = vsel %vm1976_vm11, %v6603_v40, %v5353_v62  ;;  %v6604_v40 = vrot.slane %v5371_v12, 4 }
 0x25e   : > { %v1891_v54 = vpop.permute.xlu1 %1890 }
 0x25f   : > { %v1896_v55 = vsel %vm1894_vm8, %v1891_v54, %v5771_v19  ;;  %v977_v19 = vadd.f32 %v954_v32, %v895_v48  ;;  %v978_v59 = vadd.f32 %v974_v8, %v896_v29  ;;  %v1971_v28 = vpop.permute.xlu2 %1970  ;;  %v2580_v32 = vmul.f32 %v5942_v38, %v2577_v57 }
 0x260   : > { %4509 = vmatpush.msk.msrb.mxu3 %vm296_vm0, %v1896_v55  ;;  %v5992_v51 = vpop.permute.xlu0 %3229  ;;  %v2657_v57 = vsel %vm1894_vm8, %v6604_v40, %v5371_v12 }
 0x261   : > { %4510 = vmatmul.msk.f32.vlgmr.msrb.gmra.mxu3 %vm358_vm1, %v5967_v11  ;;  %v1059_v37 = vadd.f32 %v1036_v53, %v977_v19 }
 0x263   : > { %v2505_v26 = vld.sshfl [vmem:[#allocation1] sm:$0xff pattern:$0x75316420] }
 0x264   : > { %2506 = vrot.lane.b32.xlu2 %v2505_v26, %s5015_s15  ;;  %2510 = vst [vmem:[#allocation1] ss:$2 sm:$0xff] %v2500_v63  ;;  %v1056_v58 = vpop.f32.mrf.mxu1  ;;  %v1118_v17 = vpop.f32.mrf.mxu2  ;;  %s6668_s15 = sshll.u32 %s5145_s26, 3 }
 0x265   : > { %v1060_v18 = vadd.f32 %v1056_v58, %v978_v59  ;;  %v1138_v14 = vpop.f32.mrf.mxu3  ;;  %v1141_v33 = vadd.f32 %v1118_v17, %v1059_v37  ;;  %v1191_v8 = vpop.f32.mrf.mxu0 }
 0x267   : > { %v1142_v63 = vadd.f32 %v1138_v14, %v1060_v18  ;;  %v2055_v48 = vpop.permute.xlu2 %2054  ;;  %v1214_v17 = vadd.f32 %v1191_v8, %v1141_v33  ;;  %v2660_v8 = vmul.f32 %v5942_v38, %v2657_v57 }
 0x268   : > { %v6000_v26 = vpop.permute.xlu0 %3309  ;;  %v2060_v29 = vsel %vm2058_vm14, %v2055_v48, %v5817_v24 }
 0x269   : > { %4517 = vmatpush.msk.msra.mxu3 %vm296_vm0, %v2060_v29 }
 0x26b   : > { %v2514_v30 = vld.sshfl [vmem:[#allocation1 + $0x8] sm:$0xff pattern:$0x75316420]  ;;  %v2513_v55 = vld.sshfl [vmem:[#allocation1] sm:$0xff pattern:$0x75316420] }
 0x26c   : > { %2518 = vrot.lane.b32.xlu2 %v2514_v30, %s6564_s24  ;;  %2516 = vrot.lane.b32.xlu1 %v2513_v55, %s6564_s24  ;;  %2584 = vst [vmem:[#allocation1] ss:$2 sm:$0xff] %v2582_v10  ;;  %v1211_v19 = vpop.f32.mrf.mxu1  ;;  %v1273_v37 = vpop.f32.mrf.mxu2  ;;  %v2662_v55 = vld [vmem:[#allocation6] sm:$0xf]  ;;  %s6609_s24 = smov 124  }
 0x26d   : > { %v1215_v18 = vadd.f32 %v1211_v19, %v1142_v63  ;;  %v1293_v62 = vpop.f32.mrf.mxu3  ;;  %v1961_v10 = vpop.permute.xlu1 %1960  ;;  %v1296_v53 = vadd.f32 %v1273_v37, %v1214_v17  ;;  %v2742_v37 = vld [vmem:[#allocation6] sm:$0xf] }
 0x26f   : > { %v1297_v58 = vadd.f32 %v1293_v62, %v1215_v18  ;;  %v2125_v63 = vpop.permute.xlu2 %2124 }
 0x270   : > { %v1889_v30 = vpop.permute.xlu0 %1888 }
 0x271   : > { %v1895_v24 = vsel %vm1894_vm8, %v1889_v30, %v1891_v54  ;;  %vm6616_vm8 = vcmask 932864  }
 0x272   : > { %4507 = vmatpush.msk.msrb.mxu2 %vm296_vm0, %v1895_v24 }
 0x273   : > { %v2585_v59 = vld.sshfl [vmem:[#allocation1] sm:$0xff pattern:$0x75316420]  ;;  %4508 = vmatmul.msk.f32.vlgmr.msrb.gmra.mxu2 %vm358_vm1, %v5967_v11 }
 0x274   : > { %2586 = vrot.lane.b32.xlu1 %v2585_v59, %s6570_s10  ;;  %2590 = vst [vmem:[#allocation1] ss:$2 sm:$0xff] %v2580_v32  ;;  %s5018_s10 = smov 4  }
 0x277   : > { %v6017_v54 = vpop.permute.xlu1 %3542 }
 0x278   : > { %v1973_v29 = vpop.permute.xlu0 %1972 }
 0x279   : > { %v1977_v32 = vsel %vm1976_vm11, %v1971_v28, %v1973_v29  ;;  %v1978_v11 = vsel %vm1976_vm11, %v1973_v29, %v5757_v2  ;;  %vm6620_vm11 = vmmov %vm6616_vm8 }
 0x27a   : > { %4511 = vmatpush.msk.msra.mxu0 %vm296_vm0, %v1977_v32  ;;  %4513 = vmatpush.msk.msra.mxu1 %vm296_vm0, %v1978_v11 }
 0x27b   : > { %v2594_v14 = vld.sshfl [vmem:[#allocation1 + $0x8] sm:$0xff pattern:$0x75316420]  ;;  %v2593_v33 = vld.sshfl [vmem:[#allocation1] sm:$0xff pattern:$0x75316420]  ;;  %4512 = vmatmul.msk.f32.vlgmr.msra.gmra.mxu0 %vm358_vm1, %v1961_v10  ;;  %4514 = vmatmul.msk.f32.vlgmr.msra.gmra.mxu1 %vm358_vm1, %v1961_v10 }
 0x27c   : > { %2598 = vrot.lane.b32.xlu2 %v2594_v14, %s6567_s12  ;;  %2596 = vrot.lane.b32.xlu1 %v2593_v33, %s6567_s12  ;;  %2664 = vst [vmem:[#allocation1] ss:$2 sm:$0xff] %v2662_v55  ;;  %s5016_s12 = smov 12   ;;  %v6605_v10 = vrot.slane %v5373_v13, 4 }
 0x27d   : > { %v1355_v2 = vpop.f32.mrf.mxu0  ;;  %v1375_v18 = vpop.f32.mrf.mxu1 }
 0x27e   : > { %v1378_v17 = vadd.f32 %v1355_v2, %v1296_v53  ;;  %v1379_v62 = vadd.f32 %v1375_v18, %v1297_v58  ;;  %v2737_v55 = vsel %vm1812_vm4, %v6605_v10, %v5373_v13  ;;  %vm6633_vm4 = vcmask 809984  }
 0x27f   : > { %v2740_v58 = vmul.f32 %v5942_v38, %v2737_v55 }
 0x280   : > { %v2043_v28 = vpop.permute.xlu0 %2042 }
 0x281   : > { %4518 = vmatmul.msk.f32.vlgmr.msra.gmra.mxu3 %vm358_vm1, %v2043_v28 }
 0x282   : > { %v6027_v12 = vpop.permute.xlu1 %3622  ;;  %v6029_v59 = vpop.permute.xlu2 %3862 }
 0x283   : > { %v2665_v19 = vld.sshfl [vmem:[#allocation1] sm:$0xff pattern:$0x75316420] }
 0x284   : > { %2666 = vrot.lane.b32.xlu2 %v2665_v19, %s5016_s12  ;;  %2670 = vst [vmem:[#allocation1] ss:$2 sm:$0xff] %v2660_v8  ;;  %s274_s12 = scalar_lea.vmem [#allocation9], %s6668_s15 }
 0x28a   : > { %v6038_v14 = vpop.permute.xlu0 %3702  ;;  %v2053_v33 = vpop.permute.xlu1 %2052 }
 0x28b   : > { %v2674_v30 = vld.sshfl [vmem:[#allocation1 + $0x8] sm:$0xff pattern:$0x75316420]  ;;  %v2673_v24 = vld.sshfl [vmem:[#allocation1] sm:$0xff pattern:$0x75316420]  ;;  %v2059_v53 = vsel %vm2058_vm14, %v2053_v33, %v2055_v48  ;;  %v6041_v40 = vpop.permute.xlu2 %3934 }
 0x28c   : > { %2678 = vrot.lane.b32.xlu2 %v2674_v30, %s6568_s30  ;;  %2676 = vrot.lane.b32.xlu1 %v2673_v24, %s6568_s30  ;;  %2744 = vst [vmem:[#allocation1] ss:$2 sm:$0xff] %v2742_v37  ;;  %s5017_s30 = smov 8   ;;  %v2814_v48 = vld [vmem:[#allocation6] sm:$0xf]  ;;  %v6606_v33 = vrot.slane %v5337_v44, 4 }
 0x28d   : > { %4515 = vmatpush.msk.msra.mxu2 %vm296_vm0, %v2059_v53  ;;  %vm6630_vm14 = vcmask 900096  }
 0x28e   : > { %4516 = vmatmul.msk.f32.vlgmr.msra.gmra.mxu2 %vm358_vm1, %v2043_v28  ;;  %v2890_v53 = vsel %vm1657_vm13, %v6606_v33, %v5337_v44  ;;  %vm2834_vm13 = vcmask 916480  }
 0x292   : > { %v6046_v29 = vpop.permute.xlu0 %3782  ;;  %v2137_v13 = vpop.permute.xlu1 %2136 }
 0x293   : > { %v2745_v57 = vld.sshfl [vmem:[#allocation1] sm:$0xff pattern:$0x75316420]  ;;  %v2217_v32 = vpop.permute.xlu2 %2216  ;;  %v2142_v11 = vsel %vm2140_vm5, %v2137_v13, %v5806_v34 }
 0x294   : > { %2746 = vrot.lane.b32.xlu0 %v2745_v57, %s5017_s30  ;;  %2750 = vst [vmem:[#allocation1] ss:$2 sm:$0xff] %v2740_v58  ;;  %4521 = vmatpush.msk.msrb.mxu1 %vm296_vm0, %v2142_v11  ;;  %s4270_s30 = sshll.u32 %s274_s12, 4  ;;  %s4271_s30 = int_to_ptr.vmem [resolvable:$true] %s4270_s30 }
 0x295   : > { %4522 = vmatmul.msk.f32.vlgmr.msrb.gmra.mxu1 %vm358_vm1, %v2125_v63  ;;  %v1437_v28 = vpop.f32.mrf.mxu2  ;;  %v1457_v2 = vpop.f32.mrf.mxu3 }
 0x296   : > { %4529 = vmatpush.msk.msra.mxu1 %vm296_vm0, %v5929_v39  ;;  %v1460_v18 = vadd.f32 %v1437_v28, %v1378_v17  ;;  %v1461_v37 = vadd.f32 %v1457_v2, %v1379_v62 }
 0x29a   : > { %v2135_v34 = vpop.permute.xlu0 %2134 }
 0x29b   : > { %v2754_v8 = vld.sshfl [vmem:[#allocation1 + $0x8] sm:$0xff pattern:$0x75316420]  ;;  %v2753_v19 = vld.sshfl [vmem:[#allocation1] sm:$0xff pattern:$0x75316420]  ;;  %v2141_v30 = vsel %vm2140_vm5, %v2135_v34, %v2137_v13  ;;  %v2279_v24 = vpop.permute.xlu2 %2278  ;;  %v2207_v58 = vpop.permute.xlu1 %2206 }
 0x29c   : > { %2758 = vrot.lane.b32.xlu1 %v2754_v8, %s6566_s9  ;;  %2756 = vrot.lane.b32.xlu0 %v2753_v19, %s6566_s9  ;;  %2816 = vst [vmem:[#allocation1] ss:$2 sm:$0xff] %v2814_v48  ;;  %v2893_v48 = vmul.f32 %v5942_v38, %v2890_v53  ;;  %v6608_v34 = vrot.slane %v5385_v27, 4  ;;  %s6613_s9 = smov 116   ;;  %vm6629_vm5 = vcmask 891904  }
 0x29d   : > { %4519 = vmatpush.msk.msrb.mxu0 %vm296_vm0, %v2141_v30  ;;  %4530 = vmatmul.msk.f32.vlgmr.msra.gmra.mxu1 %vm358_vm1, %v2279_v24 }
 0x29e   : > { %4520 = vmatmul.msk.f32.vlgmr.msrb.gmra.mxu0 %vm358_vm1, %v2125_v63  ;;  %v1519_v17 = vpop.f32.mrf.mxu0  ;;  %v1539_v62 = vpop.f32.mrf.mxu1  ;;  %v2966_v30 = vsel %vm1575_vm6, %v6608_v34, %v5385_v27  ;;  %v3051_v27 = vld [vmem:[#allocation6 + $0x4] sm:$0xf]  ;;  %vm6627_vm6 = vcmask 908288  }
 0x29f   : > { %4527 = vmatpush.msk.msra.mxu0 %vm296_vm0, %v5927_v25  ;;  %v1542_v10 = vadd.f32 %v1519_v17, %v1460_v18  ;;  %v1543_v55 = vadd.f32 %v1539_v62, %v1461_v37 }
 0x2a3   : > { %v2817_v39 = vld.sshfl [vmem:[#allocation1] sm:$0xff pattern:$0x75316420]  ;;  %v2219_v63 = vpop.permute.xlu0 %2218 }
 0x2a4   : > { %2818 = vrot.lane.b32.xlu1 %v2817_v39, %s5018_s10  ;;  %2822 = vst [vmem:[#allocation1] ss:$2 sm:$0xff] %v5914_v43  ;;  %v2223_v57 = vsel %vm2222_vm9, %v2217_v32, %v2219_v63  ;;  %v2224_v25 = vsel %vm2222_vm9, %v2219_v63, %v5830_v49  ;;  %v2969_v39 = vmul.f32 %v5942_v38, %v2966_v30  ;;  %v6612_v30 = vrot.slane %v5379_v22, 4  ;;  %vm6628_vm9 = vmmov %vm6627_vm6 }
 0x2a5   : > { %4523 = vmatpush.msk.msrb.mxu2 %vm296_vm0, %v2223_v57  ;;  %4525 = vmatpush.msk.msrb.mxu3 %vm296_vm0, %v2224_v25 }
 0x2a6   : > { %v2359_v13 = vpop.permute.xlu2 %2358  ;;  %4524 = vmatmul.msk.f32.vlgmr.msrb.gmra.mxu2 %vm358_vm1, %v2207_v58  ;;  %4526 = vmatmul.msk.f32.vlgmr.msrb.gmra.mxu3 %vm358_vm1, %v2207_v58  ;;  %v1621_v32 = vpop.f32.mrf.mxu3 }
 0x2a7   : > { %v2363_v11 = vsel %vm2196_vm7, %v2359_v13, %v5837_v60  ;;  %4528 = vmatmul.msk.f32.vlgmr.msra.gmra.mxu0 %vm358_vm1, %v2279_v24  ;;  %v1625_v8 = vadd.f32 %v1621_v32, %v1543_v55  ;;  %v2971_v60 = vld [vmem:[#allocation6 + $0x4] sm:$0xf] }
 0x2a8   : > { %4533 = vmatpush.msk.msra.mxu3 %vm296_vm0, %v2363_v11 }
 0x2aa   : > { %v6083_v2 = vpop.permute.xlu1 %4015 }
 0x2ab   : > { %v2826_v44 = vld.sshfl [vmem:[#allocation1 + $0x8] sm:$0xff pattern:$0x75316420]  ;;  %v2825_v49 = vld.sshfl [vmem:[#allocation1] sm:$0xff pattern:$0x75316420] }
 0x2ac   : > { %2830 = vrot.lane.b32.xlu1 %v2826_v44, %s6607_s8  ;;  %2828 = vrot.lane.b32.xlu0 %v2825_v49, %s6607_s8  ;;  %2898 = vst [vmem:[#allocation1] ss:$2 sm:$0xff] %v2893_v48 }
 0x2b3   : > { %v2902_v19 = vld.sshfl [vmem:[#allocation1 + $0x8] sm:$0xff pattern:$0x75316420]  ;;  %v2901_v28 = vld.sshfl [vmem:[#allocation1] sm:$0xff pattern:$0x75316420] }
 0x2b4   : > { %2906 = vrot.lane.b32.xlu1 %v2902_v19, %s6569_s13  ;;  %2904 = vrot.lane.b32.xlu0 %v2901_v28, %s6569_s13  ;;  %2973 = vst [vmem:[#allocation1] ss:$2 sm:$0xff] %v2971_v60  ;;  %v3131_v28 = vld [vmem:[#allocation6 + $0x4] sm:$0xf]  ;;  %s6621_s13 = smov 104  }
 0x2b6   : > { %v2347_v18 = vpop.permute.xlu0 %2346  ;;  %v2439_v37 = vpop.permute.xlu2 %2438 }
 0x2b7   : > { %v2443_v24 = vsel %vm2114_vm15, %v2439_v37, %v5858_v6  ;;  %4534 = vmatmul.msk.f32.vlgmr.msra.gmra.mxu3 %vm358_vm1, %v2347_v18 }
 0x2b8   : > { %4537 = vmatpush.msk.msrb.mxu1 %vm296_vm0, %v2443_v24  ;;  %v3126_v24 = vsel %vm1411_vm2, %v6612_v30, %v5379_v22  ;;  %v3211_v22 = vld [vmem:[#allocation6 + $0x4] sm:$0xf]  ;;  %vm6625_vm2 = vcmask 269312  }
 0x2bb   : > { %v2974_v17 = vld.sshfl [vmem:[#allocation1] sm:$0xff pattern:$0x75316420] }
 0x2bc   : > { %2975 = vrot.lane.b32.xlu0 %v2974_v17, %s6609_s24  ;;  %2979 = vst [vmem:[#allocation1] ss:$2 sm:$0xff] %v2969_v39  ;;  %v3129_v39 = vmul.f32 %v5942_v38, %v3126_v24 }
 0x2be   : > { %v2357_v62 = vpop.permute.xlu1 %2356  ;;  %v2507_v55 = vpop.permute.xlu2 %2506 }
 0x2bf   : > { %v2362_v33 = vsel %vm2196_vm7, %v2357_v62, %v2359_v13  ;;  %v1601_v63 = vpop.f32.mrf.mxu2  ;;  %v1703_v58 = vpop.f32.mrf.mxu1  ;;  %v6610_v13 = vrot.slane %v5400_v50, 4  ;;  %vm6615_vm7 = vcmask 244736  }
 0x2c0   : > { %4531 = vmatpush.msk.msra.mxu2 %vm296_vm0, %v2362_v33  ;;  %v1624_v57 = vadd.f32 %v1601_v63, %v1542_v10  ;;  %v6100_v25 = vadd.f32 %v1703_v58, %v1625_v8  ;;  %v1683_v11 = vpop.f32.mrf.mxu0  ;;  %v6614_v58 = vrot.slane %v5351_v56, 4 }
 0x2c1   : > { %4532 = vmatmul.msk.f32.vlgmr.msra.gmra.mxu2 %vm358_vm1, %v2347_v18  ;;  %v3046_v48 = vsel %vm1493_vm12, %v6610_v13, %v5400_v50  ;;  %vm6622_vm12 = vcmask 924672  }
 0x2c2   : > { %v6106_v32 = vadd.f32 %v1683_v11, %v1624_v57  ;;  %v3049_v10 = vmul.f32 %v5942_v38, %v3046_v48  ;;  %v3206_v57 = vsel %vm6615_vm7, %v6614_v58, %v5351_v56  ;;  %v3291_v56 = vld [vmem:[#allocation6 + $0x4] sm:$0xf]  ;;  %vm6634_vm7 = vmmov %vm6629_vm5 }
 0x2c3   : > { %v2983_v6 = vld.sshfl [vmem:[#allocation1 + $0x8] sm:$0xff pattern:$0x75316420]  ;;  %v2982_v53 = vld.sshfl [vmem:[#allocation1] sm:$0xff pattern:$0x75316420] }
 0x2c4   : > { %2987 = vrot.lane.b32.xlu1 %v2983_v6, %s6574_s0  ;;  %2985 = vrot.lane.b32.xlu0 %v2982_v53, %s6574_s0  ;;  %3053 = vst [vmem:[#allocation1] ss:$2 sm:$0xff] %v3051_v27  ;;  %s6611_s0 = smov 120  }
 0x2c6   : > { %v2427_v44 = vpop.permute.xlu1 %2426  ;;  %v2519_v49 = vpop.permute.xlu2 %2518 }
 0x2c7   : > { %v2523_v60 = vsel %vm2032_vm10, %v2519_v49, %v5886_v4  ;;  %4538 = vmatmul.msk.f32.vlgmr.msrb.gmra.mxu1 %vm358_vm1, %v2427_v44 }
 0x2c8   : > { %4541 = vmatpush.msk.msrb.mxu3 %vm296_vm0, %v2523_v60  ;;  %v6617_v60 = vrot.slane %v5366_v9, 4 }
 0x2c9   : > { %4542 = vmatmul.msk.f32.vlgmr.msrb.gmra.mxu3 %vm358_vm1, %v2507_v55 }
 0x2cb   : > { %v3054_v8 = vld.sshfl [vmem:[#allocation1] sm:$0xff pattern:$0x75316420] }
 0x2cc   : > { %3055 = vrot.lane.b32.xlu1 %v3054_v8, %s6611_s0  ;;  %3059 = vst [vmem:[#allocation1] ss:$2 sm:$0xff] %v3049_v10 }
 0x2ce   : > { %v2437_v50 = vpop.permute.xlu1 %2436 }
 0x2cf   : > { %v2442_v19 = vsel %vm2114_vm15, %v2437_v50, %v2439_v37  ;;  %vm6623_vm15 = vmmov %vm6622_vm12 }
 0x2d0   : > { %4535 = vmatpush.msk.msrb.mxu0 %vm296_vm0, %v2442_v19 }
 0x2d1   : > { %4536 = vmatmul.msk.f32.vlgmr.msrb.gmra.mxu0 %vm358_vm1, %v2427_v44 }
 0x2d3   : > { %v3063_v4 = vld.sshfl [vmem:[#allocation1 + $0x8] sm:$0xff pattern:$0x75316420]  ;;  %v3062_v18 = vld.sshfl [vmem:[#allocation1] sm:$0xff pattern:$0x75316420] }
 0x2d4   : > { %3067 = vrot.lane.b32.xlu2 %v3063_v4, %s6573_s7  ;;  %3065 = vrot.lane.b32.xlu1 %v3062_v18, %s6573_s7  ;;  %3133 = vst [vmem:[#allocation1] ss:$2 sm:$0xff] %v3131_v28  ;;  %v3363_v4 = vld [vmem:[#allocation6 + $0x4] sm:$0xf]  ;;  %s6626_s7 = smov 100  }
 0x2d6   : > { %v2599_v34 = vpop.permute.xlu2 %2598 }
 0x2d7   : > { %v2603_v37 = vsel %vm1950_vm3, %v2599_v34, %v5906_v7 }
 0x2d8   : > { %4545 = vmatpush.msk.msra.mxu1 %vm296_vm0, %v2603_v37 }
 0x2db   : > { %v3134_v17 = vld.sshfl [vmem:[#allocation1] sm:$0xff pattern:$0x75316420] }
 0x2dc   : > { %3135 = vrot.lane.b32.xlu2 %v3134_v17, %s6613_s9  ;;  %3139 = vst [vmem:[#allocation1] ss:$2 sm:$0xff] %v3129_v39 }
 0x2de   : > { %v2517_v62 = vpop.permute.xlu1 %2516  ;;  %v2667_v33 = vpop.permute.xlu2 %2666 }
 0x2df   : > { %v2522_v27 = vsel %vm2032_vm10, %v2517_v62, %v2519_v49  ;;  %vm6618_vm10 = vcmask 252928   ;;  %v3444_v62 = vld [vmem:[#allocation6 + $0x4] sm:$0xf] }
 0x2e0   : > { %4539 = vmatpush.msk.msrb.mxu2 %vm296_vm0, %v2522_v27  ;;  %v3286_v10 = vsel %vm6618_vm10, %v6617_v60, %v5366_v9  ;;  %vm6637_vm10 = vmmov %vm6633_vm4 }
 0x2e1   : > { %4540 = vmatmul.msk.f32.vlgmr.msrb.gmra.mxu2 %vm358_vm1, %v2507_v55  ;;  %v3209_v55 = vmul.f32 %v5942_v38, %v3206_v57  ;;  %v3289_v8 = vmul.f32 %v5942_v38, %v3286_v10 }
 0x2e3   : > { %v3143_v6 = vld.sshfl [vmem:[#allocation1 + $0x8] sm:$0xff pattern:$0x75316420]  ;;  %v3142_v53 = vld.sshfl [vmem:[#allocation1] sm:$0xff pattern:$0x75316420] }
 0x2e4   : > { %3147 = vrot.lane.b32.xlu2 %v3143_v6, %s6576_s1  ;;  %3145 = vrot.lane.b32.xlu1 %v3142_v53, %s6576_s1  ;;  %3213 = vst [vmem:[#allocation1] ss:$2 sm:$0xff] %v3211_v22  ;;  %s6619_s1 = smov 108  }
 0x2e6   : > { %v2587_v7 = vpop.permute.xlu1 %2586  ;;  %v2679_v63 = vpop.permute.xlu2 %2678 }
 0x2e7   : > { %v2683_v11 = vsel %vm6616_vm8, %v2679_v63, %v5921_v3  ;;  %4546 = vmatmul.msk.f32.vlgmr.msra.gmra.mxu1 %vm358_vm1, %v2587_v7  ;;  %vm6636_vm8 = vcmask 801792  }
 0x2e8   : > { %4549 = vmatpush.msk.msra.mxu3 %vm296_vm0, %v2683_v11 }
 0x2e9   : > { %4550 = vmatmul.msk.f32.vlgmr.msra.gmra.mxu3 %vm358_vm1, %v2667_v33 }
 0x2eb   : > { %v3214_v13 = vld.sshfl [vmem:[#allocation1] sm:$0xff pattern:$0x75316420] }
 0x2ec   : > { %3215 = vrot.lane.b32.xlu1 %v3214_v13, %s6607_s8  ;;  %3219 = vst [vmem:[#allocation1] ss:$2 sm:$0xff] %v3209_v55  ;;  %s4249_s8 = scalar_lea.sflag [#allocation5], %s5145_s26 }
 0x2ee   : > { %v2597_v48 = vpop.permute.xlu1 %2596 }
 0x2ef   : > { %v2602_v44 = vsel %vm1950_vm3, %v2597_v48, %v2599_v34  ;;  %vm6631_vm3 = vmmov %vm6630_vm14 }
 0x2f0   : > { %4543 = vmatpush.msk.msra.mxu0 %vm296_vm0, %v2602_v44 }
 0x2f1   : > { %4544 = vmatmul.msk.f32.vlgmr.msra.gmra.mxu0 %vm358_vm1, %v2587_v7 }
 0x2f3   : > { %v3223_v3 = vld.sshfl [vmem:[#allocation1 + $0x8] sm:$0xff pattern:$0x75316420]  ;;  %v3222_v49 = vld.sshfl [vmem:[#allocation1] sm:$0xff pattern:$0x75316420] }
 0x2f4   : > { %3227 = vrot.lane.b32.xlu2 %v3223_v3, %s6579_s2  ;;  %3225 = vrot.lane.b32.xlu1 %v3222_v49, %s6579_s2  ;;  %3293 = vst [vmem:[#allocation1] ss:$2 sm:$0xff] %v3291_v56  ;;  %v3522_v49 = vmul.f32 %v5942_v38, %v5563_v1  ;;  %s6635_s2 = smov 88  }
 0x2fb   : > { %v3294_v50 = vld.sshfl [vmem:[#allocation1] sm:$0xff pattern:$0x75316420] }
 0x2fc   : > { %3295 = vrot.lane.b32.xlu2 %v3294_v50, %s6619_s1  ;;  %3299 = vst [vmem:[#allocation1] ss:$2 sm:$0xff] %v3289_v8  ;;  %v3604_v50 = vld [vmem:[#allocation6 + $0x4] sm:$0xf] }
 0x2fe   : > { %v2677_v19 = vpop.permute.xlu1 %2676 }
 0x2ff   : > { %v2682_v28 = vsel %vm6620_vm11, %v2677_v19, %v2679_v63  ;;  %vm6639_vm11 = vcmask 793600  }
 0x300   : > { %4547 = vmatpush.msk.msra.mxu2 %vm296_vm0, %v2682_v28 }
 0x301   : > { %4548 = vmatmul.msk.f32.vlgmr.msra.gmra.mxu2 %vm358_vm1, %v2667_v33 }
 0x303   : > { %v3303_v18 = vld.sshfl [vmem:[#allocation1 + $0x8] sm:$0xff pattern:$0x75316420]  ;;  %v3302_v34 = vld.sshfl [vmem:[#allocation1] sm:$0xff pattern:$0x75316420] }
 0x304   : > { %3307 = vrot.lane.b32.xlu2 %v3303_v18, %s6580_s17  ;;  %3305 = vrot.lane.b32.xlu1 %v3302_v34, %s6580_s17  ;;  %3365 = vst [vmem:[#allocation1] ss:$2 sm:$0xff] %v3363_v4  ;;  %s6642_s17 = smov 76  }
 0x306   : > { %v2747_v9 = vpop.permute.xlu0 %2746 }
 0x30b   : > { %v3366_v30 = vld.sshfl [vmem:[#allocation1] sm:$0xff pattern:$0x75316420] }
 0x30c   : > { %3367 = vrot.lane.b32.xlu0 %v3366_v30, %s6621_s13  ;;  %3371 = vst [vmem:[#allocation1] ss:$2 sm:$0xff] %v5914_v43  ;;  %s4889_s13 = scalar_lea.hbm %s6399_s3, 16 }
 0x30e   : > { %v2759_v24 = vpop.permute.xlu1 %2758  ;;  %v2757_v37 = vpop.permute.xlu0 %2756 }
 0x30f   : > { %v2763_v39 = vsel %vm6622_vm12, %v2759_v24, %v5865_v47  ;;  %v2762_v17 = vsel %vm6623_vm15, %v2757_v37, %v2759_v24  ;;  %v6624_v47 = vrot.slane %v5393_v35, 4  ;;  %vm6640_vm12 = vmmov %vm6636_vm8 }
 0x310   : > { %4551 = vmatpush.msk.msrb.mxu0 %vm296_vm0, %v2762_v17  ;;  %4553 = vmatpush.msk.msrb.mxu1 %vm296_vm0, %v2763_v39  ;;  %v3684_v39 = vld [vmem:[#allocation6 + $0x4] sm:$0xf]  ;;  %vm6641_vm15 = vmmov %vm6639_vm11 }
 0x311   : > { %4552 = vmatmul.msk.f32.vlgmr.msrb.gmra.mxu0 %vm358_vm1, %v2747_v9  ;;  %4554 = vmatmul.msk.f32.vlgmr.msrb.gmra.mxu1 %vm358_vm1, %v2747_v9  ;;  %v3439_v6 = vsel %vm6625_vm2, %v6624_v47, %v5393_v35  ;;  %v3524_v35 = vld [vmem:[#allocation6 + $0x4] sm:$0xf]  ;;  %vm3383_vm2 = vcmask 785408  }
 0x312   : > { %v3442_v53 = vmul.f32 %v5942_v38, %v3439_v6  ;;  %v3764_v6 = vld [vmem:[#allocation6 + $0x4] sm:$0xf] }
 0x313   : > { %v3375_v33 = vld.sshfl [vmem:[#allocation1 + $0x8] sm:$0xff pattern:$0x75316420]  ;;  %v3374_v27 = vld.sshfl [vmem:[#allocation1] sm:$0xff pattern:$0x75316420] }
 0x314   : > { %3379 = vrot.lane.b32.xlu1 %v3375_v33, %s6581_s20  ;;  %3377 = vrot.lane.b32.xlu0 %v3374_v27, %s6581_s20  ;;  %3446 = vst [vmem:[#allocation1] ss:$2 sm:$0xff] %v3444_v62 }
 0x316   : > { %v2819_v22 = vpop.permute.xlu1 %2818 }
 0x31b   : > { %v3447_v7 = vld.sshfl [vmem:[#allocation1] sm:$0xff pattern:$0x75316420] }
 0x31c   : > { %3448 = vrot.lane.b32.xlu1 %v3447_v7, %s6626_s7  ;;  %3452 = vst [vmem:[#allocation1] ss:$2 sm:$0xff] %v3442_v53 }
 0x31e   : > { %v2831_v63 = vpop.permute.xlu1 %2830  ;;  %v2829_v58 = vpop.permute.xlu0 %2828 }
 0x31f   : > { %v2836_v57 = vsel %vm2834_vm13, %v2831_v63, %v5884_v20  ;;  %v2835_v11 = vsel %vm2834_vm13, %v2829_v58, %v2831_v63  ;;  %v2895_v20 = vld [vmem:[#allocation6 + $0x4] sm:$0xf]  ;;  %vm6646_vm13 = vcmask 408576  }
 0x320   : > { %4555 = vmatpush.msk.msrb.mxu2 %vm296_vm0, %v2835_v11  ;;  %4557 = vmatpush.msk.msrb.mxu3 %vm296_vm0, %v2836_v57 }
 0x321   : > { %4556 = vmatmul.msk.f32.vlgmr.msrb.gmra.mxu2 %vm358_vm1, %v2819_v22  ;;  %4558 = vmatmul.msk.f32.vlgmr.msrb.gmra.mxu3 %vm358_vm1, %v2819_v22 }
 0x323   : > { %v3456_v55 = vld.sshfl [vmem:[#allocation1 + $0x8] sm:$0xff pattern:$0x75316420]  ;;  %v3455_v13 = vld.sshfl [vmem:[#allocation1] sm:$0xff pattern:$0x75316420] }
 0x324   : > { %3460 = vrot.lane.b32.xlu1 %v3456_v55, %s6584_s11  ;;  %3458 = vrot.lane.b32.xlu0 %v3455_v13, %s6584_s11  ;;  %3526 = vst [vmem:[#allocation1] ss:$2 sm:$0xff] %v3524_v35  ;;  %v3844_v13 = vld [vmem:[#allocation6 + $0x4] sm:$0xf]  ;;  %s6643_s11 = smov 78  }
 0x326   : > { %v2907_v48 = vpop.permute.xlu1 %2906  ;;  %v2905_v44 = vpop.permute.xlu0 %2904 }
 0x327   : > { %v2911_v56 = vsel %vm6627_vm6, %v2907_v48, %v5895_v16  ;;  %v2910_v3 = vsel %vm6628_vm9, %v2905_v44, %v2907_v48  ;;  %vm6647_vm6 = vcmask 777216  }
 0x328   : > { %4559 = vmatpush.msk.msra.mxu0 %vm296_vm0, %v2910_v3  ;;  %4561 = vmatpush.msk.msra.mxu1 %vm296_vm0, %v2911_v56  ;;  %v3916_v3 = vld [vmem:[#allocation6 + $0x4] sm:$0xf]  ;;  %vm6648_vm9 = vmmov %vm6647_vm6 }
 0x329   : > { %4560 = vmatmul.msk.f32.vlgmr.msra.gmra.mxu0 %vm358_vm1, %v2895_v20  ;;  %4562 = vmatmul.msk.f32.vlgmr.msra.gmra.mxu1 %vm358_vm1, %v2895_v20 }
 0x32b   : > { %v3527_v60 = vld.sshfl [vmem:[#allocation1] sm:$0xff pattern:$0x75316420] }
 0x32c   : > { %3528 = vrot.lane.b32.xlu2 %v3527_v60, %s6581_s20  ;;  %3532 = vst [vmem:[#allocation1] ss:$2 sm:$0xff] %v3522_v49  ;;  %s6632_s20 = smov 92  }
 0x32e   : > { %v2976_v10 = vpop.permute.xlu0 %2975  ;;  %v3068_v8 = vpop.permute.xlu2 %3067 }
 0x32f   : > { %v3072_v16 = vsel %vm6629_vm5, %v3068_v8, %v5965_v31  ;;  %v3602_v31 = vmul.f32 %v5942_v38, %v5541_v61  ;;  %vm6650_vm5 = vcmask 769024  }
 0x330   : > { %4569 = vmatpush.msk.msrb.mxu1 %vm296_vm0, %v3072_v16 }
 0x333   : > { %v3536_v19 = vld.sshfl [vmem:[#allocation1 + $0x8] sm:$0xff pattern:$0x75316420]  ;;  %v3535_v28 = vld.sshfl [vmem:[#allocation1] sm:$0xff pattern:$0x75316420] }
 0x334   : > { %3540 = vrot.lane.b32.xlu0 %v3536_v19, %s6586_s16  ;;  %3538 = vrot.lane.b32.xlu2 %v3535_v28, %s6586_s16  ;;  %3606 = vst [vmem:[#allocation1] ss:$2 sm:$0xff] %v3604_v50  ;;  %v3997_v50 = vld [vmem:[#allocation6 + $0x4] sm:$0xf]  ;;  %s6644_s16 = smov 72  }
 0x336   : > { %v2988_v1 = vpop.permute.xlu1 %2987  ;;  %v2986_v4 = vpop.permute.xlu0 %2985 }
 0x337   : > { %v2992_v18 = vsel %vm6630_vm14, %v2988_v1, %v5923_v45  ;;  %v2991_v34 = vsel %vm6631_vm3, %v2986_v4, %v2988_v1  ;;  %v3136_v9 = vpop.permute.xlu2 %3135  ;;  %vm6651_vm14 = vmmov %vm6650_vm5  ;;  %vm6653_vm3 = vcmask 678912  }
 0x338   : > { %4563 = vmatpush.msk.msra.mxu2 %vm296_vm0, %v2991_v34  ;;  %4565 = vmatpush.msk.msra.mxu3 %vm296_vm0, %v2992_v18 }
 0x339   : > { %4564 = vmatmul.msk.f32.vlgmr.msra.gmra.mxu2 %vm358_vm1, %v2976_v10  ;;  %4566 = vmatmul.msk.f32.vlgmr.msra.gmra.mxu3 %vm358_vm1, %v2976_v10 }
 0x33b   : > { %v3607_v30 = vld.sshfl [vmem:[#allocation1] sm:$0xff pattern:$0x75316420] }
 0x33c   : > { %3608 = vrot.lane.b32.xlu0 %v3607_v30, %s6632_s20  ;;  %3612 = vst [vmem:[#allocation1] ss:$2 sm:$0xff] %v3602_v31  ;;  %v4077_v31 = vld [vmem:[#allocation6 + $0x4] sm:$0xf] }
 0x33e   : > { %v3056_v24 = vpop.permute.xlu1 %3055 }
 0x33f   : > { %v3148_v45 = vpop.permute.xlu2 %3147  ;;  %4570 = vmatmul.msk.f32.vlgmr.msrb.gmra.mxu1 %vm358_vm1, %v3056_v24 }
 0x340   : > { %v3152_v37 = vsel %vm6633_vm4, %v3148_v45, %v5972_v0  ;;  %v3682_v0 = vmul.f32 %v5942_v38, %v5569_v5  ;;  %vm6654_vm4 = vcmask 760832  }
 0x341   : > { %4573 = vmatpush.msk.msrb.mxu3 %vm296_vm0, %v3152_v37 }
 0x342   : > { %4574 = vmatmul.msk.f32.vlgmr.msrb.gmra.mxu3 %vm358_vm1, %v3136_v9 }
 0x343   : > { %v3616_v17 = vld.sshfl [vmem:[#allocation1 + $0x8] sm:$0xff pattern:$0x75316420]  ;;  %v3615_v62 = vld.sshfl [vmem:[#allocation1] sm:$0xff pattern:$0x75316420] }
 0x344   : > { %3620 = vrot.lane.b32.xlu0 %v3616_v17, %s6589_s19  ;;  %3618 = vrot.lane.b32.xlu2 %v3615_v62, %s6589_s19  ;;  %3686 = vst [vmem:[#allocation1] ss:$2 sm:$0xff] %v3684_v39  ;;  %s6638_s19 = smov 84   ;;  %v4778_v62 = vld [vmem:[#allocation2 + $0x4] sm:$0xff] }
 0x346   : > { %v3066_v61 = vpop.permute.xlu1 %3065 }
 0x347   : > { %v3071_v33 = vsel %vm6634_vm7, %v3066_v61, %v3068_v8  ;;  %vm6655_vm7 = vmmov %vm6654_vm4 }
 0x348   : > { %4567 = vmatpush.msk.msrb.mxu0 %vm296_vm0, %v3071_v33 }
 0x349   : > { %4568 = vmatmul.msk.f32.vlgmr.msrb.gmra.mxu0 %vm358_vm1, %v3056_v24 }
 0x34b   : > { %v3687_v27 = vld.sshfl [vmem:[#allocation1] sm:$0xff pattern:$0x75316420] }
 0x34c   : > { %3688 = vrot.lane.b32.xlu1 %v3687_v27, %s6635_s2  ;;  %3692 = vst [vmem:[#allocation1] ss:$2 sm:$0xff] %v3682_v0  ;;  %v4157_v0 = vld [vmem:[#allocation6 + $0x4] sm:$0xf] }
 0x34e   : > { %v3228_v22 = vpop.permute.xlu2 %3227 }
 0x34f   : > { %v3232_v47 = vsel %vm6636_vm8, %v3228_v22, %v5992_v51  ;;  %v3762_v51 = vmul.f32 %v5942_v38, %v5592_v36  ;;  %vm6657_vm8 = vcmask 670720  }
 0x350   : > { %4577 = vmatpush.msk.msra.mxu1 %vm296_vm0, %v3232_v47 }
 0x353   : > { %v3696_v53 = vld.sshfl [vmem:[#allocation1 + $0x8] sm:$0xff pattern:$0x75316420]  ;;  %v3695_v7 = vld.sshfl [vmem:[#allocation1] sm:$0xff pattern:$0x75316420] }
 0x354   : > { %3700 = vrot.lane.b32.xlu2 %v3696_v53, %s6590_s28  ;;  %3698 = vrot.lane.b32.xlu1 %v3695_v7, %s6590_s28  ;;  %3766 = vst [vmem:[#allocation1] ss:$2 sm:$0xff] %v3764_v6  ;;  %s6649_s28 = smov 68   ;;  %v4155_v7 = vmul.f32 %v4778_v62, %v5611_v46 }
 0x356   : > { %v3146_v63 = vpop.permute.xlu1 %3145  ;;  %v3296_v5 = vpop.permute.xlu2 %3295 }
 0x357   : > { %v3151_v58 = vsel %vm6637_vm10, %v3146_v63, %v3148_v45  ;;  %v4170_v63 = vld.sshfl [vmem:[#allocation1 + $0x10] sm:$0xff pattern:$0x75316420]  ;;  %vm6658_vm10 = vmmov %vm6653_vm3 }
 0x358   : > { %4571 = vmatpush.msk.msrb.mxu2 %vm296_vm0, %v3151_v58 }
 0x359   : > { %4572 = vmatmul.msk.f32.vlgmr.msrb.gmra.mxu2 %vm358_vm1, %v3136_v9 }
 0x35b   : > { %v3767_v57 = vld.sshfl [vmem:[#allocation1] sm:$0xff pattern:$0x75316420] }
 0x35c   : > { %3768 = vrot.lane.b32.xlu2 %v3767_v57, %s6638_s19  ;;  %3772 = vst [vmem:[#allocation1] ss:$2 sm:$0xff] %v3762_v51 }
 0x35e   : > { %v3216_v11 = vpop.permute.xlu1 %3215  ;;  %v3308_v35 = vpop.permute.xlu2 %3307 }
 0x35f   : > { %v3312_v55 = vsel %vm6639_vm11, %v3308_v35, %v6000_v26  ;;  %4578 = vmatmul.msk.f32.vlgmr.msra.gmra.mxu1 %vm358_vm1, %v3216_v11  ;;  %v3842_v26 = vmul.f32 %v5942_v38, %v5580_v15  ;;  %vm6659_vm11 = vmmov %vm6657_vm8 }
 0x360   : > { %4581 = vmatpush.msk.msra.mxu3 %vm296_vm0, %v3312_v55 }
 0x361   : > { %4582 = vmatmul.msk.f32.vlgmr.msra.gmra.mxu3 %vm358_vm1, %v3296_v5 }
 0x363   : > { %v3776_v48 = vld.sshfl [vmem:[#allocation1 + $0x8] sm:$0xff pattern:$0x75316420]  ;;  %v3775_v44 = vld.sshfl [vmem:[#allocation1] sm:$0xff pattern:$0x75316420] }
 0x364   : > { %3780 = vrot.lane.b32.xlu2 %v3776_v48, %s6593_s14  ;;  %3778 = vrot.lane.b32.xlu1 %v3775_v44, %s6593_s14  ;;  %3846 = vst [vmem:[#allocation1] ss:$2 sm:$0xff] %v3844_v13  ;;  %s6652_s14 = smov 77  }
 0x366   : > { %v3226_v36 = vpop.permute.xlu1 %3225 }
 0x367   : > { %v3231_v20 = vsel %vm6640_vm12, %v3226_v36, %v3228_v22  ;;  %vm6660_vm12 = vcmask 662528  }
 0x368   : > { %4575 = vmatpush.msk.msra.mxu0 %vm296_vm0, %v3231_v20 }
 0x369   : > { %4576 = vmatmul.msk.f32.vlgmr.msra.gmra.mxu0 %vm358_vm1, %v3216_v11 }
 0x36b   : > { %v3847_v56 = vld.sshfl [vmem:[#allocation1] sm:$0xff pattern:$0x75316420] }
 0x36c   : > { %3848 = vrot.lane.b32.xlu0 %v3847_v56, %s6596_s21  ;;  %3852 = vst [vmem:[#allocation1] ss:$2 sm:$0xff] %v3842_v26 }
 0x373   : > { %v3856_v49 = vld.sshfl [vmem:[#allocation1 + $0x8] sm:$0xff pattern:$0x75316420]  ;;  %v3855_v60 = vld.sshfl [vmem:[#allocation1] sm:$0xff pattern:$0x75316420] }
 0x374   : > { %3860 = vrot.lane.b32.xlu1 %v3856_v49, %s6594_s27  ;;  %3858 = vrot.lane.b32.xlu0 %v3855_v60, %s6594_s27  ;;  %3918 = vst [vmem:[#allocation1] ss:$2 sm:$0xff] %v3916_v3  ;;  %s6656_s27 = smov 64  }
 0x376   : > { %v3306_v10 = vpop.permute.xlu1 %3305 }
 0x377   : > { %v3311_v8 = vsel %vm6641_vm15, %v3306_v10, %v3308_v35  ;;  %vm6661_vm15 = vmmov %vm6660_vm12 }
 0x378   : > { %4579 = vmatpush.msk.msra.mxu2 %vm296_vm0, %v3311_v8 }
 0x379   : > { %4580 = vmatmul.msk.f32.vlgmr.msra.gmra.mxu2 %vm358_vm1, %v3296_v5 }
 0x37b   : > { %v3919_v15 = vld.sshfl [vmem:[#allocation1] sm:$0xff pattern:$0x75316420] }
 0x37c   : > { %3920 = vrot.lane.b32.xlu1 %v3919_v15, %s6642_s17  ;;  %3924 = vst [vmem:[#allocation1] ss:$2 sm:$0xff] %v5914_v43  ;;  %v3995_v43 = vmul.f32 %v5942_v38, %v5604_v23  ;;  %v6645_v23 = vrot.slane %v5395_v41, 4 }
 0x37e   : > { %v3368_v16 = vpop.permute.xlu0 %3367  ;;  %v4072_v38 = vsel %vm6646_vm13, %v6645_v23, %v5395_v41  ;;  %vm6662_vm13 = vcmask 646144   ;;  %v1756_v23 = vpop.f32.mrf.mxu2 }
 0x37f   : > { %v4075_v61 = vmul.f32 %v4778_v62, %v4072_v38  ;;  %v1858_v38 = vpop.f32.mrf.mxu1 }
 0x383   : > { %v3928_v19 = vld.sshfl [vmem:[#allocation1 + $0x8] sm:$0xff pattern:$0x75316420]  ;;  %v3927_v28 = vld.sshfl [vmem:[#allocation1] sm:$0xff pattern:$0x75316420] }
 0x384   : > { %3932 = vrot.lane.b32.xlu1 %v3928_v19, %s6596_s21  ;;  %3930 = vrot.lane.b32.xlu0 %v3927_v28, %s6596_s21  ;;  %3999 = vst [vmem:[#allocation1] ss:$2 sm:$0xff] %v3997_v50  ;;  %s4633_s21 = sshll.u32 %s5070_s22, 3 }
 0x385   : > { %s4268_s25 = scalar_lea.hbm %s6399_s3, %s4633_s21 }
 0x386   : > { %v3380_v1 = vpop.permute.xlu1 %3379  ;;  %v3378_v4 = vpop.permute.xlu0 %3377  ;;  %s4272_s10 = sshll.u32 %s4268_s25, 4  ;;  %s4273_s10 = int_to_ptr.hbm [resolvable:$true] %s4272_s10 }
 0x387   : > { %v3385_v18 = vsel %vm3383_vm2, %v3380_v1, %v5974_v21  ;;  %v3384_v34 = vsel %vm3383_vm2, %v3378_v4, %v3380_v1  ;;  %v3529_v45 = vpop.permute.xlu2 %3528  ;;  %vm3936_vm2 = vcmask 654336   ;;  %v1920_v62 = vpop.f32.mrf.mxu2  ;;  %s4883_s24 = sshra.s32 %s4273_s10, 4  ;;  %s4884_s24 = int_to_ptr.hbm [resolvable:$true] %s4883_s24 }
 0x388   : > { %4583 = vmatpush.msk.msrb.mxu0 %vm296_vm0, %v3384_v34  ;;  %4585 = vmatpush.msk.msrb.mxu1 %vm296_vm0, %v3385_v18  ;;  %s4885_s0 = scalar_lea.hbm %s4884_s24, 8  ;;  %p4890_p9 = scmp.lt.s32.totalorder %s4884_s24, %s6399_s3 }
 0x389   : > { %4584 = vmatmul.msk.f32.vlgmr.msrb.gmra.mxu0 %vm358_vm1, %v3368_v16  ;;  %4586 = vmatmul.msk.f32.vlgmr.msrb.gmra.mxu1 %vm358_vm1, %v3368_v16  ;;  %p4886_p1 = scmp.ne.s32.totalorder %s4884_s24, %s4885_s0  ;;  %p4891_p10 = scmp.lt.s32.totalorder %s4889_s13, %s4885_s0 }
 0x38b   : > { %v4000_v9 = vld.sshfl [vmem:[#allocation1] sm:$0xff pattern:$0x75316420]  ;;  %p4887_p4 = pnand %p4886_p1, %p5118_p5  ;;  %p4892_p2 = por %p4891_p10, %p4890_p9 }
 0x38c   : > { %4095 = vrot.lane.b32.xlu1 %v5950_v52, %s6643_s11  ;;  %4001 = vrot.lane.b32.xlu2 %v4000_v9, %s6644_s16  ;;  %4005 = vst [vmem:[#allocation1] ss:$2 sm:$0xff] %v3995_v43 }
 0x38d   : > { %p4888_p8 = pneg %p4887_p4 }
 0x38e   : > { %v3449_v21 = vpop.permute.xlu1 %3448 }
 0x38f   : > { %v3539_v41 = vpop.permute.xlu2 %3538  ;;  %p4893_p11 = pnand %p4892_p2, %p4888_p8 }
 0x393   : > { %v4009_v30 = vld.sshfl [vmem:[#allocation1 + $0x8] sm:$0xff pattern:$0x75316420]  ;;  %v4008_v24 = vld.sshfl [vmem:[#allocation1] sm:$0xff pattern:$0x75316420] }
 0x394   : > { %4013 = vrot.lane.b32.xlu0 %v4009_v30, %s6597_s29  ;;  %4011 = vrot.lane.b32.xlu2 %v4008_v24, %s6597_s29  ;;  %4079 = vst [vmem:[#allocation1] ss:$2 sm:$0xff] %v4077_v31 }
 0x396   : > { %v3461_v37 = vpop.permute.xlu1 %3460  ;;  %v3459_v39 = vpop.permute.xlu0 %3458 }
 0x397   : > { %v3465_v52 = vsel %vm6647_vm6, %v3461_v37, %v5982_v42  ;;  %v3464_v17 = vsel %vm6648_vm9, %v3459_v39, %v3461_v37  ;;  %vm6663_vm6 = vmmov %vm6662_vm13  ;;  %vm6664_vm9 = vcmask 637952   ;;  %v1776_v37 = vpop.f32.mrf.mxu3 }
 0x398   : > { %4587 = vmatpush.msk.msrb.mxu2 %vm296_vm0, %v3464_v17  ;;  %4589 = vmatpush.msk.msrb.mxu3 %vm296_vm0, %v3465_v52  ;;  %v1838_v52 = vpop.f32.mrf.mxu0 }
 0x399   : > { %4588 = vmatmul.msk.f32.vlgmr.msrb.gmra.mxu2 %vm358_vm1, %v3449_v21  ;;  %4590 = vmatmul.msk.f32.vlgmr.msrb.gmra.mxu3 %vm358_vm1, %v3449_v21 }
 0x39b   : > { %v4080_v33 = vld.sshfl [vmem:[#allocation1] sm:$0xff pattern:$0x75316420] }
 0x39c   : > { %4081 = vrot.lane.b32.xlu0 %v4080_v33, %s6649_s28  ;;  %4085 = vst [vmem:[#allocation1] ss:$2 sm:$0xff] %v4075_v61  ;;  %v2022_v61 = vpop.f32.mrf.mxu1 }
 0x39e   : > { %v3619_v22 = vpop.permute.xlu2 %3618 }
 0x39f   : > { %v1940_v17 = vpop.f32.mrf.mxu3 }
 0x3a0   : > { %v2002_v33 = vpop.f32.mrf.mxu0 }
 0x3a3   : > { %v4089_v27 = vld.sshfl [vmem:[#allocation1 + $0x8] sm:$0xff pattern:$0x75316420]  ;;  %v4088_v42 = vld.sshfl [vmem:[#allocation1] sm:$0xff pattern:$0x75316420] }
 0x3a4   : > { %4093 = vrot.lane.b32.xlu0 %v4089_v27, %s6643_s11  ;;  %4091 = vrot.lane.b32.xlu2 %v4088_v42, %s6643_s11  ;;  %4159 = vst [vmem:[#allocation1] ss:$2 sm:$0xff] %v4157_v0  ;;  %v2084_v0 = vpop.f32.mrf.mxu2  ;;  %v2186_v27 = vpop.f32.mrf.mxu1 }
 0x3a6   : > { %v3541_v47 = vpop.permute.xlu0 %3540 }
 0x3a7   : > { %v3544_v6 = vsel %vm6650_vm5, %v3539_v41, %v3541_v47  ;;  %v3545_v53 = vsel %vm6651_vm14, %v3541_v47, %v6017_v54  ;;  %vm6665_vm5 = vmmov %vm6664_vm9  ;;  %vm6666_vm14 = vcmask 629760   ;;  %v2104_v41 = vpop.f32.mrf.mxu3 }
 0x3a8   : > { %4591 = vmatpush.msk.msra.mxu0 %vm296_vm0, %v3544_v6  ;;  %4593 = vmatpush.msk.msra.mxu1 %vm296_vm0, %v3545_v53  ;;  %v2166_v42 = vpop.f32.mrf.mxu0 }
 0x3a9   : > { %4592 = vmatmul.msk.f32.vlgmr.msra.gmra.mxu0 %vm358_vm1, %v3529_v45  ;;  %4594 = vmatmul.msk.f32.vlgmr.msra.gmra.mxu1 %vm358_vm1, %v3529_v45 }
 0x3ab   : > { %v4160_v5 = vld.sshfl [vmem:[#allocation1] sm:$0xff pattern:$0x75316420] }
 0x3ac   : > { %4175 = vrot.lane.b32.xlu0 %v4170_v63, %s6652_s14  ;;  %4165 = vst [vmem:[#allocation1] ss:$2 sm:$0xff] %v4155_v7  ;;  %v2248_v47 = vpop.f32.mrf.mxu2  ;;  %v2327_v6 = vpop.f32.mrf.mxu1 }
 0x3ae   : > { %v3609_v58 = vpop.permute.xlu0 %3608  ;;  %v3701_v51 = vpop.permute.xlu2 %3700 }
 0x3af   : > { %v3705_v54 = vsel %vm6653_vm3, %v3701_v51, %v6038_v14  ;;  %vm6667_vm3 = vmmov %vm6666_vm14 }
 0x3b0   : > { %4601 = vmatpush.msk.msrb.mxu1 %vm296_vm0, %v3705_v54  ;;  %v2307_v53 = vpop.f32.mrf.mxu0 }
 0x3b3   : > { %v4169_v57 = vld.sshfl [vmem:[#allocation1 + $0x8] sm:$0xff pattern:$0x75316420]  ;;  %v4168_v11 = vld.sshfl [vmem:[#allocation1] sm:$0xff pattern:$0x75316420] }
 0x3b4   : > { %4173 = vrot.lane.b32.xlu2 %v4169_v57, %s6652_s14  ;;  %4171 = vrot.lane.b32.xlu1 %v4168_v11, %s6652_s14  ;;  %v2387_v63 = vpop.f32.mrf.mxu2 }
 0x3b6   : > { %v3621_v35 = vpop.permute.xlu0 %3620  ;;  %v3769_v46 = vpop.permute.xlu2 %3768 }
 0x3b7   : > { %v3624_v55 = vsel %vm6654_vm4, %v3619_v22, %v3621_v35  ;;  %v3625_v13 = vsel %vm6655_vm7, %v3621_v35, %v6027_v12  ;;  %v2268_v22 = vpop.f32.mrf.mxu3 }
 0x3b8   : > { %4595 = vmatpush.msk.msra.mxu2 %vm296_vm0, %v3624_v55  ;;  %4597 = vmatpush.msk.msra.mxu3 %vm296_vm0, %v3625_v13 }
 0x3b9   : > { %4596 = vmatmul.msk.f32.vlgmr.msra.gmra.mxu2 %vm358_vm1, %v3609_v58  ;;  %4598 = vmatmul.msk.f32.vlgmr.msra.gmra.mxu3 %vm358_vm1, %v3609_v58 }
 0x3bc   : > { %4161 = vrot.lane.b32.xlu1 %v4160_v5, %s6656_s27  ;;  %v2487_v5 = vpop.f32.mrf.mxu1  ;;  %v2547_v54 = vpop.f32.mrf.mxu2 }
 0x3be   : > { %v3689_v14 = vpop.permute.xlu1 %3688  ;;  %v3781_v48 = vpop.permute.xlu2 %3780 }
 0x3bf   : > { %v3785_v44 = vsel %vm6657_vm8, %v3781_v48, %v6046_v29  ;;  %4602 = vmatmul.msk.f32.vlgmr.msrb.gmra.mxu1 %vm358_vm1, %v3689_v14  ;;  %v2407_v7 = vpop.f32.mrf.mxu3 }
 0x3c0   : > { %4605 = vmatpush.msk.msrb.mxu3 %vm296_vm0, %v3785_v44 }
 0x3c1   : > { %4606 = vmatmul.msk.f32.vlgmr.msrb.gmra.mxu3 %vm358_vm1, %v3769_v46 }
 0x3c4   : > { %v2647_v57 = vpop.f32.mrf.mxu1 }
 0x3c6   : > { %v3699_v12 = vpop.permute.xlu1 %3698 }
 0x3c7   : > { %v3704_v36 = vsel %vm6658_vm10, %v3699_v12, %v3701_v51  ;;  %v2567_v58 = vpop.f32.mrf.mxu3  ;;  %v2467_v51 = vpop.f32.mrf.mxu0  ;;  %v1779_v12 = vadd.f32 %v1756_v23, %v6106_v32 }
 0x3c8   : > { %4599 = vmatpush.msk.msrb.mxu0 %vm296_vm0, %v3704_v36 }
 0x3c9   : > { %4600 = vmatmul.msk.f32.vlgmr.msrb.gmra.mxu0 %vm358_vm1, %v3689_v14 }
 0x3cc   : > { %v2807_v55 = vpop.f32.mrf.mxu1 }
 0x3cf   : > { %v2727_v11 = vpop.f32.mrf.mxu3  ;;  %v2627_v35 = vpop.f32.mrf.mxu0 }
 0x3d6   : > { %v3779_v20 = vpop.permute.xlu1 %3778 }
 0x3d7   : > { %v3784_v26 = vsel %vm6659_vm11, %v3779_v20, %v3781_v48  ;;  %v2787_v13 = vpop.f32.mrf.mxu0  ;;  %v2880_v14 = vpop.f32.mrf.mxu3  ;;  %v1780_v48 = vadd.f32 %v1776_v37, %v6100_v25  ;;  %v1861_v20 = vadd.f32 %v1838_v52, %v1779_v12 }
 0x3d8   : > { %4603 = vmatpush.msk.msrb.mxu2 %vm296_vm0, %v3784_v26 }
 0x3d9   : > { %4604 = vmatmul.msk.f32.vlgmr.msrb.gmra.mxu2 %vm358_vm1, %v3769_v46  ;;  %v2707_v46 = vpop.f32.mrf.mxu2  ;;  %v1862_v36 = vadd.f32 %v1858_v38, %v1780_v48 }
 0x3db   : > { %v1944_v26 = vadd.f32 %v1940_v17, %v1862_v36 }
 0x3de   : > { %v3849_v29 = vpop.permute.xlu0 %3848 }
 0x3e1   : > { %v2860_v44 = vpop.f32.mrf.mxu2 }
 0x3e6   : > { %v3861_v56 = vpop.permute.xlu1 %3860  ;;  %v3859_v3 = vpop.permute.xlu0 %3858 }
 0x3e7   : > { %v3865_v49 = vsel %vm6660_vm12, %v3861_v56, %v6029_v59  ;;  %v3864_v60 = vsel %vm6661_vm15, %v3859_v3, %v3861_v56  ;;  %v4002_v59 = vpop.permute.xlu2 %4001  ;;  %v2936_v56 = vpop.f32.mrf.mxu0 }
 0x3e8   : > { %4607 = vmatpush.msk.msra.mxu0 %vm296_vm0, %v3864_v60  ;;  %4609 = vmatpush.msk.msra.mxu1 %vm296_vm0, %v3865_v49  ;;  %v3036_v3 = vpop.f32.mrf.mxu3  ;;  %v1943_v49 = vadd.f32 %v1920_v62, %v1861_v20  ;;  %v2026_v60 = vadd.f32 %v2022_v61, %v1944_v26 }
 0x3e9   : > { %4608 = vmatmul.msk.f32.vlgmr.msra.gmra.mxu0 %vm358_vm1, %v3849_v29  ;;  %4610 = vmatmul.msk.f32.vlgmr.msra.gmra.mxu1 %vm358_vm1, %v3849_v29  ;;  %v2956_v29 = vpop.f32.mrf.mxu1 }
 0x3ee   : > { %v3921_v10 = vpop.permute.xlu1 %3920 }
 0x3ef   : > { %v4012_v19 = vpop.permute.xlu2 %4011 }
 0x3f6   : > { %v3933_v8 = vpop.permute.xlu1 %3932  ;;  %v3931_v15 = vpop.permute.xlu0 %3930 }
 0x3f7   : > { %v3938_v16 = vsel %vm3936_vm2, %v3933_v8, %v6041_v40  ;;  %v3937_v50 = vsel %vm3936_vm2, %v3931_v15, %v3933_v8  ;;  %v3016_v8 = vpop.f32.mrf.mxu2  ;;  %v2025_v15 = vadd.f32 %v2002_v33, %v1943_v49 }
 0x3f8   : > { %4611 = vmatpush.msk.msra.mxu2 %vm296_vm0, %v3937_v50  ;;  %4613 = vmatpush.msk.msra.mxu3 %vm296_vm0, %v3938_v16 }
 0x3f9   : > { %4612 = vmatmul.msk.f32.vlgmr.msra.gmra.mxu2 %vm358_vm1, %v3921_v10  ;;  %4614 = vmatmul.msk.f32.vlgmr.msra.gmra.mxu3 %vm358_vm1, %v3921_v10  ;;  %v2108_v10 = vadd.f32 %v2104_v41, %v2026_v60  ;;  %v2107_v50 = vadd.f32 %v2084_v0, %v2025_v15 }
 0x3fb   : > { %v2190_v16 = vadd.f32 %v2186_v27, %v2108_v10  ;;  %v2189_v25 = vadd.f32 %v2166_v42, %v2107_v50 }
 0x3fe   : > { %v4096_v18 = vpop.permute.xlu1 %4095  ;;  %v4092_v34 = vpop.permute.xlu2 %4091 }
 0x406   : > { %v4014_v28 = vpop.permute.xlu0 %4013 }
 0x407   : > { %v4017_v1 = vsel %vm6662_vm13, %v4012_v19, %v4014_v28  ;;  %v4018_v4 = vsel %vm6663_vm6, %v4014_v28, %v6083_v2  ;;  %v3116_v19 = vpop.f32.mrf.mxu1  ;;  %v3096_v28 = vpop.f32.mrf.mxu0 }
 0x408   : > { %4615 = vmatpush.msk.msrb.mxu0 %vm296_vm0, %v4017_v1  ;;  %4617 = vmatpush.msk.msrb.mxu1 %vm296_vm0, %v4018_v4  ;;  %v3196_v1 = vpop.f32.mrf.mxu3  ;;  %v2271_v4 = vadd.f32 %v2248_v47, %v2189_v25 }
 0x409   : > { %4616 = vmatmul.msk.f32.vlgmr.msrb.gmra.mxu0 %vm358_vm1, %v4002_v59  ;;  %4618 = vmatmul.msk.f32.vlgmr.msrb.gmra.mxu1 %vm358_vm1, %v4002_v59  ;;  %v2272_v59 = vadd.f32 %v2268_v22, %v2190_v16 }
 0x40b   : > { %v2331_v32 = vadd.f32 %v2327_v6, %v2272_v59 }
 0x40e   : > { %v4082_v40 = vpop.permute.xlu0 %4081  ;;  %v4174_v2 = vpop.permute.xlu2 %4173 }
 0x416   : > { %v4094_v43 = vpop.permute.xlu0 %4093 }
 0x417   : > { %v4097_v9 = vsel %vm6664_vm9, %v4092_v34, %v4094_v43  ;;  %v4098_v21 = vsel %vm6665_vm5, %v4094_v43, %v4096_v18  ;;  %v2411_v18 = vadd.f32 %v2407_v7, %v2331_v32  ;;  %v2330_v34 = vadd.f32 %v2307_v53, %v2271_v4 }
 0x418   : > { %4619 = vmatpush.msk.msrb.mxu2 %vm296_vm0, %v4097_v9  ;;  %4621 = vmatpush.msk.msrb.mxu3 %vm296_vm0, %v4098_v21  ;;  %v3276_v9 = vpop.f32.mrf.mxu1  ;;  %v3256_v21 = vpop.f32.mrf.mxu0 }
 0x419   : > { %4620 = vmatmul.msk.f32.vlgmr.msrb.gmra.mxu2 %vm358_vm1, %v4082_v40  ;;  %4622 = vmatmul.msk.f32.vlgmr.msrb.gmra.mxu3 %vm358_vm1, %v4082_v40  ;;  %v3176_v40 = vpop.f32.mrf.mxu2  ;;  %v2491_v43 = vadd.f32 %v2487_v5, %v2411_v18 }
 0x41e   : > { %v4176_v31 = vpop.permute.xlu0 %4175 }
 0x41f   : > { %v4178_v30 = vsel %vm6666_vm14, %v4174_v2, %v4176_v31  ;;  %v2571_v31 = vadd.f32 %v2567_v58, %v2491_v43 }
 0x420   : > { %4625 = vmatpush.msk.msra.mxu1 %vm296_vm0, %v4178_v30  ;;  %v3356_v30 = vpop.f32.mrf.mxu3  ;;  %v3429_v17 = vpop.f32.mrf.mxu1 }
 0x421   : > { %v3336_v37 = vpop.f32.mrf.mxu2  ;;  %v3409_v62 = vpop.f32.mrf.mxu0 }
 0x426   : > { %v4172_v24 = vpop.permute.xlu1 %4171 }
 0x427   : > { %v4177_v45 = vsel %vm6667_vm3, %v4172_v24, %v4174_v2  ;;  %v2410_v2 = vadd.f32 %v2387_v63, %v2330_v34 }
 0x428   : > { %4623 = vmatpush.msk.msra.mxu0 %vm296_vm0, %v4177_v45  ;;  %v2651_v45 = vadd.f32 %v2647_v57, %v2571_v31  ;;  %v3509_v41 = vpop.f32.mrf.mxu3  ;;  %v3589_v6 = vpop.f32.mrf.mxu1 }
 0x429   : > { %v2490_v24 = vadd.f32 %v2467_v51, %v2410_v2  ;;  %v3489_v27 = vpop.f32.mrf.mxu2  ;;  %v3569_v53 = vpop.f32.mrf.mxu0 }
 0x42a   : > { %v2731_v23 = vadd.f32 %v2727_v11, %v2651_v45 }
 0x42c   : > { %v2811_v52 = vadd.f32 %v2807_v55, %v2731_v23 }
 0x42e   : > { %v4162_v39 = vpop.permute.xlu1 %4161  ;;  %v2884_v33 = vadd.f32 %v2880_v14, %v2811_v52 }
 0x42f   : > { %4624 = vmatmul.msk.f32.vlgmr.msra.gmra.mxu0 %vm358_vm1, %v4162_v39  ;;  %4626 = vmatmul.msk.f32.vlgmr.msra.gmra.mxu1 %vm358_vm1, %v4162_v39  ;;  %v2570_v39 = vadd.f32 %v2547_v54, %v2490_v24 }
 0x430   : > { %v2960_v22 = vadd.f32 %v2956_v29, %v2884_v33 }
 0x431   : > { %v2650_v38 = vadd.f32 %v2627_v35, %v2570_v39 }
 0x432   : > { %v3040_v47 = vadd.f32 %v3036_v3, %v2960_v22 }
 0x433   : > { %v2730_v61 = vadd.f32 %v2707_v46, %v2650_v38 }
 0x434   : > { %v3120_v58 = vadd.f32 %v3116_v19, %v3040_v47 }
 0x435   : > { %v2810_v0 = vadd.f32 %v2787_v13, %v2730_v61 }
 0x436   : > { %v3200_v54 = vadd.f32 %v3196_v1, %v3120_v58 }
 0x437   : > { %v2883_v42 = vadd.f32 %v2860_v44, %v2810_v0 }
 0x438   : > { %v3280_v35 = vadd.f32 %v3276_v9, %v3200_v54 }
 0x439   : > { %v2959_v7 = vadd.f32 %v2936_v56, %v2883_v42 }
 0x43a   : > { %v3360_v14 = vadd.f32 %v3356_v30, %v3280_v35 }
 0x43b   : > { %v3039_v5 = vadd.f32 %v3016_v8, %v2959_v7 }
 0x43c   : > { %v3669_v63 = vpop.f32.mrf.mxu3  ;;  %v3649_v51 = vpop.f32.mrf.mxu2  ;;  %v3433_v12 = vadd.f32 %v3429_v17, %v3360_v14 }
 0x43d   : > { %v3119_v57 = vadd.f32 %v3096_v28, %v3039_v5  ;;  %v3749_v55 = vpop.f32.mrf.mxu1 }
 0x43e   : > { %v3513_v26 = vadd.f32 %v3509_v41, %v3433_v12 }
 0x43f   : > { %v3199_v11 = vadd.f32 %v3176_v40, %v3119_v57 }
 0x440   : > { %v3593_v56 = vadd.f32 %v3589_v6, %v3513_v26 }
 0x441   : > { %v3279_v48 = vadd.f32 %v3256_v21, %v3199_v11 }
 0x442   : > { %v3673_v10 = vadd.f32 %v3669_v63, %v3593_v56 }
 0x443   : > { %v3359_v13 = vadd.f32 %v3336_v37, %v3279_v48 }
 0x444   : > { %v3829_v44 = vpop.f32.mrf.mxu3  ;;  %v3753_v50 = vadd.f32 %v3749_v55, %v3673_v10 }
 0x445   : > { %v3432_v20 = vadd.f32 %v3409_v62, %v3359_v13 }
 0x446   : > { %v3729_v46 = vpop.f32.mrf.mxu0  ;;  %v3833_v19 = vadd.f32 %v3829_v44, %v3753_v50 }
 0x447   : > { %v3512_v29 = vadd.f32 %v3489_v27, %v3432_v20 }
 0x449   : > { %v3592_v60 = vadd.f32 %v3569_v53, %v3512_v29 }
 0x44b   : > { %v3672_v8 = vadd.f32 %v3649_v51, %v3592_v60 }
 0x44d   : > { %v3752_v59 = vadd.f32 %v3729_v46, %v3672_v8 }
 0x45c   : > { %v3809_v36 = vpop.f32.mrf.mxu2 }
 0x45d   : > { %v3832_v28 = vadd.f32 %v3809_v36, %v3752_v59 }
 0x466   : > { %v3889_v3 = vpop.f32.mrf.mxu0  ;;  %v3909_v49 = vpop.f32.mrf.mxu1 }
 0x467   : > { %v3912_v4 = vadd.f32 %v3889_v3, %v3832_v28  ;;  %v3913_v32 = vadd.f32 %v3909_v49, %v3833_v19 }
 0x47c   : > { %v3962_v15 = vpop.f32.mrf.mxu2  ;;  %v3982_v16 = vpop.f32.mrf.mxu3 }
 0x47d   : > { %v3985_v40 = vadd.f32 %v3962_v15, %v3912_v4  ;;  %v3986_v18 = vadd.f32 %v3982_v16, %v3913_v32 }
 0x486   : > { %v4042_v25 = vpop.f32.mrf.mxu0  ;;  %v4062_v1 = vpop.f32.mrf.mxu1 }
 0x487   : > { %v4065_v9 = vadd.f32 %v4042_v25, %v3985_v40  ;;  %v4066_v21 = vadd.f32 %v4062_v1, %v3986_v18 }
 0x49c   : > { %v4122_v34 = vpop.f32.mrf.mxu2  ;;  %v4142_v43 = vpop.f32.mrf.mxu3 }
 0x49d   : > { %v4145_v2 = vadd.f32 %v4122_v34, %v4065_v9  ;;  %v4146_v31 = vadd.f32 %v4142_v43, %v4066_v21 }
 0x4ac   : > { %v4202_v30 = vpop.f32.mrf.mxu0  ;;  %v4222_v24 = vpop.f32.mrf.mxu1 }
 0x4ad   : > { %v4225_v45 = vadd.f32 %v4202_v30, %v4145_v2  ;;  %v4226_v37 = vadd.f32 %v4222_v24, %v4146_v31 }
 0x4af   : > { %v4240_v39 = vmul.f32 %v4225_v45, %v4225_v45  ;;  %v4229_v23 = vrot.slane %v4226_v37, 4  ;;  %v4241_v38 = vmul.f32 %v4226_v37, %v4226_v37  ;;  %v4233_v52 = vsel %vm296_vm0, %v4225_v45, 0.0 }
 0x4b0   : > { %v4234_v17 = vsel %vm296_vm0, %v4226_v37, 0.0 }
 0x4b1   : > { %v4235_v62 = vadd.f32 %v4234_v17, %v4233_v52  ;;  %v4242_v61 = vsel %vm296_vm0, %v4240_v39, 0.0  ;;  %v4243_v33 = vsel %vm296_vm0, %v4241_v38, 0.0  ;;  %v4230_v41 = vsel %vm296_vm0, %v4225_v45, %v4229_v23 }
 0x4b2   : > { %v4244_v0 = vadd.f32 %v4243_v33, %v4242_v61  ;;  %4232 = vst [vmem:[%s274_s12] sm:$0xff] %v4230_v41 }
 0x4b3   : > { %4236 = vadd.xlane.f32.xlu2 %v4235_v62 }
 0x4b4   : > { %4896 = shalt.err (!%p4893_p11)
}
 0x4b5   : > { %4644 = dma.vmem_to_hbm [thread:$0]  (%p5118_p5), %s4271_s30, 128, %s4273_s10, %s4249_s8   ;;  %4245 = vadd.xlane.f32.xlu0 %v4244_v0  ;;  %vm4238_vm0 = vcmask 3072  }
 0x4b6   : > { %p287_p12 = scmp.lt.s32.totalorder %s5070_s22, 1 }
 0x4b8   : > { %s6677_s22 = smov (!%p287_p12, %s5070_s22), 1 }
 0x4b9   : > { %s4429_s26 = sshll.u32 %s6677_s22, 2 }
 0x4ba   : > { %s290_s17 = scalar_lea.vmem %s6400_s4, %s4429_s26  ;;  %s294_s28 = scalar_lea.vmem %s6401_s5, %s4429_s26 }
 0x526   : > { %v4237_v27 = vpop.xlane.xlu2 %4236 }
 0x527   : > { %4239 = vst.msk [vmem:[%s290_s17] sm:$0xf] %vm4238_vm0, %v4237_v27 }
 0x528   : > { %v4246_v42 = vpop.xlane.xlu0 %4245 }
 0x529   : > { %4247 = vst.msk [vmem:[%s294_s28] sm:$0xf] %vm4238_vm0, %v4246_v42 }
 0x52a PF: > { %s6670_s14 = sld [smem:[#allocation15_spill]]  ;;  %s4290_s27 = sand.u32 1, %s4927_s18  }
 0x52b   : > { %s4291_s22 = scalar_lea.sflag [#allocation5], %s4290_s27 }
 0x530   : > { %p6671_p5 = scmp.ge.s32.totalorder %s6670_s14, 2 }
 0x532   : > { %p4658_p13 = pnand %p6671_p5, %p5084_p6 }
 0x534   : > { %p4659_p0 = pneg %p4658_p13 }
 0x536   : > { %4922 = dma.done.wait (%p4659_p0), %s4291_s22, 128  }
 0x537   : > { %4924 = vsyncadd (%p4659_p0), %s4291_s22, 4294967168  ;;  %s6672_s21 = sld [smem:[#allocation17_spill]] }
 0x538   : > { %s6673_s18 = sld [smem:[#allocation13_spill]] }
 0x539   : > { %s6674_s19 = sld [smem:[#allocation14_spill]] }
 0x53a   : > { %s6675_s20 = sld [smem:[#allocation18_spill]] }
 0x53d   : > { %p20_p3 = scmp.ge.s32.totalorder %s6672_s21, 4  }
 0x53f   :  { %22 = sbr.rel (!%p20_p3) target bundleno = 10 (0xa), region = 162 }
 0x544   :  { %4311 = vsyncpa [#allocation4], 1 }
 0x545   :  { %4313 = vsyncpa [#allocation4 + $0x1], 1 }
 0x546   :  { %4314 = vsyncpa [#allocation7], 1 }
 0x547   :  { %4315 = vsyncpa [#allocation5], 1 }
 0x548   :  { %4317 = vsyncpa [#allocation5 + $0x1], 1 }

</bundles_post_ra>
